<compile_context>
chip_gen: v7x
topology: tpu7x:2x2x1
jax: 0.10.0
libtpu: 0.0.40
codegen_flags: <defaults>
</compile_context>

<pallas_src>
import collections
import functools

import jax
import jax.numpy as jnp
from jax.experimental import pallas as pl
from jax.experimental.pallas import tpu as pltpu

_BN_EPS = 1e-5
_ACT_DTYPE = jnp.bfloat16     # HBM activation dtype / MXU operand dtype

Genotype = collections.namedtuple("Genotype", "reduce reduce_concat up up_concat")
GENOTYPE = Genotype(
    reduce=[("conv_3x3", 0), ("conv_3x3", 1), ("skip_connect", 2), ("conv_3x3", 0)],
    reduce_concat=[2, 3],
    up=[("up_conv_3x3", 0), ("up_conv_3x3", 1), ("conv_3x3", 2), ("skip_connect", 2)],
    up_concat=[2, 3],
)


# ----------------------------------------------------------------------------
# The single Pallas kernel: fused (ReLU) -> tap-gather -> deep-K matmul ->
# shift (+ tanh) for one batch image, channels-first, flattened spatial lanes.
# ----------------------------------------------------------------------------
def _tap_conv_kernel(x_ref, w_ref, shift_ref, o_ref, *, tap_src, tap_off,
                     l_out, pre_relu, post_tanh, out_scale):
    # x_ref:     (S, Cin, Lsrc)  bf16  -- S flattened padded source planes.
    # w_ref:     (Cout, T*Cin)   bf16  -- BN-scale folded; column block t = tap t.
    # shift_ref: (Cout, 1)       f32   -- BN shift / conv bias.
    # o_ref:     (Cout, Lout)          -- Lout = oh * row_pitch (lane-dense).
    x = x_ref[...]
    if pre_relu:
        x = jnp.maximum(x, 0)
    # Every tap is a contiguous lane-slice of a flattened source plane, so the
    # patch slab is assembled in registers/VMEM -- no HBM im2col.  One deep-K
    # matmul (K = T*Cin) replaces T tiny-K MXU calls.
    parts = [x[s, :, off:off + l_out] for s, off in zip(tap_src, tap_off)]
    if len(parts) == 1:
        slab = parts[0]
    else:
        cin = x.shape[1]
        slab = jnp.stack(parts, axis=0).reshape(len(parts) * cin, l_out)
    acc = jnp.dot(w_ref[...], slab, preferred_element_type=jnp.float32)
    acc = acc + shift_ref[...]
    if post_tanh:
        acc = jnp.tanh(acc) * out_scale
    o_ref[...] = acc.astype(o_ref.dtype)


def _tap_conv(src, w_mat, shift, tap_src, tap_off, l_out, *, pre_relu,
              post_tanh=False, out_scale=1.0, out_dtype=_ACT_DTYPE):
    n, n_src, cin, lsrc = src.shape
    cout, k_tot = w_mat.shape
    kernel = functools.partial(
        _tap_conv_kernel, tap_src=tuple(tap_src), tap_off=tuple(tap_off),
        l_out=l_out, pre_relu=pre_relu, post_tanh=post_tanh,
        out_scale=out_scale)
    out_itemsize = jnp.dtype(out_dtype).itemsize
    return pl.pallas_call(
        kernel,
        out_shape=jax.ShapeDtypeStruct((n, cout, l_out), out_dtype),
        grid=(n,),
        in_specs=[
            pl.BlockSpec((None, n_src, cin, lsrc), lambda b: (b, 0, 0, 0)),
            pl.BlockSpec((cout, k_tot), lambda b: (0, 0)),
            pl.BlockSpec((cout, 1), lambda b: (0, 0)),
        ],
        out_specs=pl.BlockSpec((None, cout, l_out), lambda b: (b, 0, 0)),
        compiler_params=pltpu.CompilerParams(
            dimension_semantics=("parallel",)),
        cost_estimate=pl.CostEstimate(
            flops=2 * n * cout * k_tot * l_out,
            transcendentals=(n * cout * l_out) if post_tanh else 0,
            bytes_accessed=int(2 * (n * n_src * cin * lsrc + cout * k_tot)
                               + 4 * cout + n * cout * l_out * out_itemsize)),
    )(src, w_mat, shift)


# ----------------------------------------------------------------------------
# Wrapper-side source construction (pads / strided slices / free reshapes on
# bf16 activations -- no im2col slab, no wrapper ReLU or cast passes).
# ----------------------------------------------------------------------------
def _sources_stride1(x, kh, kw, pad):
    n, cin, h, w = x.shape
    hp, wp = h + 2 * pad, w + 2 * pad
    oh, ow = hp - kh + 1, wp - kw + 1
    if pad:
        x = jnp.pad(x, ((0, 0), (0, 0), (pad, pad), (pad, pad)))
    l_out = oh * wp                                    # row pitch = wp
    src = x.reshape(n, 1, cin, hp * wp)
    tap_src, tap_off = [], []
    for di in range(kh):
        for dj in range(kw):
            tap_src.append(0)
            tap_off.append(di * wp + dj)
    tail = max(0, max(tap_off) + l_out - hp * wp)
    if tail:
        src = jnp.pad(src, ((0, 0), (0, 0), (0, 0), (0, tail)))
    return src, tap_src, tap_off, oh, ow, wp, l_out


def _sources_stride2(x, kh, kw, pad):
    # Phase-split the (padded) input into its 4 parity sub-images so a strided
    # conv becomes plain contiguous tap slices inside the kernel.
    n, cin, h, w = x.shape
    hp, wp = h + 2 * pad, w + 2 * pad
    oh, ow = (hp - kh) // 2 + 1, (wp - kw) // 2 + 1
    he, we = (hp + 1) // 2, (wp + 1) // 2
    if pad:
        x = jnp.pad(x, ((0, 0), (0, 0), (pad, pad), (pad, pad)))
    phases = []
    for r in range(2):
        for c in range(2):
            ph = x[:, :, r::2, c::2]
            ph = jnp.pad(ph, ((0, 0), (0, 0), (0, he - ph.shape[2]),
                              (0, we - ph.shape[3])))
            phases.append(ph.reshape(n, cin, he * we))
    src = jnp.stack(phases, axis=1)                    # (N, 4, Cin, he*we)
    l_out = oh * we                                    # row pitch = we
    tap_src, tap_off = [], []
    for ki in range(kh):
        for kj in range(kw):
            tap_src.append((ki % 2) * 2 + (kj % 2))
            tap_off.append((ki // 2) * we + (kj // 2))
    tail = max(0, max(tap_off) + l_out - he * we)
    if tail:
        src = jnp.pad(src, ((0, 0), (0, 0), (0, 0), (0, tail)))
    return src, tap_src, tap_off, oh, ow, we, l_out


def conv2d(x, w_oihw, scale, shift, *, stride=1, pad=0, pre_relu=False,
           post_tanh=False, out_scale=1.0, out_dtype=_ACT_DTYPE):
    """(ReLU?) -> Conv2d(stride, pad; OIHW weights) -> +shift [-> scale*tanh].

    Eval-mode BN scale is folded into the weight rows; ReLU, tap gather,
    matmul and epilogue run inside a single Pallas kernel."""
    assert stride in (1, 2)
    cout, cin, kh, kw = w_oihw.shape
    x = x.astype(_ACT_DTYPE)
    if stride == 1:
        src, tap_src, tap_off, oh, ow, pitch, l_out = _sources_stride1(x, kh, kw, pad)
    else:
        src, tap_src, tap_off, oh, ow, pitch, l_out = _sources_stride2(x, kh, kw, pad)
    w_folded = (w_oihw * scale.reshape(cout, 1, 1, 1)).astype(jnp.float32)
    # column block t = tap t (matches the builders' (ki, kj) row-major order)
    w_mat = jnp.transpose(w_folded, (0, 2, 3, 1)).reshape(cout, kh * kw * cin)
    w_mat = w_mat.astype(_ACT_DTYPE)
    shift = shift.reshape(cout, 1).astype(jnp.float32)
    z = _tap_conv(src, w_mat, shift, tap_src, tap_off, l_out,
                  pre_relu=pre_relu, post_tanh=post_tanh, out_scale=out_scale,
                  out_dtype=out_dtype)
    n = x.shape[0]
    y = z.reshape(n, cout, oh, pitch)
    if pitch != ow:
        y = y[:, :, :, :ow]        # drop the row-wrap columns of the flat layout
    return y


# ----------------------------------------------------------------------------
# Op-level glue.
# ----------------------------------------------------------------------------
_UP_RHO = ((0, 1, 1), (1, 1, 2))   # pad-1 source offset used by output phase a
                                   # for original 3x3 tap index k


def _upconv_phase_weights(w_oihw):
    """Fold the x2 nearest-neighbour upsample into the 3x3 conv weights.

    Returns a (4*Cout, Cin, 3, 3) weight for an equivalent stride-1 pad-1 conv
    over the ORIGINAL-resolution input; output-channel block p = a*2+b holds
    output phase (a, b) (rows 2i+a, cols 2j+b of the upsampled output)."""
    cout, cin, kh, kw = w_oihw.shape
    assert (kh, kw) == (3, 3)
    sel = jnp.array([[[1.0 if _UP_RHO[a][k] == d else 0.0 for k in range(3)]
                      for d in range(3)] for a in range(2)], jnp.float32)
    w_eff = jnp.einsum("adk,bel,ockl->abocde", sel, sel, w_oihw)
    return w_eff.reshape(4 * cout, cin, 3, 3)


def _interleave_phases(z):
    # z: (N, 4*Cout, H, W), channel blocks ordered by phase (a, b) row-major.
    n, c4, h, w = z.shape
    cout = c4 // 4
    z = z.reshape(n, 2, 2, cout, h, w)
    z = jnp.transpose(z, (0, 3, 4, 1, 5, 2))           # (N, Cout, H, 2, W, 2)
    return z.reshape(n, cout, 2 * h, 2 * w)


def _conv_branch(op, x):
    """(input, OIHW weight, scale, shift, stride, needs_phase_interleave)."""
    if op["kind"] == "conv_3x3":
        return x, op["w"], op["scale"], op["shift"], op["stride"], False
    if op["kind"] == "up_conv_3x3":
        w_eff = _upconv_phase_weights(op["w"])
        return (x, w_eff, jnp.tile(op["scale"], 4), jnp.tile(op["shift"], 4),
                1, True)
    return None


def apply_op(op, x):
    k = op["kind"]
    if k == "identity":
        return x
    if k == "conv_3x3":
        return conv2d(x, op["w"], op["scale"], op["shift"],
                      stride=op["stride"], pad=1, pre_relu=True)
    if k == "up_conv_3x3":
        w_eff = _upconv_phase_weights(op["w"])
        y = conv2d(x, w_eff, jnp.tile(op["scale"], 4), jnp.tile(op["shift"], 4),
                   stride=1, pad=1, pre_relu=True)
        return _interleave_phases(y)
    raise ValueError(k)


def apply_pair(op1, x1, op2, x2):
    """h1 + h2 for one cell node.  When both ops are convs with identical
    geometry they run as ONE Pallas conv: channel-concat of the inputs and
    Cin-concat of the scale-folded weights (the add is free in the f32
    accumulator).  Valid because ReLU commutes with channel concat and with
    nearest-neighbour upsampling (pointwise selection)."""
    b1 = _conv_branch(op1, x1)
    b2 = _conv_branch(op2, x2)
    if b1 is not None and b2 is not None:
        xa, wa, sca, sha, sta, pha = b1
        xb, wb, scb, shb, stb, phb = b2
        if (sta == stb and pha == phb
                and xa.shape[0] == xb.shape[0] and xa.shape[2:] == xb.shape[2:]
                and wa.shape[0] == wb.shape[0] and wa.shape[2:] == wb.shape[2:]):
            xc = jnp.concatenate([xa.astype(_ACT_DTYPE), xb.astype(_ACT_DTYPE)],
                                 axis=1)
            wfa = wa * sca.reshape(-1, 1, 1, 1)
            wfb = wb * scb.reshape(-1, 1, 1, 1)
            wc = jnp.concatenate([wfa, wfb], axis=1)   # concat along Cin
            cout = wc.shape[0]
            y = conv2d(xc, wc, jnp.ones((cout,), jnp.float32), sha + shb,
                       stride=sta, pad=1, pre_relu=True)
            return _interleave_phases(y) if pha else y
    return apply_op(op1, x1) + apply_op(op2, x2)


def apply_fact_reduce(p, x):
    # FactorizedReduce: ReLU -> [1x1/s2 on x | 1x1/s2 on x[:,:,1:,1:]] ->
    # concat(C) -> BN, expressed as ONE 2x2/s2 block-sparse conv (taps (0,0)
    # and (1,1)) so it is a single kernel launch.
    chalf, cin = p["w1"].shape[0], p["w1"].shape[1]
    w = jnp.zeros((2 * chalf, cin, 2, 2), jnp.float32)
    w = w.at[:chalf, :, 0, 0].set(p["w1"][:, :, 0, 0])
    w = w.at[chalf:, :, 1, 1].set(p["w2"][:, :, 0, 0])
    return conv2d(x, w, p["scale"], p["shift"], stride=2, pad=0, pre_relu=True)


def apply_pre(p, x):
    if p["kind"] == "rcb":
        return conv2d(x, p["w"], p["scale"], p["shift"],
                      stride=1, pad=0, pre_relu=True)
    return apply_fact_reduce(p, x)


def apply_pres(cell, s0, s1):
    """preprocess0 + preprocess1.  Both-1x1 cases fuse into a single Pallas
    call (Cout-stacked when they share the input tensor, block-diagonal over a
    channel concat otherwise)."""
    p0, p1 = cell["pre0"], cell["pre1"]
    if (p0["kind"] == "rcb" and p1["kind"] == "rcb"
            and s0.shape[0] == s1.shape[0] and s0.shape[2:] == s1.shape[2:]):
        c0, c1 = p0["w"].shape[0], p1["w"].shape[0]
        scale = jnp.concatenate([p0["scale"], p1["scale"]])
        shift = jnp.concatenate([p0["shift"], p1["shift"]])
        if s0 is s1:
            w = jnp.concatenate([p0["w"], p1["w"]], axis=0)
            y = conv2d(s0, w, scale, shift, stride=1, pad=0, pre_relu=True)
        else:
            cin0, cin1 = p0["w"].shape[1], p1["w"].shape[1]
            w = jnp.zeros((c0 + c1, cin0 + cin1, 1, 1), jnp.float32)
            w = w.at[:c0, :cin0].set(p0["w"])
            w = w.at[c0:, cin0:].set(p1["w"])
            x = jnp.concatenate([s0.astype(_ACT_DTYPE), s1.astype(_ACT_DTYPE)],
                                axis=1)
            y = conv2d(x, w, scale, shift, stride=1, pad=0, pre_relu=True)
        return y[:, :c0], y[:, c0:]
    return apply_pre(p0, s0), apply_pre(p1, s1)


def apply_cell(cell, s0, s1):
    s0, s1 = apply_pres(cell, s0, s1)
    states = [s0, s1]
    for i in range(cell["steps"]):
        i1 = cell["indices"][2 * i]
        i2 = cell["indices"][2 * i + 1]
        states.append(apply_pair(cell["ops"][2 * i], states[i1],
                                 cell["ops"][2 * i + 1], states[i2]))
    return jnp.concatenate([states[i] for i in cell["concat"]], axis=1)


def nasg_forward(params, x_nchw):
    x = x_nchw.astype(_ACT_DTYPE)                      # NCHW end to end
    s = conv2d(x, params["stem0_w"], params["stem0_scale"],
               params["stem0_shift"], stride=1, pad=3, pre_relu=False)
    s0 = s1 = s
    down_states = [s1]
    for i, cell in enumerate(params["cells"]):
        if cell["cell_class"] == -1:
            s0, s1 = s1, apply_cell(cell, s0, s1)
            down_states.append(s1)
        elif cell["cell_class"] == 1:
            s0 = down_states[-(i + 2 - len(down_states))]
            s1 = apply_cell(cell, s0, s1)
    # stem1 (ReLU + 3x3 conv with bias) and 10/255 * tanh fused in the kernel.
    cout = params["stem1_w"].shape[0]
    return conv2d(s1, params["stem1_w"], jnp.ones((cout,), jnp.float32),
                  params["stem1_b"], stride=1, pad=1, pre_relu=True,
                  post_tanh=True, out_scale=10.0 / 255.0,
                  out_dtype=jnp.float32)


# ----------------------------------------------------------------------------
# Parameter construction (deterministic, mirrors NASG.__init__ shapes; OIHW).
# ----------------------------------------------------------------------------
class _KeyGen:
    def __init__(self, key, n=512):
        self._keys = iter(jax.random.split(key, n))

    def __call__(self):
        return next(self._keys)


def _winit(key, shape, std=0.1):
    return std * jax.random.normal(key, shape, jnp.float32)


def bn_scale_shift(cout):
    # eval-mode BN with default running stats and gamma=1 / beta=0
    gamma = jnp.ones((cout,), jnp.float32)
    beta = jnp.zeros((cout,), jnp.float32)
    return gamma / jnp.sqrt(1.0 + _BN_EPS), beta


def init_op(nk, name, c, stride):
    if name == "skip_connect":
        assert stride == 1
        return {"kind": "identity"}
    s, b = bn_scale_shift(c)
    if name == "conv_3x3":
        return {"kind": "conv_3x3", "w": _winit(nk(), (c, c, 3, 3)),
                "scale": s, "shift": b, "stride": stride}
    if name == "up_conv_3x3":
        return {"kind": "up_conv_3x3", "w": _winit(nk(), (c, c, 3, 3)),
                "scale": s, "shift": b, "up": stride}
    raise ValueError(name)


def init_cell(nk, genotype, c_pp, c_p, c, cell_class, downsamp_prev):
    cell = {"cell_class": cell_class}
    if downsamp_prev == -1 and cell_class == -1:
        # FactorizedReduce(C_prev_prev, C, affine=False)
        s, b = bn_scale_shift(c)
        cell["pre0"] = {"kind": "fact_reduce",
                        "w1": _winit(nk(), (c // 2, c_pp, 1, 1)),
                        "w2": _winit(nk(), (c // 2, c_pp, 1, 1)),
                        "scale": s, "shift": b}
    elif downsamp_prev == 0 or cell_class == 1:
        # ReLUConvBN(C_prev, C, 1, 1, 0, affine=False)
        s, b = bn_scale_shift(c)
        cell["pre0"] = {"kind": "rcb", "w": _winit(nk(), (c, c_p, 1, 1)),
                        "scale": s, "shift": b}
    # preprocess1 = ReLUConvBN(C_prev, C, 1, 1, 0)
    s, b = bn_scale_shift(c)
    cell["pre1"] = {"kind": "rcb", "w": _winit(nk(), (c, c_p, 1, 1)),
                    "scale": s, "shift": b}

    if cell_class == -1:
        op_names, indices = zip(*genotype.reduce)
        concat = genotype.reduce_concat
    else:
        op_names, indices = zip(*genotype.up)
        concat = genotype.up_concat

    cell["steps"] = len(op_names) // 2
    cell["concat"] = list(concat)
    cell["multiplier"] = len(concat)
    cell["indices"] = list(indices)
    ops = []
    for name, index in zip(op_names, indices):
        stride = 2 if (abs(cell_class) == 1 and index < 2) else 1
        ops.append(init_op(nk, name, c, stride))
    cell["ops"] = ops
    return cell


def init_nasg_params(key, c, layers, genotype, in_channel, out_channel):
    nk = _KeyGen(key)
    params = {}
    # stem0: Conv(in_channel, C, 7, pad=3, bias=False) + BN(C)
    params["stem0_w"] = _winit(nk(), (c, in_channel, 7, 7))
    params["stem0_scale"], params["stem0_shift"] = bn_scale_shift(c)

    cells = []
    c_pp, c_p, c_curr = c, c, c
    downsamp_prev = 0
    for i in range(layers):
        cell_class = -1 if i < layers // 2 else 1
        cell = init_cell(nk, genotype, c_pp, c_p, c_curr, cell_class,
                         downsamp_prev)
        downsamp_prev = cell_class
        cells.append(cell)
        c_pp, c_p = c_p, cell["multiplier"] * c_curr
    params["cells"] = cells

    # stem1: ReLU + Conv(C_prev, out_channel, 3, 1, 1) with bias
    params["stem1_w"] = _winit(nk(), (out_channel, c_p, 3, 3))
    params["stem1_b"] = _winit(nk(), (out_channel,))
    return params


if __name__ == "__main__":
    key = jax.random.PRNGKey(0)
    kp, kx = jax.random.split(key)

    C, layers, in_channel, out_channel = 4, 4, 3, 3
    params = init_nasg_params(kp, C, layers, GENOTYPE, in_channel, out_channel)

    x = jax.random.normal(kx, (2, in_channel, 16, 16), jnp.float32)
    fwd = jax.jit(lambda inp: nasg_forward(params, inp))
    y = jax.block_until_ready(fwd(x))

    assert y.shape == (2, out_channel, 16, 16), y.shape
    assert y.dtype == jnp.float32, y.dtype
    assert bool(jnp.all(jnp.isfinite(y)))
    assert float(jnp.max(jnp.abs(y))) <= 10.0 / 255.0 + 1e-6
    print("KERNEL_OK")
</pallas_src>

<mosaic_0001>
module attributes {stable_mosaic.version = 11 : i64} {
  func.func @_tap_conv_kernel(%arg0: i32, %arg1: memref<1x1x3x490xbf16, #tpu.memory_space<vmem>>, %arg2: memref<4x147xbf16, #tpu.memory_space<vmem>>, %arg3: memref<4x1xf32, #tpu.memory_space<vmem>>, %arg4: memref<1x4x352xbf16, #tpu.memory_space<vmem>>) attributes {dimension_semantics = [#tpu.dimension_semantics<parallel>], iteration_bounds = array<i64: 2>, scalar_prefetch = 0 : i64, scratch_operands = 0 : i64, tpu.core_type = #tpu.core_type<tc>, window_params = [{transform_indices = @transform_0, window_bounds = array<i64: 1, 1, 3, 490>}, {pipeline_mode = #tpu.pipeline_mode<synchronous>, transform_indices = @transform_1, window_bounds = array<i64: 4, 147>}, {pipeline_mode = #tpu.pipeline_mode<synchronous>, transform_indices = @transform_2, window_bounds = array<i64: 4, 1>}, {transform_indices = @transform_3, window_bounds = array<i64: 1, 4, 352>}]} {
    %c0 = arith.constant 0 : index
    %c0_0 = arith.constant 0 : index
    %c0_1 = arith.constant 0 : index
    %c0_2 = arith.constant 0 : index
    %0 = vector.load %arg1[%c0, %c0_0, %c0_1, %c0_2] : memref<1x1x3x490xbf16, #tpu.memory_space<vmem>>, vector<1x1x3x490xbf16>
    %1 = vector.shape_cast %0 : vector<1x1x3x490xbf16> to vector<1x3x490xbf16>
    %2 = vector.extract_strided_slice %1 {offsets = [0, 0, 0], sizes = [1, 3, 352], strides = [1, 1, 1]} : vector<1x3x490xbf16> to vector<1x3x352xbf16>
    %3 = vector.shape_cast %2 : vector<1x3x352xbf16> to vector<3x352xbf16>
    %4 = vector.extract_strided_slice %1 {offsets = [0, 0, 1], sizes = [1, 3, 352], strides = [1, 1, 1]} : vector<1x3x490xbf16> to vector<1x3x352xbf16>
    %5 = vector.shape_cast %4 : vector<1x3x352xbf16> to vector<3x352xbf16>
    %6 = vector.extract_strided_slice %1 {offsets = [0, 0, 2], sizes = [1, 3, 352], strides = [1, 1, 1]} : vector<1x3x490xbf16> to vector<1x3x352xbf16>
    %7 = vector.shape_cast %6 : vector<1x3x352xbf16> to vector<3x352xbf16>
    %8 = vector.extract_strided_slice %1 {offsets = [0, 0, 3], sizes = [1, 3, 352], strides = [1, 1, 1]} : vector<1x3x490xbf16> to vector<1x3x352xbf16>
    %9 = vector.shape_cast %8 : vector<1x3x352xbf16> to vector<3x352xbf16>
    %10 = vector.extract_strided_slice %1 {offsets = [0, 0, 4], sizes = [1, 3, 352], strides = [1, 1, 1]} : vector<1x3x490xbf16> to vector<1x3x352xbf16>
    %11 = vector.shape_cast %10 : vector<1x3x352xbf16> to vector<3x352xbf16>
    %12 = vector.extract_strided_slice %1 {offsets = [0, 0, 5], sizes = [1, 3, 352], strides = [1, 1, 1]} : vector<1x3x490xbf16> to vector<1x3x352xbf16>
    %13 = vector.shape_cast %12 : vector<1x3x352xbf16> to vector<3x352xbf16>
    %14 = vector.extract_strided_slice %1 {offsets = [0, 0, 6], sizes = [1, 3, 352], strides = [1, 1, 1]} : vector<1x3x490xbf16> to vector<1x3x352xbf16>
    %15 = vector.shape_cast %14 : vector<1x3x352xbf16> to vector<3x352xbf16>
    %16 = vector.extract_strided_slice %1 {offsets = [0, 0, 22], sizes = [1, 3, 352], strides = [1, 1, 1]} : vector<1x3x490xbf16> to vector<1x3x352xbf16>
    %17 = vector.shape_cast %16 : vector<1x3x352xbf16> to vector<3x352xbf16>
    %18 = vector.extract_strided_slice %1 {offsets = [0, 0, 23], sizes = [1, 3, 352], strides = [1, 1, 1]} : vector<1x3x490xbf16> to vector<1x3x352xbf16>
    %19 = vector.shape_cast %18 : vector<1x3x352xbf16> to vector<3x352xbf16>
    %20 = vector.extract_strided_slice %1 {offsets = [0, 0, 24], sizes = [1, 3, 352], strides = [1, 1, 1]} : vector<1x3x490xbf16> to vector<1x3x352xbf16>
    %21 = vector.shape_cast %20 : vector<1x3x352xbf16> to vector<3x352xbf16>
    %22 = vector.extract_strided_slice %1 {offsets = [0, 0, 25], sizes = [1, 3, 352], strides = [1, 1, 1]} : vector<1x3x490xbf16> to vector<1x3x352xbf16>
    %23 = vector.shape_cast %22 : vector<1x3x352xbf16> to vector<3x352xbf16>
    %24 = vector.extract_strided_slice %1 {offsets = [0, 0, 26], sizes = [1, 3, 352], strides = [1, 1, 1]} : vector<1x3x490xbf16> to vector<1x3x352xbf16>
    %25 = vector.shape_cast %24 : vector<1x3x352xbf16> to vector<3x352xbf16>
    %26 = vector.extract_strided_slice %1 {offsets = [0, 0, 27], sizes = [1, 3, 352], strides = [1, 1, 1]} : vector<1x3x490xbf16> to vector<1x3x352xbf16>
    %27 = vector.shape_cast %26 : vector<1x3x352xbf16> to vector<3x352xbf16>
    %28 = vector.extract_strided_slice %1 {offsets = [0, 0, 28], sizes = [1, 3, 352], strides = [1, 1, 1]} : vector<1x3x490xbf16> to vector<1x3x352xbf16>
    %29 = vector.shape_cast %28 : vector<1x3x352xbf16> to vector<3x352xbf16>
    %30 = vector.extract_strided_slice %1 {offsets = [0, 0, 44], sizes = [1, 3, 352], strides = [1, 1, 1]} : vector<1x3x490xbf16> to vector<1x3x352xbf16>
    %31 = vector.shape_cast %30 : vector<1x3x352xbf16> to vector<3x352xbf16>
    %32 = vector.extract_strided_slice %1 {offsets = [0, 0, 45], sizes = [1, 3, 352], strides = [1, 1, 1]} : vector<1x3x490xbf16> to vector<1x3x352xbf16>
    %33 = vector.shape_cast %32 : vector<1x3x352xbf16> to vector<3x352xbf16>
    %34 = vector.extract_strided_slice %1 {offsets = [0, 0, 46], sizes = [1, 3, 352], strides = [1, 1, 1]} : vector<1x3x490xbf16> to vector<1x3x352xbf16>
    %35 = vector.shape_cast %34 : vector<1x3x352xbf16> to vector<3x352xbf16>
    %36 = vector.extract_strided_slice %1 {offsets = [0, 0, 47], sizes = [1, 3, 352], strides = [1, 1, 1]} : vector<1x3x490xbf16> to vector<1x3x352xbf16>
    %37 = vector.shape_cast %36 : vector<1x3x352xbf16> to vector<3x352xbf16>
    %38 = vector.extract_strided_slice %1 {offsets = [0, 0, 48], sizes = [1, 3, 352], strides = [1, 1, 1]} : vector<1x3x490xbf16> to vector<1x3x352xbf16>
    %39 = vector.shape_cast %38 : vector<1x3x352xbf16> to vector<3x352xbf16>
    %40 = vector.extract_strided_slice %1 {offsets = [0, 0, 49], sizes = [1, 3, 352], strides = [1, 1, 1]} : vector<1x3x490xbf16> to vector<1x3x352xbf16>
    %41 = vector.shape_cast %40 : vector<1x3x352xbf16> to vector<3x352xbf16>
    %42 = vector.extract_strided_slice %1 {offsets = [0, 0, 50], sizes = [1, 3, 352], strides = [1, 1, 1]} : vector<1x3x490xbf16> to vector<1x3x352xbf16>
    %43 = vector.shape_cast %42 : vector<1x3x352xbf16> to vector<3x352xbf16>
    %44 = vector.extract_strided_slice %1 {offsets = [0, 0, 66], sizes = [1, 3, 352], strides = [1, 1, 1]} : vector<1x3x490xbf16> to vector<1x3x352xbf16>
    %45 = vector.shape_cast %44 : vector<1x3x352xbf16> to vector<3x352xbf16>
    %46 = vector.extract_strided_slice %1 {offsets = [0, 0, 67], sizes = [1, 3, 352], strides = [1, 1, 1]} : vector<1x3x490xbf16> to vector<1x3x352xbf16>
    %47 = vector.shape_cast %46 : vector<1x3x352xbf16> to vector<3x352xbf16>
    %48 = vector.extract_strided_slice %1 {offsets = [0, 0, 68], sizes = [1, 3, 352], strides = [1, 1, 1]} : vector<1x3x490xbf16> to vector<1x3x352xbf16>
    %49 = vector.shape_cast %48 : vector<1x3x352xbf16> to vector<3x352xbf16>
    %50 = vector.extract_strided_slice %1 {offsets = [0, 0, 69], sizes = [1, 3, 352], strides = [1, 1, 1]} : vector<1x3x490xbf16> to vector<1x3x352xbf16>
    %51 = vector.shape_cast %50 : vector<1x3x352xbf16> to vector<3x352xbf16>
    %52 = vector.extract_strided_slice %1 {offsets = [0, 0, 70], sizes = [1, 3, 352], strides = [1, 1, 1]} : vector<1x3x490xbf16> to vector<1x3x352xbf16>
    %53 = vector.shape_cast %52 : vector<1x3x352xbf16> to vector<3x352xbf16>
    %54 = vector.extract_strided_slice %1 {offsets = [0, 0, 71], sizes = [1, 3, 352], strides = [1, 1, 1]} : vector<1x3x490xbf16> to vector<1x3x352xbf16>
    %55 = vector.shape_cast %54 : vector<1x3x352xbf16> to vector<3x352xbf16>
    %56 = vector.extract_strided_slice %1 {offsets = [0, 0, 72], sizes = [1, 3, 352], strides = [1, 1, 1]} : vector<1x3x490xbf16> to vector<1x3x352xbf16>
    %57 = vector.shape_cast %56 : vector<1x3x352xbf16> to vector<3x352xbf16>
    %58 = vector.extract_strided_slice %1 {offsets = [0, 0, 88], sizes = [1, 3, 352], strides = [1, 1, 1]} : vector<1x3x490xbf16> to vector<1x3x352xbf16>
    %59 = vector.shape_cast %58 : vector<1x3x352xbf16> to vector<3x352xbf16>
    %60 = vector.extract_strided_slice %1 {offsets = [0, 0, 89], sizes = [1, 3, 352], strides = [1, 1, 1]} : vector<1x3x490xbf16> to vector<1x3x352xbf16>
    %61 = vector.shape_cast %60 : vector<1x3x352xbf16> to vector<3x352xbf16>
    %62 = vector.extract_strided_slice %1 {offsets = [0, 0, 90], sizes = [1, 3, 352], strides = [1, 1, 1]} : vector<1x3x490xbf16> to vector<1x3x352xbf16>
    %63 = vector.shape_cast %62 : vector<1x3x352xbf16> to vector<3x352xbf16>
    %64 = vector.extract_strided_slice %1 {offsets = [0, 0, 91], sizes = [1, 3, 352], strides = [1, 1, 1]} : vector<1x3x490xbf16> to vector<1x3x352xbf16>
    %65 = vector.shape_cast %64 : vector<1x3x352xbf16> to vector<3x352xbf16>
    %66 = vector.extract_strided_slice %1 {offsets = [0, 0, 92], sizes = [1, 3, 352], strides = [1, 1, 1]} : vector<1x3x490xbf16> to vector<1x3x352xbf16>
    %67 = vector.shape_cast %66 : vector<1x3x352xbf16> to vector<3x352xbf16>
    %68 = vector.extract_strided_slice %1 {offsets = [0, 0, 93], sizes = [1, 3, 352], strides = [1, 1, 1]} : vector<1x3x490xbf16> to vector<1x3x352xbf16>
    %69 = vector.shape_cast %68 : vector<1x3x352xbf16> to vector<3x352xbf16>
    %70 = vector.extract_strided_slice %1 {offsets = [0, 0, 94], sizes = [1, 3, 352], strides = [1, 1, 1]} : vector<1x3x490xbf16> to vector<1x3x352xbf16>
    %71 = vector.shape_cast %70 : vector<1x3x352xbf16> to vector<3x352xbf16>
    %72 = vector.extract_strided_slice %1 {offsets = [0, 0, 110], sizes = [1, 3, 352], strides = [1, 1, 1]} : vector<1x3x490xbf16> to vector<1x3x352xbf16>
    %73 = vector.shape_cast %72 : vector<1x3x352xbf16> to vector<3x352xbf16>
    %74 = vector.extract_strided_slice %1 {offsets = [0, 0, 111], sizes = [1, 3, 352], strides = [1, 1, 1]} : vector<1x3x490xbf16> to vector<1x3x352xbf16>
    %75 = vector.shape_cast %74 : vector<1x3x352xbf16> to vector<3x352xbf16>
    %76 = vector.extract_strided_slice %1 {offsets = [0, 0, 112], sizes = [1, 3, 352], strides = [1, 1, 1]} : vector<1x3x490xbf16> to vector<1x3x352xbf16>
    %77 = vector.shape_cast %76 : vector<1x3x352xbf16> to vector<3x352xbf16>
    %78 = vector.extract_strided_slice %1 {offsets = [0, 0, 113], sizes = [1, 3, 352], strides = [1, 1, 1]} : vector<1x3x490xbf16> to vector<1x3x352xbf16>
    %79 = vector.shape_cast %78 : vector<1x3x352xbf16> to vector<3x352xbf16>
    %80 = vector.extract_strided_slice %1 {offsets = [0, 0, 114], sizes = [1, 3, 352], strides = [1, 1, 1]} : vector<1x3x490xbf16> to vector<1x3x352xbf16>
    %81 = vector.shape_cast %80 : vector<1x3x352xbf16> to vector<3x352xbf16>
    %82 = vector.extract_strided_slice %1 {offsets = [0, 0, 115], sizes = [1, 3, 352], strides = [1, 1, 1]} : vector<1x3x490xbf16> to vector<1x3x352xbf16>
    %83 = vector.shape_cast %82 : vector<1x3x352xbf16> to vector<3x352xbf16>
    %84 = vector.extract_strided_slice %1 {offsets = [0, 0, 116], sizes = [1, 3, 352], strides = [1, 1, 1]} : vector<1x3x490xbf16> to vector<1x3x352xbf16>
    %85 = vector.shape_cast %84 : vector<1x3x352xbf16> to vector<3x352xbf16>
    %86 = vector.extract_strided_slice %1 {offsets = [0, 0, 132], sizes = [1, 3, 352], strides = [1, 1, 1]} : vector<1x3x490xbf16> to vector<1x3x352xbf16>
    %87 = vector.shape_cast %86 : vector<1x3x352xbf16> to vector<3x352xbf16>
    %88 = vector.extract_strided_slice %1 {offsets = [0, 0, 133], sizes = [1, 3, 352], strides = [1, 1, 1]} : vector<1x3x490xbf16> to vector<1x3x352xbf16>
    %89 = vector.shape_cast %88 : vector<1x3x352xbf16> to vector<3x352xbf16>
    %90 = vector.extract_strided_slice %1 {offsets = [0, 0, 134], sizes = [1, 3, 352], strides = [1, 1, 1]} : vector<1x3x490xbf16> to vector<1x3x352xbf16>
    %91 = vector.shape_cast %90 : vector<1x3x352xbf16> to vector<3x352xbf16>
    %92 = vector.extract_strided_slice %1 {offsets = [0, 0, 135], sizes = [1, 3, 352], strides = [1, 1, 1]} : vector<1x3x490xbf16> to vector<1x3x352xbf16>
    %93 = vector.shape_cast %92 : vector<1x3x352xbf16> to vector<3x352xbf16>
    %94 = vector.extract_strided_slice %1 {offsets = [0, 0, 136], sizes = [1, 3, 352], strides = [1, 1, 1]} : vector<1x3x490xbf16> to vector<1x3x352xbf16>
    %95 = vector.shape_cast %94 : vector<1x3x352xbf16> to vector<3x352xbf16>
    %96 = vector.extract_strided_slice %1 {offsets = [0, 0, 137], sizes = [1, 3, 352], strides = [1, 1, 1]} : vector<1x3x490xbf16> to vector<1x3x352xbf16>
    %97 = vector.shape_cast %96 : vector<1x3x352xbf16> to vector<3x352xbf16>
    %98 = vector.extract_strided_slice %1 {offsets = [0, 0, 138], sizes = [1, 3, 352], strides = [1, 1, 1]} : vector<1x3x490xbf16> to vector<1x3x352xbf16>
    %99 = vector.shape_cast %98 : vector<1x3x352xbf16> to vector<3x352xbf16>
    %100 = vector.shape_cast %3 : vector<3x352xbf16> to vector<1x3x352xbf16>
    %101 = vector.shape_cast %5 : vector<3x352xbf16> to vector<1x3x352xbf16>
    %102 = vector.shape_cast %7 : vector<3x352xbf16> to vector<1x3x352xbf16>
    %103 = vector.shape_cast %9 : vector<3x352xbf16> to vector<1x3x352xbf16>
    %104 = vector.shape_cast %11 : vector<3x352xbf16> to vector<1x3x352xbf16>
    %105 = vector.shape_cast %13 : vector<3x352xbf16> to vector<1x3x352xbf16>
    %106 = vector.shape_cast %15 : vector<3x352xbf16> to vector<1x3x352xbf16>
    %107 = vector.shape_cast %17 : vector<3x352xbf16> to vector<1x3x352xbf16>
    %108 = vector.shape_cast %19 : vector<3x352xbf16> to vector<1x3x352xbf16>
    %109 = vector.shape_cast %21 : vector<3x352xbf16> to vector<1x3x352xbf16>
    %110 = vector.shape_cast %23 : vector<3x352xbf16> to vector<1x3x352xbf16>
    %111 = vector.shape_cast %25 : vector<3x352xbf16> to vector<1x3x352xbf16>
    %112 = vector.shape_cast %27 : vector<3x352xbf16> to vector<1x3x352xbf16>
    %113 = vector.shape_cast %29 : vector<3x352xbf16> to vector<1x3x352xbf16>
    %114 = vector.shape_cast %31 : vector<3x352xbf16> to vector<1x3x352xbf16>
    %115 = vector.shape_cast %33 : vector<3x352xbf16> to vector<1x3x352xbf16>
    %116 = vector.shape_cast %35 : vector<3x352xbf16> to vector<1x3x352xbf16>
    %117 = vector.shape_cast %37 : vector<3x352xbf16> to vector<1x3x352xbf16>
    %118 = vector.shape_cast %39 : vector<3x352xbf16> to vector<1x3x352xbf16>
    %119 = vector.shape_cast %41 : vector<3x352xbf16> to vector<1x3x352xbf16>
    %120 = vector.shape_cast %43 : vector<3x352xbf16> to vector<1x3x352xbf16>
    %121 = vector.shape_cast %45 : vector<3x352xbf16> to vector<1x3x352xbf16>
    %122 = vector.shape_cast %47 : vector<3x352xbf16> to vector<1x3x352xbf16>
    %123 = vector.shape_cast %49 : vector<3x352xbf16> to vector<1x3x352xbf16>
    %124 = vector.shape_cast %51 : vector<3x352xbf16> to vector<1x3x352xbf16>
    %125 = vector.shape_cast %53 : vector<3x352xbf16> to vector<1x3x352xbf16>
    %126 = vector.shape_cast %55 : vector<3x352xbf16> to vector<1x3x352xbf16>
    %127 = vector.shape_cast %57 : vector<3x352xbf16> to vector<1x3x352xbf16>
    %128 = vector.shape_cast %59 : vector<3x352xbf16> to vector<1x3x352xbf16>
    %129 = vector.shape_cast %61 : vector<3x352xbf16> to vector<1x3x352xbf16>
    %130 = vector.shape_cast %63 : vector<3x352xbf16> to vector<1x3x352xbf16>
    %131 = vector.shape_cast %65 : vector<3x352xbf16> to vector<1x3x352xbf16>
    %132 = vector.shape_cast %67 : vector<3x352xbf16> to vector<1x3x352xbf16>
    %133 = vector.shape_cast %69 : vector<3x352xbf16> to vector<1x3x352xbf16>
    %134 = vector.shape_cast %71 : vector<3x352xbf16> to vector<1x3x352xbf16>
    %135 = vector.shape_cast %73 : vector<3x352xbf16> to vector<1x3x352xbf16>
    %136 = vector.shape_cast %75 : vector<3x352xbf16> to vector<1x3x352xbf16>
    %137 = vector.shape_cast %77 : vector<3x352xbf16> to vector<1x3x352xbf16>
    %138 = vector.shape_cast %79 : vector<3x352xbf16> to vector<1x3x352xbf16>
    %139 = vector.shape_cast %81 : vector<3x352xbf16> to vector<1x3x352xbf16>
    %140 = vector.shape_cast %83 : vector<3x352xbf16> to vector<1x3x352xbf16>
    %141 = vector.shape_cast %85 : vector<3x352xbf16> to vector<1x3x352xbf16>
    %142 = vector.shape_cast %87 : vector<3x352xbf16> to vector<1x3x352xbf16>
    %143 = vector.shape_cast %89 : vector<3x352xbf16> to vector<1x3x352xbf16>
    %144 = vector.shape_cast %91 : vector<3x352xbf16> to vector<1x3x352xbf16>
    %145 = vector.shape_cast %93 : vector<3x352xbf16> to vector<1x3x352xbf16>
    %146 = vector.shape_cast %95 : vector<3x352xbf16> to vector<1x3x352xbf16>
    %147 = vector.shape_cast %97 : vector<3x352xbf16> to vector<1x3x352xbf16>
    %148 = vector.shape_cast %99 : vector<3x352xbf16> to vector<1x3x352xbf16>
    %149 = tpu.concatenate %100, %101, %102, %103, %104, %105, %106, %107, %108, %109, %110, %111, %112, %113, %114, %115 in 0 : vector<1x3x352xbf16>, vector<1x3x352xbf16>, vector<1x3x352xbf16>, vector<1x3x352xbf16>, vector<1x3x352xbf16>, vector<1x3x352xbf16>, vector<1x3x352xbf16>, vector<1x3x352xbf16>, vector<1x3x352xbf16>, vector<1x3x352xbf16>, vector<1x3x352xbf16>, vector<1x3x352xbf16>, vector<1x3x352xbf16>, vector<1x3x352xbf16>, vector<1x3x352xbf16>, vector<1x3x352xbf16> -> vector<16x3x352xbf16>
    %150 = tpu.concatenate %116, %117, %118, %119, %120, %121, %122, %123, %124, %125, %126, %127, %128, %129, %130, %131 in 0 : vector<1x3x352xbf16>, vector<1x3x352xbf16>, vector<1x3x352xbf16>, vector<1x3x352xbf16>, vector<1x3x352xbf16>, vector<1x3x352xbf16>, vector<1x3x352xbf16>, vector<1x3x352xbf16>, vector<1x3x352xbf16>, vector<1x3x352xbf16>, vector<1x3x352xbf16>, vector<1x3x352xbf16>, vector<1x3x352xbf16>, vector<1x3x352xbf16>, vector<1x3x352xbf16>, vector<1x3x352xbf16> -> vector<16x3x352xbf16>
    %151 = tpu.concatenate %132, %133, %134, %135, %136, %137, %138, %139, %140, %141, %142, %143, %144, %145, %146, %147 in 0 : vector<1x3x352xbf16>, vector<1x3x352xbf16>, vector<1x3x352xbf16>, vector<1x3x352xbf16>, vector<1x3x352xbf16>, vector<1x3x352xbf16>, vector<1x3x352xbf16>, vector<1x3x352xbf16>, vector<1x3x352xbf16>, vector<1x3x352xbf16>, vector<1x3x352xbf16>, vector<1x3x352xbf16>, vector<1x3x352xbf16>, vector<1x3x352xbf16>, vector<1x3x352xbf16>, vector<1x3x352xbf16> -> vector<16x3x352xbf16>
    %152 = tpu.concatenate %149, %150, %151, %148 in 0 : vector<16x3x352xbf16>, vector<16x3x352xbf16>, vector<16x3x352xbf16>, vector<1x3x352xbf16> -> vector<49x3x352xbf16>
    %153 = vector.shape_cast %152 : vector<49x3x352xbf16> to vector<147x352xbf16>
    %c0_3 = arith.constant 0 : index
    %c0_4 = arith.constant 0 : index
    %154 = vector.load %arg2[%c0_3, %c0_4] : memref<4x147xbf16, #tpu.memory_space<vmem>>, vector<4x147xbf16>
    %cst = arith.constant dense<0.000000e+00> : vector<4x352xf32>
    %155 = tpu.matmul %154, %153, %cst {dimension_numbers = #tpu.dot_dimension_numbers<[1], [0], [0], [1], [0, 0, 1, 1], [], []>} : vector<4x147xbf16>, vector<147x352xbf16>, vector<4x352xf32> -> vector<4x352xf32>
    %c0_5 = arith.constant 0 : index
    %c0_6 = arith.constant 0 : index
    %156 = vector.load %arg3[%c0_5, %c0_6] : memref<4x1xf32, #tpu.memory_space<vmem>>, vector<4x1xf32>
    %157 = vector.broadcast %156 : vector<4x1xf32> to vector<4x352xf32>
    %158 = arith.addf %155, %157 : vector<4x352xf32>
    %159 = arith.truncf %158 : vector<4x352xf32> to vector<4x352xbf16>
    %c0_7 = arith.constant 0 : index
    %c0_8 = arith.constant 0 : index
    %c0_9 = arith.constant 0 : index
    %160 = vector.load %arg4[%c0_7, %c0_8, %c0_9] : memref<1x4x352xbf16, #tpu.memory_space<vmem>>, vector<1x4x352xbf16>
    %161 = vector.shape_cast %160 : vector<1x4x352xbf16> to vector<4x352xbf16>
    %162 = vector.shape_cast %159 : vector<4x352xbf16> to vector<1x4x352xbf16>
    tpu.vector_store %arg4[%c0_7, %c0_8, %c0_9], %162 {strides = array<i32>} : memref<1x4x352xbf16, #tpu.memory_space<vmem>>, vector<1x4x352xbf16>,
    return
  }
  func.func @transform_0(%arg0: i32) -> (i32, i32, i32, i32) {
    %c0_i32 = arith.constant 0 : i32
    %c0_i32_0 = arith.constant 0 : i32
    %c0_i32_1 = arith.constant 0 : i32
    %c0_i32_2 = arith.constant 0 : i32
    return %arg0, %c0_i32, %c0_i32_0, %c0_i32_1 : i32, i32, i32, i32
  }
  func.func @transform_1(%arg0: i32) -> (i32, i32) {
    %c0_i32 = arith.constant 0 : i32
    %c0_i32_0 = arith.constant 0 : i32
    %c0_i32_1 = arith.constant 0 : i32
    return %c0_i32, %c0_i32_0 : i32, i32
  }
  func.func @transform_2(%arg0: i32) -> (i32, i32) {
    %c0_i32 = arith.constant 0 : i32
    %c0_i32_0 = arith.constant 0 : i32
    %c0_i32_1 = arith.constant 0 : i32
    return %c0_i32, %c0_i32_0 : i32, i32
  }
  func.func @transform_3(%arg0: i32) -> (i32, i32, i32) {
    %c0_i32 = arith.constant 0 : i32
    %c0_i32_0 = arith.constant 0 : i32
    %c0_i32_1 = arith.constant 0 : i32
    return %arg0, %c0_i32, %c0_i32_0 : i32, i32, i32
  }
}

module attributes {stable_mosaic.version = 11 : i64} {
  func.func @_tap_conv_kernel(%arg0: i32, %arg1: memref<1x1x4x256xbf16, #tpu.memory_space<vmem>>, %arg2: memref<8x4xbf16, #tpu.memory_space<vmem>>, %arg3: memref<8x1xf32, #tpu.memory_space<vmem>>, %arg4: memref<1x8x256xbf16, #tpu.memory_space<vmem>>) attributes {dimension_semantics = [#tpu.dimension_semantics<parallel>], iteration_bounds = array<i64: 2>, scalar_prefetch = 0 : i64, scratch_operands = 0 : i64, tpu.core_type = #tpu.core_type<tc>, window_params = [{transform_indices = @transform_0, window_bounds = array<i64: 1, 1, 4, 256>}, {pipeline_mode = #tpu.pipeline_mode<synchronous>, transform_indices = @transform_1, window_bounds = array<i64: 8, 4>}, {pipeline_mode = #tpu.pipeline_mode<synchronous>, transform_indices = @transform_2, window_bounds = array<i64: 8, 1>}, {transform_indices = @transform_3, window_bounds = array<i64: 1, 8, 256>}]} {
    %c0 = arith.constant 0 : index
    %c0_0 = arith.constant 0 : index
    %c0_1 = arith.constant 0 : index
    %c0_2 = arith.constant 0 : index
    %0 = vector.load %arg1[%c0, %c0_0, %c0_1, %c0_2] : memref<1x1x4x256xbf16, #tpu.memory_space<vmem>>, vector<1x1x4x256xbf16>
    %1 = vector.shape_cast %0 : vector<1x1x4x256xbf16> to vector<1x4x256xbf16>
    %cst = arith.constant 0.000000e+00 : bf16
    %2 = vector.broadcast %cst : bf16 to vector<1x4x256xbf16>
    %3 = arith.maximumf %1, %2 : vector<1x4x256xbf16>
    %4 = vector.shape_cast %3 : vector<1x4x256xbf16> to vector<4x256xbf16>
    %c0_3 = arith.constant 0 : index
    %c0_4 = arith.constant 0 : index
    %5 = vector.load %arg2[%c0_3, %c0_4] : memref<8x4xbf16, #tpu.memory_space<vmem>>, vector<8x4xbf16>
    %cst_5 = arith.constant dense<0.000000e+00> : vector<8x256xf32>
    %6 = tpu.matmul %5, %4, %cst_5 {dimension_numbers = #tpu.dot_dimension_numbers<[1], [0], [0], [1], [0, 0, 1, 1], [], []>} : vector<8x4xbf16>, vector<4x256xbf16>, vector<8x256xf32> -> vector<8x256xf32>
    %c0_6 = arith.constant 0 : index
    %c0_7 = arith.constant 0 : index
    %7 = vector.load %arg3[%c0_6, %c0_7] : memref<8x1xf32, #tpu.memory_space<vmem>>, vector<8x1xf32>
    %8 = vector.broadcast %7 : vector<8x1xf32> to vector<8x256xf32>
    %9 = arith.addf %6, %8 : vector<8x256xf32>
    %10 = arith.truncf %9 : vector<8x256xf32> to vector<8x256xbf16>
    %c0_8 = arith.constant 0 : index
    %c0_9 = arith.constant 0 : index
    %c0_10 = arith.constant 0 : index
    %11 = vector.load %arg4[%c0_8, %c0_9, %c0_10] : memref<1x8x256xbf16, #tpu.memory_space<vmem>>, vector<1x8x256xbf16>
    %12 = vector.shape_cast %11 : vector<1x8x256xbf16> to vector<8x256xbf16>
    %13 = vector.shape_cast %10 : vector<8x256xbf16> to vector<1x8x256xbf16>
    tpu.vector_store %arg4[%c0_8, %c0_9, %c0_10], %13 {strides = array<i32>} : memref<1x8x256xbf16, #tpu.memory_space<vmem>>, vector<1x8x256xbf16>,
    return
  }
  func.func @transform_0(%arg0: i32) -> (i32, i32, i32, i32) {
    %c0_i32 = arith.constant 0 : i32
    %c0_i32_0 = arith.constant 0 : i32
    %c0_i32_1 = arith.constant 0 : i32
    %c0_i32_2 = arith.constant 0 : i32
    return %arg0, %c0_i32, %c0_i32_0, %c0_i32_1 : i32, i32, i32, i32
  }
  func.func @transform_1(%arg0: i32) -> (i32, i32) {
    %c0_i32 = arith.constant 0 : i32
    %c0_i32_0 = arith.constant 0 : i32
    %c0_i32_1 = arith.constant 0 : i32
    return %c0_i32, %c0_i32_0 : i32, i32
  }
  func.func @transform_2(%arg0: i32) -> (i32, i32) {
    %c0_i32 = arith.constant 0 : i32
    %c0_i32_0 = arith.constant 0 : i32
    %c0_i32_1 = arith.constant 0 : i32
    return %c0_i32, %c0_i32_0 : i32, i32
  }
  func.func @transform_3(%arg0: i32) -> (i32, i32, i32) {
    %c0_i32 = arith.constant 0 : i32
    %c0_i32_0 = arith.constant 0 : i32
    %c0_i32_1 = arith.constant 0 : i32
    return %arg0, %c0_i32, %c0_i32_0 : i32, i32, i32
  }
}

module attributes {stable_mosaic.version = 11 : i64} {
  func.func @_tap_conv_kernel(%arg0: i32, %arg1: memref<1x4x4x64xbf16, #tpu.memory_space<vmem>>, %arg2: memref<4x16xbf16, #tpu.memory_space<vmem>>, %arg3: memref<4x1xf32, #tpu.memory_space<vmem>>, %arg4: memref<1x4x64xbf16, #tpu.memory_space<vmem>>) attributes {dimension_semantics = [#tpu.dimension_semantics<parallel>], iteration_bounds = array<i64: 2>, scalar_prefetch = 0 : i64, scratch_operands = 0 : i64, tpu.core_type = #tpu.core_type<tc>, window_params = [{transform_indices = @transform_0, window_bounds = array<i64: 1, 4, 4, 64>}, {pipeline_mode = #tpu.pipeline_mode<synchronous>, transform_indices = @transform_1, window_bounds = array<i64: 4, 16>}, {pipeline_mode = #tpu.pipeline_mode<synchronous>, transform_indices = @transform_2, window_bounds = array<i64: 4, 1>}, {transform_indices = @transform_3, window_bounds = array<i64: 1, 4, 64>}]} {
    %c0 = arith.constant 0 : index
    %c0_0 = arith.constant 0 : index
    %c0_1 = arith.constant 0 : index
    %c0_2 = arith.constant 0 : index
    %0 = vector.load %arg1[%c0, %c0_0, %c0_1, %c0_2] : memref<1x4x4x64xbf16, #tpu.memory_space<vmem>>, vector<1x4x4x64xbf16>
    %1 = vector.shape_cast %0 : vector<1x4x4x64xbf16> to vector<4x4x64xbf16>
    %cst = arith.constant 0.000000e+00 : bf16
    %2 = vector.broadcast %cst : bf16 to vector<4x4x64xbf16>
    %3 = arith.maximumf %1, %2 : vector<4x4x64xbf16>
    %4 = vector.extract_strided_slice %3 {offsets = [0, 0, 0], sizes = [1, 4, 64], strides = [1, 1, 1]} : vector<4x4x64xbf16> to vector<1x4x64xbf16>
    %5 = vector.shape_cast %4 : vector<1x4x64xbf16> to vector<4x64xbf16>
    %6 = vector.extract_strided_slice %3 {offsets = [1, 0, 0], sizes = [1, 4, 64], strides = [1, 1, 1]} : vector<4x4x64xbf16> to vector<1x4x64xbf16>
    %7 = vector.shape_cast %6 : vector<1x4x64xbf16> to vector<4x64xbf16>
    %8 = vector.extract_strided_slice %3 {offsets = [2, 0, 0], sizes = [1, 4, 64], strides = [1, 1, 1]} : vector<4x4x64xbf16> to vector<1x4x64xbf16>
    %9 = vector.shape_cast %8 : vector<1x4x64xbf16> to vector<4x64xbf16>
    %10 = vector.extract_strided_slice %3 {offsets = [3, 0, 0], sizes = [1, 4, 64], strides = [1, 1, 1]} : vector<4x4x64xbf16> to vector<1x4x64xbf16>
    %11 = vector.shape_cast %10 : vector<1x4x64xbf16> to vector<4x64xbf16>
    %12 = vector.shape_cast %5 : vector<4x64xbf16> to vector<1x4x64xbf16>
    %13 = vector.shape_cast %7 : vector<4x64xbf16> to vector<1x4x64xbf16>
    %14 = vector.shape_cast %9 : vector<4x64xbf16> to vector<1x4x64xbf16>
    %15 = vector.shape_cast %11 : vector<4x64xbf16> to vector<1x4x64xbf16>
    %16 = tpu.concatenate %12, %13, %14, %15 in 0 : vector<1x4x64xbf16>, vector<1x4x64xbf16>, vector<1x4x64xbf16>, vector<1x4x64xbf16> -> vector<4x4x64xbf16>
    %17 = vector.shape_cast %16 : vector<4x4x64xbf16> to vector<16x64xbf16>
    %c0_3 = arith.constant 0 : index
    %c0_4 = arith.constant 0 : index
    %18 = vector.load %arg2[%c0_3, %c0_4] : memref<4x16xbf16, #tpu.memory_space<vmem>>, vector<4x16xbf16>
    %cst_5 = arith.constant dense<0.000000e+00> : vector<4x64xf32>
    %19 = tpu.matmul %18, %17, %cst_5 {dimension_numbers = #tpu.dot_dimension_numbers<[1], [0], [0], [1], [0, 0, 1, 1], [], []>} : vector<4x16xbf16>, vector<16x64xbf16>, vector<4x64xf32> -> vector<4x64xf32>
    %c0_6 = arith.constant 0 : index
    %c0_7 = arith.constant 0 : index
    %20 = vector.load %arg3[%c0_6, %c0_7] : memref<4x1xf32, #tpu.memory_space<vmem>>, vector<4x1xf32>
    %21 = vector.broadcast %20 : vector<4x1xf32> to vector<4x64xf32>
    %22 = arith.addf %19, %21 : vector<4x64xf32>
    %23 = arith.truncf %22 : vector<4x64xf32> to vector<4x64xbf16>
    %c0_8 = arith.constant 0 : index
    %c0_9 = arith.constant 0 : index
    %c0_10 = arith.constant 0 : index
    %24 = vector.load %arg4[%c0_8, %c0_9, %c0_10] : memref<1x4x64xbf16, #tpu.memory_space<vmem>>, vector<1x4x64xbf16>
    %25 = vector.shape_cast %24 : vector<1x4x64xbf16> to vector<4x64xbf16>
    %26 = vector.shape_cast %23 : vector<4x64xbf16> to vector<1x4x64xbf16>
    tpu.vector_store %arg4[%c0_8, %c0_9, %c0_10], %26 {strides = array<i32>} : memref<1x4x64xbf16, #tpu.memory_space<vmem>>, vector<1x4x64xbf16>,
    return
  }
  func.func @transform_0(%arg0: i32) -> (i32, i32, i32, i32) {
    %c0_i32 = arith.constant 0 : i32
    %c0_i32_0 = arith.constant 0 : i32
    %c0_i32_1 = arith.constant 0 : i32
    %c0_i32_2 = arith.constant 0 : i32
    return %arg0, %c0_i32, %c0_i32_0, %c0_i32_1 : i32, i32, i32, i32
  }
  func.func @transform_1(%arg0: i32) -> (i32, i32) {
    %c0_i32 = arith.constant 0 : i32
    %c0_i32_0 = arith.constant 0 : i32
    %c0_i32_1 = arith.constant 0 : i32
    return %c0_i32, %c0_i32_0 : i32, i32
  }
  func.func @transform_2(%arg0: i32) -> (i32, i32) {
    %c0_i32 = arith.constant 0 : i32
    %c0_i32_0 = arith.constant 0 : i32
    %c0_i32_1 = arith.constant 0 : i32
    return %c0_i32, %c0_i32_0 : i32, i32
  }
  func.func @transform_3(%arg0: i32) -> (i32, i32, i32) {
    %c0_i32 = arith.constant 0 : i32
    %c0_i32_0 = arith.constant 0 : i32
    %c0_i32_1 = arith.constant 0 : i32
    return %arg0, %c0_i32, %c0_i32_0 : i32, i32, i32
  }
}

module attributes {stable_mosaic.version = 11 : i64} {
  func.func @_tap_conv_kernel(%arg0: i32, %arg1: memref<1x4x4x26xbf16, #tpu.memory_space<vmem>>, %arg2: memref<4x36xbf16, #tpu.memory_space<vmem>>, %arg3: memref<4x1xf32, #tpu.memory_space<vmem>>, %arg4: memref<1x4x20xbf16, #tpu.memory_space<vmem>>) attributes {dimension_semantics = [#tpu.dimension_semantics<parallel>], iteration_bounds = array<i64: 2>, scalar_prefetch = 0 : i64, scratch_operands = 0 : i64, tpu.core_type = #tpu.core_type<tc>, window_params = [{transform_indices = @transform_0, window_bounds = array<i64: 1, 4, 4, 26>}, {pipeline_mode = #tpu.pipeline_mode<synchronous>, transform_indices = @transform_1, window_bounds = array<i64: 4, 36>}, {pipeline_mode = #tpu.pipeline_mode<synchronous>, transform_indices = @transform_2, window_bounds = array<i64: 4, 1>}, {transform_indices = @transform_3, window_bounds = array<i64: 1, 4, 20>}]} {
    %c0 = arith.constant 0 : index
    %c0_0 = arith.constant 0 : index
    %c0_1 = arith.constant 0 : index
    %c0_2 = arith.constant 0 : index
    %0 = vector.load %arg1[%c0, %c0_0, %c0_1, %c0_2] : memref<1x4x4x26xbf16, #tpu.memory_space<vmem>>, vector<1x4x4x26xbf16>
    %1 = vector.shape_cast %0 : vector<1x4x4x26xbf16> to vector<4x4x26xbf16>
    %cst = arith.constant 0.000000e+00 : bf16
    %2 = vector.broadcast %cst : bf16 to vector<4x4x26xbf16>
    %3 = arith.maximumf %1, %2 : vector<4x4x26xbf16>
    %4 = vector.extract_strided_slice %3 {offsets = [0, 0, 0], sizes = [1, 4, 20], strides = [1, 1, 1]} : vector<4x4x26xbf16> to vector<1x4x20xbf16>
    %5 = vector.shape_cast %4 : vector<1x4x20xbf16> to vector<4x20xbf16>
    %6 = vector.extract_strided_slice %3 {offsets = [1, 0, 0], sizes = [1, 4, 20], strides = [1, 1, 1]} : vector<4x4x26xbf16> to vector<1x4x20xbf16>
    %7 = vector.shape_cast %6 : vector<1x4x20xbf16> to vector<4x20xbf16>
    %8 = vector.extract_strided_slice %3 {offsets = [0, 0, 1], sizes = [1, 4, 20], strides = [1, 1, 1]} : vector<4x4x26xbf16> to vector<1x4x20xbf16>
    %9 = vector.shape_cast %8 : vector<1x4x20xbf16> to vector<4x20xbf16>
    %10 = vector.extract_strided_slice %3 {offsets = [2, 0, 0], sizes = [1, 4, 20], strides = [1, 1, 1]} : vector<4x4x26xbf16> to vector<1x4x20xbf16>
    %11 = vector.shape_cast %10 : vector<1x4x20xbf16> to vector<4x20xbf16>
    %12 = vector.extract_strided_slice %3 {offsets = [3, 0, 0], sizes = [1, 4, 20], strides = [1, 1, 1]} : vector<4x4x26xbf16> to vector<1x4x20xbf16>
    %13 = vector.shape_cast %12 : vector<1x4x20xbf16> to vector<4x20xbf16>
    %14 = vector.extract_strided_slice %3 {offsets = [2, 0, 1], sizes = [1, 4, 20], strides = [1, 1, 1]} : vector<4x4x26xbf16> to vector<1x4x20xbf16>
    %15 = vector.shape_cast %14 : vector<1x4x20xbf16> to vector<4x20xbf16>
    %16 = vector.extract_strided_slice %3 {offsets = [0, 0, 5], sizes = [1, 4, 20], strides = [1, 1, 1]} : vector<4x4x26xbf16> to vector<1x4x20xbf16>
    %17 = vector.shape_cast %16 : vector<1x4x20xbf16> to vector<4x20xbf16>
    %18 = vector.extract_strided_slice %3 {offsets = [1, 0, 5], sizes = [1, 4, 20], strides = [1, 1, 1]} : vector<4x4x26xbf16> to vector<1x4x20xbf16>
    %19 = vector.shape_cast %18 : vector<1x4x20xbf16> to vector<4x20xbf16>
    %20 = vector.extract_strided_slice %3 {offsets = [0, 0, 6], sizes = [1, 4, 20], strides = [1, 1, 1]} : vector<4x4x26xbf16> to vector<1x4x20xbf16>
    %21 = vector.shape_cast %20 : vector<1x4x20xbf16> to vector<4x20xbf16>
    %22 = vector.shape_cast %5 : vector<4x20xbf16> to vector<1x4x20xbf16>
    %23 = vector.shape_cast %7 : vector<4x20xbf16> to vector<1x4x20xbf16>
    %24 = vector.shape_cast %9 : vector<4x20xbf16> to vector<1x4x20xbf16>
    %25 = vector.shape_cast %11 : vector<4x20xbf16> to vector<1x4x20xbf16>
    %26 = vector.shape_cast %13 : vector<4x20xbf16> to vector<1x4x20xbf16>
    %27 = vector.shape_cast %15 : vector<4x20xbf16> to vector<1x4x20xbf16>
    %28 = vector.shape_cast %17 : vector<4x20xbf16> to vector<1x4x20xbf16>
    %29 = vector.shape_cast %19 : vector<4x20xbf16> to vector<1x4x20xbf16>
    %30 = vector.shape_cast %21 : vector<4x20xbf16> to vector<1x4x20xbf16>
    %31 = tpu.concatenate %22, %23, %24, %25, %26, %27, %28, %29, %30 in 0 : vector<1x4x20xbf16>, vector<1x4x20xbf16>, vector<1x4x20xbf16>, vector<1x4x20xbf16>, vector<1x4x20xbf16>, vector<1x4x20xbf16>, vector<1x4x20xbf16>, vector<1x4x20xbf16>, vector<1x4x20xbf16> -> vector<9x4x20xbf16>
    %32 = vector.shape_cast %31 : vector<9x4x20xbf16> to vector<36x20xbf16>
    %c0_3 = arith.constant 0 : index
    %c0_4 = arith.constant 0 : index
    %33 = vector.load %arg2[%c0_3, %c0_4] : memref<4x36xbf16, #tpu.memory_space<vmem>>, vector<4x36xbf16>
    %cst_5 = arith.constant dense<0.000000e+00> : vector<4x20xf32>
    %34 = tpu.matmul %33, %32, %cst_5 {dimension_numbers = #tpu.dot_dimension_numbers<[1], [0], [0], [1], [0, 0, 1, 1], [], []>} : vector<4x36xbf16>, vector<36x20xbf16>, vector<4x20xf32> -> vector<4x20xf32>
    %c0_6 = arith.constant 0 : index
    %c0_7 = arith.constant 0 : index
    %35 = vector.load %arg3[%c0_6, %c0_7] : memref<4x1xf32, #tpu.memory_space<vmem>>, vector<4x1xf32>
    %36 = vector.broadcast %35 : vector<4x1xf32> to vector<4x20xf32>
    %37 = arith.addf %34, %36 : vector<4x20xf32>
    %38 = arith.truncf %37 : vector<4x20xf32> to vector<4x20xbf16>
    %c0_8 = arith.constant 0 : index
    %c0_9 = arith.constant 0 : index
    %c0_10 = arith.constant 0 : index
    %39 = vector.load %arg4[%c0_8, %c0_9, %c0_10] : memref<1x4x20xbf16, #tpu.memory_space<vmem>>, vector<1x4x20xbf16>
    %40 = vector.shape_cast %39 : vector<1x4x20xbf16> to vector<4x20xbf16>
    %41 = vector.shape_cast %38 : vector<4x20xbf16> to vector<1x4x20xbf16>
    tpu.vector_store %arg4[%c0_8, %c0_9, %c0_10], %41 {strides = array<i32>} : memref<1x4x20xbf16, #tpu.memory_space<vmem>>, vector<1x4x20xbf16>,
    return
  }
  func.func @transform_0(%arg0: i32) -> (i32, i32, i32, i32) {
    %c0_i32 = arith.constant 0 : i32
    %c0_i32_0 = arith.constant 0 : i32
    %c0_i32_1 = arith.constant 0 : i32
    %c0_i32_2 = arith.constant 0 : i32
    return %arg0, %c0_i32, %c0_i32_0, %c0_i32_1 : i32, i32, i32, i32
  }
  func.func @transform_1(%arg0: i32) -> (i32, i32) {
    %c0_i32 = arith.constant 0 : i32
    %c0_i32_0 = arith.constant 0 : i32
    %c0_i32_1 = arith.constant 0 : i32
    return %c0_i32, %c0_i32_0 : i32, i32
  }
  func.func @transform_2(%arg0: i32) -> (i32, i32) {
    %c0_i32 = arith.constant 0 : i32
    %c0_i32_0 = arith.constant 0 : i32
    %c0_i32_1 = arith.constant 0 : i32
    return %c0_i32, %c0_i32_0 : i32, i32
  }
  func.func @transform_3(%arg0: i32) -> (i32, i32, i32) {
    %c0_i32 = arith.constant 0 : i32
    %c0_i32_0 = arith.constant 0 : i32
    %c0_i32_1 = arith.constant 0 : i32
    return %arg0, %c0_i32, %c0_i32_0 : i32, i32, i32
  }
}

module attributes {stable_mosaic.version = 11 : i64} {
  func.func @_tap_conv_kernel(%arg0: i32, %arg1: memref<1x4x4x82xbf16, #tpu.memory_space<vmem>>, %arg2: memref<4x36xbf16, #tpu.memory_space<vmem>>, %arg3: memref<4x1xf32, #tpu.memory_space<vmem>>, %arg4: memref<1x4x72xbf16, #tpu.memory_space<vmem>>) attributes {dimension_semantics = [#tpu.dimension_semantics<parallel>], iteration_bounds = array<i64: 2>, scalar_prefetch = 0 : i64, scratch_operands = 0 : i64, tpu.core_type = #tpu.core_type<tc>, window_params = [{transform_indices = @transform_0, window_bounds = array<i64: 1, 4, 4, 82>}, {pipeline_mode = #tpu.pipeline_mode<synchronous>, transform_indices = @transform_1, window_bounds = array<i64: 4, 36>}, {pipeline_mode = #tpu.pipeline_mode<synchronous>, transform_indices = @transform_2, window_bounds = array<i64: 4, 1>}, {transform_indices = @transform_3, window_bounds = array<i64: 1, 4, 72>}]} {
    %c0 = arith.constant 0 : index
    %c0_0 = arith.constant 0 : index
    %c0_1 = arith.constant 0 : index
    %c0_2 = arith.constant 0 : index
    %0 = vector.load %arg1[%c0, %c0_0, %c0_1, %c0_2] : memref<1x4x4x82xbf16, #tpu.memory_space<vmem>>, vector<1x4x4x82xbf16>
    %1 = vector.shape_cast %0 : vector<1x4x4x82xbf16> to vector<4x4x82xbf16>
    %cst = arith.constant 0.000000e+00 : bf16
    %2 = vector.broadcast %cst : bf16 to vector<4x4x82xbf16>
    %3 = arith.maximumf %1, %2 : vector<4x4x82xbf16>
    %4 = vector.extract_strided_slice %3 {offsets = [0, 0, 0], sizes = [1, 4, 72], strides = [1, 1, 1]} : vector<4x4x82xbf16> to vector<1x4x72xbf16>
    %5 = vector.shape_cast %4 : vector<1x4x72xbf16> to vector<4x72xbf16>
    %6 = vector.extract_strided_slice %3 {offsets = [1, 0, 0], sizes = [1, 4, 72], strides = [1, 1, 1]} : vector<4x4x82xbf16> to vector<1x4x72xbf16>
    %7 = vector.shape_cast %6 : vector<1x4x72xbf16> to vector<4x72xbf16>
    %8 = vector.extract_strided_slice %3 {offsets = [0, 0, 1], sizes = [1, 4, 72], strides = [1, 1, 1]} : vector<4x4x82xbf16> to vector<1x4x72xbf16>
    %9 = vector.shape_cast %8 : vector<1x4x72xbf16> to vector<4x72xbf16>
    %10 = vector.extract_strided_slice %3 {offsets = [2, 0, 0], sizes = [1, 4, 72], strides = [1, 1, 1]} : vector<4x4x82xbf16> to vector<1x4x72xbf16>
    %11 = vector.shape_cast %10 : vector<1x4x72xbf16> to vector<4x72xbf16>
    %12 = vector.extract_strided_slice %3 {offsets = [3, 0, 0], sizes = [1, 4, 72], strides = [1, 1, 1]} : vector<4x4x82xbf16> to vector<1x4x72xbf16>
    %13 = vector.shape_cast %12 : vector<1x4x72xbf16> to vector<4x72xbf16>
    %14 = vector.extract_strided_slice %3 {offsets = [2, 0, 1], sizes = [1, 4, 72], strides = [1, 1, 1]} : vector<4x4x82xbf16> to vector<1x4x72xbf16>
    %15 = vector.shape_cast %14 : vector<1x4x72xbf16> to vector<4x72xbf16>
    %16 = vector.extract_strided_slice %3 {offsets = [0, 0, 9], sizes = [1, 4, 72], strides = [1, 1, 1]} : vector<4x4x82xbf16> to vector<1x4x72xbf16>
    %17 = vector.shape_cast %16 : vector<1x4x72xbf16> to vector<4x72xbf16>
    %18 = vector.extract_strided_slice %3 {offsets = [1, 0, 9], sizes = [1, 4, 72], strides = [1, 1, 1]} : vector<4x4x82xbf16> to vector<1x4x72xbf16>
    %19 = vector.shape_cast %18 : vector<1x4x72xbf16> to vector<4x72xbf16>
    %20 = vector.extract_strided_slice %3 {offsets = [0, 0, 10], sizes = [1, 4, 72], strides = [1, 1, 1]} : vector<4x4x82xbf16> to vector<1x4x72xbf16>
    %21 = vector.shape_cast %20 : vector<1x4x72xbf16> to vector<4x72xbf16>
    %22 = vector.shape_cast %5 : vector<4x72xbf16> to vector<1x4x72xbf16>
    %23 = vector.shape_cast %7 : vector<4x72xbf16> to vector<1x4x72xbf16>
    %24 = vector.shape_cast %9 : vector<4x72xbf16> to vector<1x4x72xbf16>
    %25 = vector.shape_cast %11 : vector<4x72xbf16> to vector<1x4x72xbf16>
    %26 = vector.shape_cast %13 : vector<4x72xbf16> to vector<1x4x72xbf16>
    %27 = vector.shape_cast %15 : vector<4x72xbf16> to vector<1x4x72xbf16>
    %28 = vector.shape_cast %17 : vector<4x72xbf16> to vector<1x4x72xbf16>
    %29 = vector.shape_cast %19 : vector<4x72xbf16> to vector<1x4x72xbf16>
    %30 = vector.shape_cast %21 : vector<4x72xbf16> to vector<1x4x72xbf16>
    %31 = tpu.concatenate %22, %23, %24, %25, %26, %27, %28, %29, %30 in 0 : vector<1x4x72xbf16>, vector<1x4x72xbf16>, vector<1x4x72xbf16>, vector<1x4x72xbf16>, vector<1x4x72xbf16>, vector<1x4x72xbf16>, vector<1x4x72xbf16>, vector<1x4x72xbf16>, vector<1x4x72xbf16> -> vector<9x4x72xbf16>
    %32 = vector.shape_cast %31 : vector<9x4x72xbf16> to vector<36x72xbf16>
    %c0_3 = arith.constant 0 : index
    %c0_4 = arith.constant 0 : index
    %33 = vector.load %arg2[%c0_3, %c0_4] : memref<4x36xbf16, #tpu.memory_space<vmem>>, vector<4x36xbf16>
    %cst_5 = arith.constant dense<0.000000e+00> : vector<4x72xf32>
    %34 = tpu.matmul %33, %32, %cst_5 {dimension_numbers = #tpu.dot_dimension_numbers<[1], [0], [0], [1], [0, 0, 1, 1], [], []>} : vector<4x36xbf16>, vector<36x72xbf16>, vector<4x72xf32> -> vector<4x72xf32>
    %c0_6 = arith.constant 0 : index
    %c0_7 = arith.constant 0 : index
    %35 = vector.load %arg3[%c0_6, %c0_7] : memref<4x1xf32, #tpu.memory_space<vmem>>, vector<4x1xf32>
    %36 = vector.broadcast %35 : vector<4x1xf32> to vector<4x72xf32>
    %37 = arith.addf %34, %36 : vector<4x72xf32>
    %38 = arith.truncf %37 : vector<4x72xf32> to vector<4x72xbf16>
    %c0_8 = arith.constant 0 : index
    %c0_9 = arith.constant 0 : index
    %c0_10 = arith.constant 0 : index
    %39 = vector.load %arg4[%c0_8, %c0_9, %c0_10] : memref<1x4x72xbf16, #tpu.memory_space<vmem>>, vector<1x4x72xbf16>
    %40 = vector.shape_cast %39 : vector<1x4x72xbf16> to vector<4x72xbf16>
    %41 = vector.shape_cast %38 : vector<4x72xbf16> to vector<1x4x72xbf16>
    tpu.vector_store %arg4[%c0_8, %c0_9, %c0_10], %41 {strides = array<i32>} : memref<1x4x72xbf16, #tpu.memory_space<vmem>>, vector<1x4x72xbf16>,
    return
  }
  func.func @transform_0(%arg0: i32) -> (i32, i32, i32, i32) {
    %c0_i32 = arith.constant 0 : i32
    %c0_i32_0 = arith.constant 0 : i32
    %c0_i32_1 = arith.constant 0 : i32
    %c0_i32_2 = arith.constant 0 : i32
    return %arg0, %c0_i32, %c0_i32_0, %c0_i32_1 : i32, i32, i32, i32
  }
  func.func @transform_1(%arg0: i32) -> (i32, i32) {
    %c0_i32 = arith.constant 0 : i32
    %c0_i32_0 = arith.constant 0 : i32
    %c0_i32_1 = arith.constant 0 : i32
    return %c0_i32, %c0_i32_0 : i32, i32
  }
  func.func @transform_2(%arg0: i32) -> (i32, i32) {
    %c0_i32 = arith.constant 0 : i32
    %c0_i32_0 = arith.constant 0 : i32
    %c0_i32_1 = arith.constant 0 : i32
    return %c0_i32, %c0_i32_0 : i32, i32
  }
  func.func @transform_3(%arg0: i32) -> (i32, i32, i32) {
    %c0_i32 = arith.constant 0 : i32
    %c0_i32_0 = arith.constant 0 : i32
    %c0_i32_1 = arith.constant 0 : i32
    return %arg0, %c0_i32, %c0_i32_0 : i32, i32, i32
  }
}

module attributes {stable_mosaic.version = 11 : i64} {
  func.func @_tap_conv_kernel(%arg0: i32, %arg1: memref<1x4x8x82xbf16, #tpu.memory_space<vmem>>, %arg2: memref<4x72xbf16, #tpu.memory_space<vmem>>, %arg3: memref<4x1xf32, #tpu.memory_space<vmem>>, %arg4: memref<1x4x72xbf16, #tpu.memory_space<vmem>>) attributes {dimension_semantics = [#tpu.dimension_semantics<parallel>], iteration_bounds = array<i64: 2>, scalar_prefetch = 0 : i64, scratch_operands = 0 : i64, tpu.core_type = #tpu.core_type<tc>, window_params = [{transform_indices = @transform_0, window_bounds = array<i64: 1, 4, 8, 82>}, {pipeline_mode = #tpu.pipeline_mode<synchronous>, transform_indices = @transform_1, window_bounds = array<i64: 4, 72>}, {pipeline_mode = #tpu.pipeline_mode<synchronous>, transform_indices = @transform_2, window_bounds = array<i64: 4, 1>}, {transform_indices = @transform_3, window_bounds = array<i64: 1, 4, 72>}]} {
    %c0 = arith.constant 0 : index
    %c0_0 = arith.constant 0 : index
    %c0_1 = arith.constant 0 : index
    %c0_2 = arith.constant 0 : index
    %0 = vector.load %arg1[%c0, %c0_0, %c0_1, %c0_2] : memref<1x4x8x82xbf16, #tpu.memory_space<vmem>>, vector<1x4x8x82xbf16>
    %1 = vector.shape_cast %0 : vector<1x4x8x82xbf16> to vector<4x8x82xbf16>
    %cst = arith.constant 0.000000e+00 : bf16
    %2 = vector.broadcast %cst : bf16 to vector<4x8x82xbf16>
    %3 = arith.maximumf %1, %2 : vector<4x8x82xbf16>
    %4 = vector.extract_strided_slice %3 {offsets = [0, 0, 0], sizes = [1, 8, 72], strides = [1, 1, 1]} : vector<4x8x82xbf16> to vector<1x8x72xbf16>
    %5 = vector.shape_cast %4 : vector<1x8x72xbf16> to vector<8x72xbf16>
    %6 = vector.extract_strided_slice %3 {offsets = [1, 0, 0], sizes = [1, 8, 72], strides = [1, 1, 1]} : vector<4x8x82xbf16> to vector<1x8x72xbf16>
    %7 = vector.shape_cast %6 : vector<1x8x72xbf16> to vector<8x72xbf16>
    %8 = vector.extract_strided_slice %3 {offsets = [0, 0, 1], sizes = [1, 8, 72], strides = [1, 1, 1]} : vector<4x8x82xbf16> to vector<1x8x72xbf16>
    %9 = vector.shape_cast %8 : vector<1x8x72xbf16> to vector<8x72xbf16>
    %10 = vector.extract_strided_slice %3 {offsets = [2, 0, 0], sizes = [1, 8, 72], strides = [1, 1, 1]} : vector<4x8x82xbf16> to vector<1x8x72xbf16>
    %11 = vector.shape_cast %10 : vector<1x8x72xbf16> to vector<8x72xbf16>
    %12 = vector.extract_strided_slice %3 {offsets = [3, 0, 0], sizes = [1, 8, 72], strides = [1, 1, 1]} : vector<4x8x82xbf16> to vector<1x8x72xbf16>
    %13 = vector.shape_cast %12 : vector<1x8x72xbf16> to vector<8x72xbf16>
    %14 = vector.extract_strided_slice %3 {offsets = [2, 0, 1], sizes = [1, 8, 72], strides = [1, 1, 1]} : vector<4x8x82xbf16> to vector<1x8x72xbf16>
    %15 = vector.shape_cast %14 : vector<1x8x72xbf16> to vector<8x72xbf16>
    %16 = vector.extract_strided_slice %3 {offsets = [0, 0, 9], sizes = [1, 8, 72], strides = [1, 1, 1]} : vector<4x8x82xbf16> to vector<1x8x72xbf16>
    %17 = vector.shape_cast %16 : vector<1x8x72xbf16> to vector<8x72xbf16>
    %18 = vector.extract_strided_slice %3 {offsets = [1, 0, 9], sizes = [1, 8, 72], strides = [1, 1, 1]} : vector<4x8x82xbf16> to vector<1x8x72xbf16>
    %19 = vector.shape_cast %18 : vector<1x8x72xbf16> to vector<8x72xbf16>
    %20 = vector.extract_strided_slice %3 {offsets = [0, 0, 10], sizes = [1, 8, 72], strides = [1, 1, 1]} : vector<4x8x82xbf16> to vector<1x8x72xbf16>
    %21 = vector.shape_cast %20 : vector<1x8x72xbf16> to vector<8x72xbf16>
    %22 = vector.shape_cast %5 : vector<8x72xbf16> to vector<1x8x72xbf16>
    %23 = vector.shape_cast %7 : vector<8x72xbf16> to vector<1x8x72xbf16>
    %24 = vector.shape_cast %9 : vector<8x72xbf16> to vector<1x8x72xbf16>
    %25 = vector.shape_cast %11 : vector<8x72xbf16> to vector<1x8x72xbf16>
    %26 = vector.shape_cast %13 : vector<8x72xbf16> to vector<1x8x72xbf16>
    %27 = vector.shape_cast %15 : vector<8x72xbf16> to vector<1x8x72xbf16>
    %28 = vector.shape_cast %17 : vector<8x72xbf16> to vector<1x8x72xbf16>
    %29 = vector.shape_cast %19 : vector<8x72xbf16> to vector<1x8x72xbf16>
    %30 = vector.shape_cast %21 : vector<8x72xbf16> to vector<1x8x72xbf16>
    %31 = tpu.concatenate %22, %23, %24, %25, %26, %27, %28, %29, %30 in 0 : vector<1x8x72xbf16>, vector<1x8x72xbf16>, vector<1x8x72xbf16>, vector<1x8x72xbf16>, vector<1x8x72xbf16>, vector<1x8x72xbf16>, vector<1x8x72xbf16>, vector<1x8x72xbf16>, vector<1x8x72xbf16> -> vector<9x8x72xbf16>
    %32 = vector.shape_cast %31 : vector<9x8x72xbf16> to vector<72x72xbf16>
    %c0_3 = arith.constant 0 : index
    %c0_4 = arith.constant 0 : index
    %33 = vector.load %arg2[%c0_3, %c0_4] : memref<4x72xbf16, #tpu.memory_space<vmem>>, vector<4x72xbf16>
    %cst_5 = arith.constant dense<0.000000e+00> : vector<4x72xf32>
    %34 = tpu.matmul %33, %32, %cst_5 {dimension_numbers = #tpu.dot_dimension_numbers<[1], [0], [0], [1], [0, 0, 1, 1], [], []>} : vector<4x72xbf16>, vector<72x72xbf16>, vector<4x72xf32> -> vector<4x72xf32>
    %c0_6 = arith.constant 0 : index
    %c0_7 = arith.constant 0 : index
    %35 = vector.load %arg3[%c0_6, %c0_7] : memref<4x1xf32, #tpu.memory_space<vmem>>, vector<4x1xf32>
    %36 = vector.broadcast %35 : vector<4x1xf32> to vector<4x72xf32>
    %37 = arith.addf %34, %36 : vector<4x72xf32>
    %38 = arith.truncf %37 : vector<4x72xf32> to vector<4x72xbf16>
    %c0_8 = arith.constant 0 : index
    %c0_9 = arith.constant 0 : index
    %c0_10 = arith.constant 0 : index
    %39 = vector.load %arg4[%c0_8, %c0_9, %c0_10] : memref<1x4x72xbf16, #tpu.memory_space<vmem>>, vector<1x4x72xbf16>
    %40 = vector.shape_cast %39 : vector<1x4x72xbf16> to vector<4x72xbf16>
    %41 = vector.shape_cast %38 : vector<4x72xbf16> to vector<1x4x72xbf16>
    tpu.vector_store %arg4[%c0_8, %c0_9, %c0_10], %41 {strides = array<i32>} : memref<1x4x72xbf16, #tpu.memory_space<vmem>>, vector<1x4x72xbf16>,
    return
  }
  func.func @transform_0(%arg0: i32) -> (i32, i32, i32, i32) {
    %c0_i32 = arith.constant 0 : i32
    %c0_i32_0 = arith.constant 0 : i32
    %c0_i32_1 = arith.constant 0 : i32
    %c0_i32_2 = arith.constant 0 : i32
    return %arg0, %c0_i32, %c0_i32_0, %c0_i32_1 : i32, i32, i32, i32
  }
  func.func @transform_1(%arg0: i32) -> (i32, i32) {
    %c0_i32 = arith.constant 0 : i32
    %c0_i32_0 = arith.constant 0 : i32
    %c0_i32_1 = arith.constant 0 : i32
    return %c0_i32, %c0_i32_0 : i32, i32
  }
  func.func @transform_2(%arg0: i32) -> (i32, i32) {
    %c0_i32 = arith.constant 0 : i32
    %c0_i32_0 = arith.constant 0 : i32
    %c0_i32_1 = arith.constant 0 : i32
    return %c0_i32, %c0_i32_0 : i32, i32
  }
  func.func @transform_3(%arg0: i32) -> (i32, i32, i32) {
    %c0_i32 = arith.constant 0 : i32
    %c0_i32_0 = arith.constant 0 : i32
    %c0_i32_1 = arith.constant 0 : i32
    return %arg0, %c0_i32, %c0_i32_0 : i32, i32, i32
  }
}

module attributes {stable_mosaic.version = 11 : i64} {
  func.func @_tap_conv_kernel(%arg0: i32, %arg1: memref<1x1x8x64xbf16, #tpu.memory_space<vmem>>, %arg2: memref<4x8xbf16, #tpu.memory_space<vmem>>, %arg3: memref<4x1xf32, #tpu.memory_space<vmem>>, %arg4: memref<1x4x64xbf16, #tpu.memory_space<vmem>>) attributes {dimension_semantics = [#tpu.dimension_semantics<parallel>], iteration_bounds = array<i64: 2>, scalar_prefetch = 0 : i64, scratch_operands = 0 : i64, tpu.core_type = #tpu.core_type<tc>, window_params = [{transform_indices = @transform_0, window_bounds = array<i64: 1, 1, 8, 64>}, {pipeline_mode = #tpu.pipeline_mode<synchronous>, transform_indices = @transform_1, window_bounds = array<i64: 4, 8>}, {pipeline_mode = #tpu.pipeline_mode<synchronous>, transform_indices = @transform_2, window_bounds = array<i64: 4, 1>}, {transform_indices = @transform_3, window_bounds = array<i64: 1, 4, 64>}]} {
    %c0 = arith.constant 0 : index
    %c0_0 = arith.constant 0 : index
    %c0_1 = arith.constant 0 : index
    %c0_2 = arith.constant 0 : index
    %0 = vector.load %arg1[%c0, %c0_0, %c0_1, %c0_2] : memref<1x1x8x64xbf16, #tpu.memory_space<vmem>>, vector<1x1x8x64xbf16>
    %1 = vector.shape_cast %0 : vector<1x1x8x64xbf16> to vector<1x8x64xbf16>
    %cst = arith.constant 0.000000e+00 : bf16
    %2 = vector.broadcast %cst : bf16 to vector<1x8x64xbf16>
    %3 = arith.maximumf %1, %2 : vector<1x8x64xbf16>
    %4 = vector.shape_cast %3 : vector<1x8x64xbf16> to vector<8x64xbf16>
    %c0_3 = arith.constant 0 : index
    %c0_4 = arith.constant 0 : index
    %5 = vector.load %arg2[%c0_3, %c0_4] : memref<4x8xbf16, #tpu.memory_space<vmem>>, vector<4x8xbf16>
    %cst_5 = arith.constant dense<0.000000e+00> : vector<4x64xf32>
    %6 = tpu.matmul %5, %4, %cst_5 {dimension_numbers = #tpu.dot_dimension_numbers<[1], [0], [0], [1], [0, 0, 1, 1], [], []>} : vector<4x8xbf16>, vector<8x64xbf16>, vector<4x64xf32> -> vector<4x64xf32>
    %c0_6 = arith.constant 0 : index
    %c0_7 = arith.constant 0 : index
    %7 = vector.load %arg3[%c0_6, %c0_7] : memref<4x1xf32, #tpu.memory_space<vmem>>, vector<4x1xf32>
    %8 = vector.broadcast %7 : vector<4x1xf32> to vector<4x64xf32>
    %9 = arith.addf %6, %8 : vector<4x64xf32>
    %10 = arith.truncf %9 : vector<4x64xf32> to vector<4x64xbf16>
    %c0_8 = arith.constant 0 : index
    %c0_9 = arith.constant 0 : index
    %c0_10 = arith.constant 0 : index
    %11 = vector.load %arg4[%c0_8, %c0_9, %c0_10] : memref<1x4x64xbf16, #tpu.memory_space<vmem>>, vector<1x4x64xbf16>
    %12 = vector.shape_cast %11 : vector<1x4x64xbf16> to vector<4x64xbf16>
    %13 = vector.shape_cast %10 : vector<4x64xbf16> to vector<1x4x64xbf16>
    tpu.vector_store %arg4[%c0_8, %c0_9, %c0_10], %13 {strides = array<i32>} : memref<1x4x64xbf16, #tpu.memory_space<vmem>>, vector<1x4x64xbf16>,
    return
  }
  func.func @transform_0(%arg0: i32) -> (i32, i32, i32, i32) {
    %c0_i32 = arith.constant 0 : i32
    %c0_i32_0 = arith.constant 0 : i32
    %c0_i32_1 = arith.constant 0 : i32
    %c0_i32_2 = arith.constant 0 : i32
    return %arg0, %c0_i32, %c0_i32_0, %c0_i32_1 : i32, i32, i32, i32
  }
  func.func @transform_1(%arg0: i32) -> (i32, i32) {
    %c0_i32 = arith.constant 0 : i32
    %c0_i32_0 = arith.constant 0 : i32
    %c0_i32_1 = arith.constant 0 : i32
    return %c0_i32, %c0_i32_0 : i32, i32
  }
  func.func @transform_2(%arg0: i32) -> (i32, i32) {
    %c0_i32 = arith.constant 0 : i32
    %c0_i32_0 = arith.constant 0 : i32
    %c0_i32_1 = arith.constant 0 : i32
    return %c0_i32, %c0_i32_0 : i32, i32
  }
  func.func @transform_3(%arg0: i32) -> (i32, i32, i32) {
    %c0_i32 = arith.constant 0 : i32
    %c0_i32_0 = arith.constant 0 : i32
    %c0_i32_1 = arith.constant 0 : i32
    return %arg0, %c0_i32, %c0_i32_0 : i32, i32, i32
  }
}

module attributes {stable_mosaic.version = 11 : i64} {
  func.func @_tap_conv_kernel(%arg0: i32, %arg1: memref<1x4x8x26xbf16, #tpu.memory_space<vmem>>, %arg2: memref<4x72xbf16, #tpu.memory_space<vmem>>, %arg3: memref<4x1xf32, #tpu.memory_space<vmem>>, %arg4: memref<1x4x20xbf16, #tpu.memory_space<vmem>>) attributes {dimension_semantics = [#tpu.dimension_semantics<parallel>], iteration_bounds = array<i64: 2>, scalar_prefetch = 0 : i64, scratch_operands = 0 : i64, tpu.core_type = #tpu.core_type<tc>, window_params = [{transform_indices = @transform_0, window_bounds = array<i64: 1, 4, 8, 26>}, {pipeline_mode = #tpu.pipeline_mode<synchronous>, transform_indices = @transform_1, window_bounds = array<i64: 4, 72>}, {pipeline_mode = #tpu.pipeline_mode<synchronous>, transform_indices = @transform_2, window_bounds = array<i64: 4, 1>}, {transform_indices = @transform_3, window_bounds = array<i64: 1, 4, 20>}]} {
    %c0 = arith.constant 0 : index
    %c0_0 = arith.constant 0 : index
    %c0_1 = arith.constant 0 : index
    %c0_2 = arith.constant 0 : index
    %0 = vector.load %arg1[%c0, %c0_0, %c0_1, %c0_2] : memref<1x4x8x26xbf16, #tpu.memory_space<vmem>>, vector<1x4x8x26xbf16>
    %1 = vector.shape_cast %0 : vector<1x4x8x26xbf16> to vector<4x8x26xbf16>
    %cst = arith.constant 0.000000e+00 : bf16
    %2 = vector.broadcast %cst : bf16 to vector<4x8x26xbf16>
    %3 = arith.maximumf %1, %2 : vector<4x8x26xbf16>
    %4 = vector.extract_strided_slice %3 {offsets = [0, 0, 0], sizes = [1, 8, 20], strides = [1, 1, 1]} : vector<4x8x26xbf16> to vector<1x8x20xbf16>
    %5 = vector.shape_cast %4 : vector<1x8x20xbf16> to vector<8x20xbf16>
    %6 = vector.extract_strided_slice %3 {offsets = [1, 0, 0], sizes = [1, 8, 20], strides = [1, 1, 1]} : vector<4x8x26xbf16> to vector<1x8x20xbf16>
    %7 = vector.shape_cast %6 : vector<1x8x20xbf16> to vector<8x20xbf16>
    %8 = vector.extract_strided_slice %3 {offsets = [0, 0, 1], sizes = [1, 8, 20], strides = [1, 1, 1]} : vector<4x8x26xbf16> to vector<1x8x20xbf16>
    %9 = vector.shape_cast %8 : vector<1x8x20xbf16> to vector<8x20xbf16>
    %10 = vector.extract_strided_slice %3 {offsets = [2, 0, 0], sizes = [1, 8, 20], strides = [1, 1, 1]} : vector<4x8x26xbf16> to vector<1x8x20xbf16>
    %11 = vector.shape_cast %10 : vector<1x8x20xbf16> to vector<8x20xbf16>
    %12 = vector.extract_strided_slice %3 {offsets = [3, 0, 0], sizes = [1, 8, 20], strides = [1, 1, 1]} : vector<4x8x26xbf16> to vector<1x8x20xbf16>
    %13 = vector.shape_cast %12 : vector<1x8x20xbf16> to vector<8x20xbf16>
    %14 = vector.extract_strided_slice %3 {offsets = [2, 0, 1], sizes = [1, 8, 20], strides = [1, 1, 1]} : vector<4x8x26xbf16> to vector<1x8x20xbf16>
    %15 = vector.shape_cast %14 : vector<1x8x20xbf16> to vector<8x20xbf16>
    %16 = vector.extract_strided_slice %3 {offsets = [0, 0, 5], sizes = [1, 8, 20], strides = [1, 1, 1]} : vector<4x8x26xbf16> to vector<1x8x20xbf16>
    %17 = vector.shape_cast %16 : vector<1x8x20xbf16> to vector<8x20xbf16>
    %18 = vector.extract_strided_slice %3 {offsets = [1, 0, 5], sizes = [1, 8, 20], strides = [1, 1, 1]} : vector<4x8x26xbf16> to vector<1x8x20xbf16>
    %19 = vector.shape_cast %18 : vector<1x8x20xbf16> to vector<8x20xbf16>
    %20 = vector.extract_strided_slice %3 {offsets = [0, 0, 6], sizes = [1, 8, 20], strides = [1, 1, 1]} : vector<4x8x26xbf16> to vector<1x8x20xbf16>
    %21 = vector.shape_cast %20 : vector<1x8x20xbf16> to vector<8x20xbf16>
    %22 = vector.shape_cast %5 : vector<8x20xbf16> to vector<1x8x20xbf16>
    %23 = vector.shape_cast %7 : vector<8x20xbf16> to vector<1x8x20xbf16>
    %24 = vector.shape_cast %9 : vector<8x20xbf16> to vector<1x8x20xbf16>
    %25 = vector.shape_cast %11 : vector<8x20xbf16> to vector<1x8x20xbf16>
    %26 = vector.shape_cast %13 : vector<8x20xbf16> to vector<1x8x20xbf16>
    %27 = vector.shape_cast %15 : vector<8x20xbf16> to vector<1x8x20xbf16>
    %28 = vector.shape_cast %17 : vector<8x20xbf16> to vector<1x8x20xbf16>
    %29 = vector.shape_cast %19 : vector<8x20xbf16> to vector<1x8x20xbf16>
    %30 = vector.shape_cast %21 : vector<8x20xbf16> to vector<1x8x20xbf16>
    %31 = tpu.concatenate %22, %23, %24, %25, %26, %27, %28, %29, %30 in 0 : vector<1x8x20xbf16>, vector<1x8x20xbf16>, vector<1x8x20xbf16>, vector<1x8x20xbf16>, vector<1x8x20xbf16>, vector<1x8x20xbf16>, vector<1x8x20xbf16>, vector<1x8x20xbf16>, vector<1x8x20xbf16> -> vector<9x8x20xbf16>
    %32 = vector.shape_cast %31 : vector<9x8x20xbf16> to vector<72x20xbf16>
    %c0_3 = arith.constant 0 : index
    %c0_4 = arith.constant 0 : index
    %33 = vector.load %arg2[%c0_3, %c0_4] : memref<4x72xbf16, #tpu.memory_space<vmem>>, vector<4x72xbf16>
    %cst_5 = arith.constant dense<0.000000e+00> : vector<4x20xf32>
    %34 = tpu.matmul %33, %32, %cst_5 {dimension_numbers = #tpu.dot_dimension_numbers<[1], [0], [0], [1], [0, 0, 1, 1], [], []>} : vector<4x72xbf16>, vector<72x20xbf16>, vector<4x20xf32> -> vector<4x20xf32>
    %c0_6 = arith.constant 0 : index
    %c0_7 = arith.constant 0 : index
    %35 = vector.load %arg3[%c0_6, %c0_7] : memref<4x1xf32, #tpu.memory_space<vmem>>, vector<4x1xf32>
    %36 = vector.broadcast %35 : vector<4x1xf32> to vector<4x20xf32>
    %37 = arith.addf %34, %36 : vector<4x20xf32>
    %38 = arith.truncf %37 : vector<4x20xf32> to vector<4x20xbf16>
    %c0_8 = arith.constant 0 : index
    %c0_9 = arith.constant 0 : index
    %c0_10 = arith.constant 0 : index
    %39 = vector.load %arg4[%c0_8, %c0_9, %c0_10] : memref<1x4x20xbf16, #tpu.memory_space<vmem>>, vector<1x4x20xbf16>
    %40 = vector.shape_cast %39 : vector<1x4x20xbf16> to vector<4x20xbf16>
    %41 = vector.shape_cast %38 : vector<4x20xbf16> to vector<1x4x20xbf16>
    tpu.vector_store %arg4[%c0_8, %c0_9, %c0_10], %41 {strides = array<i32>} : memref<1x4x20xbf16, #tpu.memory_space<vmem>>, vector<1x4x20xbf16>,
    return
  }
  func.func @transform_0(%arg0: i32) -> (i32, i32, i32, i32) {
    %c0_i32 = arith.constant 0 : i32
    %c0_i32_0 = arith.constant 0 : i32
    %c0_i32_1 = arith.constant 0 : i32
    %c0_i32_2 = arith.constant 0 : i32
    return %arg0, %c0_i32, %c0_i32_0, %c0_i32_1 : i32, i32, i32, i32
  }
  func.func @transform_1(%arg0: i32) -> (i32, i32) {
    %c0_i32 = arith.constant 0 : i32
    %c0_i32_0 = arith.constant 0 : i32
    %c0_i32_1 = arith.constant 0 : i32
    return %c0_i32, %c0_i32_0 : i32, i32
  }
  func.func @transform_2(%arg0: i32) -> (i32, i32) {
    %c0_i32 = arith.constant 0 : i32
    %c0_i32_0 = arith.constant 0 : i32
    %c0_i32_1 = arith.constant 0 : i32
    return %c0_i32, %c0_i32_0 : i32, i32
  }
  func.func @transform_3(%arg0: i32) -> (i32, i32, i32) {
    %c0_i32 = arith.constant 0 : i32
    %c0_i32_0 = arith.constant 0 : i32
    %c0_i32_1 = arith.constant 0 : i32
    return %arg0, %c0_i32, %c0_i32_0 : i32, i32, i32
  }
}

module attributes {stable_mosaic.version = 11 : i64} {
  func.func @_tap_conv_kernel(%arg0: i32, %arg1: memref<1x1x8x16xbf16, #tpu.memory_space<vmem>>, %arg2: memref<8x8xbf16, #tpu.memory_space<vmem>>, %arg3: memref<8x1xf32, #tpu.memory_space<vmem>>, %arg4: memref<1x8x16xbf16, #tpu.memory_space<vmem>>) attributes {dimension_semantics = [#tpu.dimension_semantics<parallel>], iteration_bounds = array<i64: 2>, scalar_prefetch = 0 : i64, scratch_operands = 0 : i64, tpu.core_type = #tpu.core_type<tc>, window_params = [{transform_indices = @transform_0, window_bounds = array<i64: 1, 1, 8, 16>}, {pipeline_mode = #tpu.pipeline_mode<synchronous>, transform_indices = @transform_1, window_bounds = array<i64: 8, 8>}, {pipeline_mode = #tpu.pipeline_mode<synchronous>, transform_indices = @transform_2, window_bounds = array<i64: 8, 1>}, {transform_indices = @transform_3, window_bounds = array<i64: 1, 8, 16>}]} {
    %c0 = arith.constant 0 : index
    %c0_0 = arith.constant 0 : index
    %c0_1 = arith.constant 0 : index
    %c0_2 = arith.constant 0 : index
    %0 = vector.load %arg1[%c0, %c0_0, %c0_1, %c0_2] : memref<1x1x8x16xbf16, #tpu.memory_space<vmem>>, vector<1x1x8x16xbf16>
    %1 = vector.shape_cast %0 : vector<1x1x8x16xbf16> to vector<1x8x16xbf16>
    %cst = arith.constant 0.000000e+00 : bf16
    %2 = vector.broadcast %cst : bf16 to vector<1x8x16xbf16>
    %3 = arith.maximumf %1, %2 : vector<1x8x16xbf16>
    %4 = vector.shape_cast %3 : vector<1x8x16xbf16> to vector<8x16xbf16>
    %c0_3 = arith.constant 0 : index
    %c0_4 = arith.constant 0 : index
    %5 = vector.load %arg2[%c0_3, %c0_4] : memref<8x8xbf16, #tpu.memory_space<vmem>>, vector<8x8xbf16>
    %cst_5 = arith.constant dense<0.000000e+00> : vector<8x16xf32>
    %6 = tpu.matmul %5, %4, %cst_5 {dimension_numbers = #tpu.dot_dimension_numbers<[1], [0], [0], [1], [0, 0, 1, 1], [], []>} : vector<8x8xbf16>, vector<8x16xbf16>, vector<8x16xf32> -> vector<8x16xf32>
    %c0_6 = arith.constant 0 : index
    %c0_7 = arith.constant 0 : index
    %7 = vector.load %arg3[%c0_6, %c0_7] : memref<8x1xf32, #tpu.memory_space<vmem>>, vector<8x1xf32>
    %8 = vector.broadcast %7 : vector<8x1xf32> to vector<8x16xf32>
    %9 = arith.addf %6, %8 : vector<8x16xf32>
    %10 = arith.truncf %9 : vector<8x16xf32> to vector<8x16xbf16>
    %c0_8 = arith.constant 0 : index
    %c0_9 = arith.constant 0 : index
    %c0_10 = arith.constant 0 : index
    %11 = vector.load %arg4[%c0_8, %c0_9, %c0_10] : memref<1x8x16xbf16, #tpu.memory_space<vmem>>, vector<1x8x16xbf16>
    %12 = vector.shape_cast %11 : vector<1x8x16xbf16> to vector<8x16xbf16>
    %13 = vector.shape_cast %10 : vector<8x16xbf16> to vector<1x8x16xbf16>
    tpu.vector_store %arg4[%c0_8, %c0_9, %c0_10], %13 {strides = array<i32>} : memref<1x8x16xbf16, #tpu.memory_space<vmem>>, vector<1x8x16xbf16>,
    return
  }
  func.func @transform_0(%arg0: i32) -> (i32, i32, i32, i32) {
    %c0_i32 = arith.constant 0 : i32
    %c0_i32_0 = arith.constant 0 : i32
    %c0_i32_1 = arith.constant 0 : i32
    %c0_i32_2 = arith.constant 0 : i32
    return %arg0, %c0_i32, %c0_i32_0, %c0_i32_1 : i32, i32, i32, i32
  }
  func.func @transform_1(%arg0: i32) -> (i32, i32) {
    %c0_i32 = arith.constant 0 : i32
    %c0_i32_0 = arith.constant 0 : i32
    %c0_i32_1 = arith.constant 0 : i32
    return %c0_i32, %c0_i32_0 : i32, i32
  }
  func.func @transform_2(%arg0: i32) -> (i32, i32) {
    %c0_i32 = arith.constant 0 : i32
    %c0_i32_0 = arith.constant 0 : i32
    %c0_i32_1 = arith.constant 0 : i32
    return %c0_i32, %c0_i32_0 : i32, i32
  }
  func.func @transform_3(%arg0: i32) -> (i32, i32, i32) {
    %c0_i32 = arith.constant 0 : i32
    %c0_i32_0 = arith.constant 0 : i32
    %c0_i32_1 = arith.constant 0 : i32
    return %arg0, %c0_i32, %c0_i32_0 : i32, i32, i32
  }
}

module attributes {stable_mosaic.version = 11 : i64} {
  func.func @_tap_conv_kernel(%arg0: i32, %arg1: memref<1x1x8x38xbf16, #tpu.memory_space<vmem>>, %arg2: memref<16x72xbf16, #tpu.memory_space<vmem>>, %arg3: memref<16x1xf32, #tpu.memory_space<vmem>>, %arg4: memref<1x16x24xbf16, #tpu.memory_space<vmem>>) attributes {dimension_semantics = [#tpu.dimension_semantics<parallel>], iteration_bounds = array<i64: 2>, scalar_prefetch = 0 : i64, scratch_operands = 0 : i64, tpu.core_type = #tpu.core_type<tc>, window_params = [{transform_indices = @transform_0, window_bounds = array<i64: 1, 1, 8, 38>}, {pipeline_mode = #tpu.pipeline_mode<synchronous>, transform_indices = @transform_1, window_bounds = array<i64: 16, 72>}, {pipeline_mode = #tpu.pipeline_mode<synchronous>, transform_indices = @transform_2, window_bounds = array<i64: 16, 1>}, {transform_indices = @transform_3, window_bounds = array<i64: 1, 16, 24>}]} {
    %c0 = arith.constant 0 : index
    %c0_0 = arith.constant 0 : index
    %c0_1 = arith.constant 0 : index
    %c0_2 = arith.constant 0 : index
    %0 = vector.load %arg1[%c0, %c0_0, %c0_1, %c0_2] : memref<1x1x8x38xbf16, #tpu.memory_space<vmem>>, vector<1x1x8x38xbf16>
    %1 = vector.shape_cast %0 : vector<1x1x8x38xbf16> to vector<1x8x38xbf16>
    %cst = arith.constant 0.000000e+00 : bf16
    %2 = vector.broadcast %cst : bf16 to vector<1x8x38xbf16>
    %3 = arith.maximumf %1, %2 : vector<1x8x38xbf16>
    %4 = vector.extract_strided_slice %3 {offsets = [0, 0, 0], sizes = [1, 8, 24], strides = [1, 1, 1]} : vector<1x8x38xbf16> to vector<1x8x24xbf16>
    %5 = vector.shape_cast %4 : vector<1x8x24xbf16> to vector<8x24xbf16>
    %6 = vector.extract_strided_slice %3 {offsets = [0, 0, 1], sizes = [1, 8, 24], strides = [1, 1, 1]} : vector<1x8x38xbf16> to vector<1x8x24xbf16>
    %7 = vector.shape_cast %6 : vector<1x8x24xbf16> to vector<8x24xbf16>
    %8 = vector.extract_strided_slice %3 {offsets = [0, 0, 2], sizes = [1, 8, 24], strides = [1, 1, 1]} : vector<1x8x38xbf16> to vector<1x8x24xbf16>
    %9 = vector.shape_cast %8 : vector<1x8x24xbf16> to vector<8x24xbf16>
    %10 = vector.extract_strided_slice %3 {offsets = [0, 0, 6], sizes = [1, 8, 24], strides = [1, 1, 1]} : vector<1x8x38xbf16> to vector<1x8x24xbf16>
    %11 = vector.shape_cast %10 : vector<1x8x24xbf16> to vector<8x24xbf16>
    %12 = vector.extract_strided_slice %3 {offsets = [0, 0, 7], sizes = [1, 8, 24], strides = [1, 1, 1]} : vector<1x8x38xbf16> to vector<1x8x24xbf16>
    %13 = vector.shape_cast %12 : vector<1x8x24xbf16> to vector<8x24xbf16>
    %14 = vector.extract_strided_slice %3 {offsets = [0, 0, 8], sizes = [1, 8, 24], strides = [1, 1, 1]} : vector<1x8x38xbf16> to vector<1x8x24xbf16>
    %15 = vector.shape_cast %14 : vector<1x8x24xbf16> to vector<8x24xbf16>
    %16 = vector.extract_strided_slice %3 {offsets = [0, 0, 12], sizes = [1, 8, 24], strides = [1, 1, 1]} : vector<1x8x38xbf16> to vector<1x8x24xbf16>
    %17 = vector.shape_cast %16 : vector<1x8x24xbf16> to vector<8x24xbf16>
    %18 = vector.extract_strided_slice %3 {offsets = [0, 0, 13], sizes = [1, 8, 24], strides = [1, 1, 1]} : vector<1x8x38xbf16> to vector<1x8x24xbf16>
    %19 = vector.shape_cast %18 : vector<1x8x24xbf16> to vector<8x24xbf16>
    %20 = vector.extract_strided_slice %3 {offsets = [0, 0, 14], sizes = [1, 8, 24], strides = [1, 1, 1]} : vector<1x8x38xbf16> to vector<1x8x24xbf16>
    %21 = vector.shape_cast %20 : vector<1x8x24xbf16> to vector<8x24xbf16>
    %22 = vector.shape_cast %5 : vector<8x24xbf16> to vector<1x8x24xbf16>
    %23 = vector.shape_cast %7 : vector<8x24xbf16> to vector<1x8x24xbf16>
    %24 = vector.shape_cast %9 : vector<8x24xbf16> to vector<1x8x24xbf16>
    %25 = vector.shape_cast %11 : vector<8x24xbf16> to vector<1x8x24xbf16>
    %26 = vector.shape_cast %13 : vector<8x24xbf16> to vector<1x8x24xbf16>
    %27 = vector.shape_cast %15 : vector<8x24xbf16> to vector<1x8x24xbf16>
    %28 = vector.shape_cast %17 : vector<8x24xbf16> to vector<1x8x24xbf16>
    %29 = vector.shape_cast %19 : vector<8x24xbf16> to vector<1x8x24xbf16>
    %30 = vector.shape_cast %21 : vector<8x24xbf16> to vector<1x8x24xbf16>
    %31 = tpu.concatenate %22, %23, %24, %25, %26, %27, %28, %29, %30 in 0 : vector<1x8x24xbf16>, vector<1x8x24xbf16>, vector<1x8x24xbf16>, vector<1x8x24xbf16>, vector<1x8x24xbf16>, vector<1x8x24xbf16>, vector<1x8x24xbf16>, vector<1x8x24xbf16>, vector<1x8x24xbf16> -> vector<9x8x24xbf16>
    %32 = vector.shape_cast %31 : vector<9x8x24xbf16> to vector<72x24xbf16>
    %c0_3 = arith.constant 0 : index
    %c0_4 = arith.constant 0 : index
    %33 = vector.load %arg2[%c0_3, %c0_4] : memref<16x72xbf16, #tpu.memory_space<vmem>>, vector<16x72xbf16>
    %cst_5 = arith.constant dense<0.000000e+00> : vector<16x24xf32>
    %34 = tpu.matmul %33, %32, %cst_5 {dimension_numbers = #tpu.dot_dimension_numbers<[1], [0], [0], [1], [0, 0, 1, 1], [], []>} : vector<16x72xbf16>, vector<72x24xbf16>, vector<16x24xf32> -> vector<16x24xf32>
    %c0_6 = arith.constant 0 : index
    %c0_7 = arith.constant 0 : index
    %35 = vector.load %arg3[%c0_6, %c0_7] : memref<16x1xf32, #tpu.memory_space<vmem>>, vector<16x1xf32>
    %36 = vector.broadcast %35 : vector<16x1xf32> to vector<16x24xf32>
    %37 = arith.addf %34, %36 : vector<16x24xf32>
    %38 = arith.truncf %37 : vector<16x24xf32> to vector<16x24xbf16>
    %c0_8 = arith.constant 0 : index
    %c0_9 = arith.constant 0 : index
    %c0_10 = arith.constant 0 : index
    %39 = vector.load %arg4[%c0_8, %c0_9, %c0_10] : memref<1x16x24xbf16, #tpu.memory_space<vmem>>, vector<1x16x24xbf16>
    %40 = vector.shape_cast %39 : vector<1x16x24xbf16> to vector<16x24xbf16>
    %41 = vector.shape_cast %38 : vector<16x24xbf16> to vector<1x16x24xbf16>
    tpu.vector_store %arg4[%c0_8, %c0_9, %c0_10], %41 {strides = array<i32>} : memref<1x16x24xbf16, #tpu.memory_space<vmem>>, vector<1x16x24xbf16>,
    return
  }
  func.func @transform_0(%arg0: i32) -> (i32, i32, i32, i32) {
    %c0_i32 = arith.constant 0 : i32
    %c0_i32_0 = arith.constant 0 : i32
    %c0_i32_1 = arith.constant 0 : i32
    %c0_i32_2 = arith.constant 0 : i32
    return %arg0, %c0_i32, %c0_i32_0, %c0_i32_1 : i32, i32, i32, i32
  }
  func.func @transform_1(%arg0: i32) -> (i32, i32) {
    %c0_i32 = arith.constant 0 : i32
    %c0_i32_0 = arith.constant 0 : i32
    %c0_i32_1 = arith.constant 0 : i32
    return %c0_i32, %c0_i32_0 : i32, i32
  }
  func.func @transform_2(%arg0: i32) -> (i32, i32) {
    %c0_i32 = arith.constant 0 : i32
    %c0_i32_0 = arith.constant 0 : i32
    %c0_i32_1 = arith.constant 0 : i32
    return %c0_i32, %c0_i32_0 : i32, i32
  }
  func.func @transform_3(%arg0: i32) -> (i32, i32, i32) {
    %c0_i32 = arith.constant 0 : i32
    %c0_i32_0 = arith.constant 0 : i32
    %c0_i32_1 = arith.constant 0 : i32
    return %arg0, %c0_i32, %c0_i32_0 : i32, i32, i32
  }
}

module attributes {stable_mosaic.version = 11 : i64} {
  func.func @_tap_conv_kernel(%arg0: i32, %arg1: memref<1x1x4x102xbf16, #tpu.memory_space<vmem>>, %arg2: memref<4x36xbf16, #tpu.memory_space<vmem>>, %arg3: memref<4x1xf32, #tpu.memory_space<vmem>>, %arg4: memref<1x4x80xbf16, #tpu.memory_space<vmem>>) attributes {dimension_semantics = [#tpu.dimension_semantics<parallel>], iteration_bounds = array<i64: 2>, scalar_prefetch = 0 : i64, scratch_operands = 0 : i64, tpu.core_type = #tpu.core_type<tc>, window_params = [{transform_indices = @transform_0, window_bounds = array<i64: 1, 1, 4, 102>}, {pipeline_mode = #tpu.pipeline_mode<synchronous>, transform_indices = @transform_1, window_bounds = array<i64: 4, 36>}, {pipeline_mode = #tpu.pipeline_mode<synchronous>, transform_indices = @transform_2, window_bounds = array<i64: 4, 1>}, {transform_indices = @transform_3, window_bounds = array<i64: 1, 4, 80>}]} {
    %c0 = arith.constant 0 : index
    %c0_0 = arith.constant 0 : index
    %c0_1 = arith.constant 0 : index
    %c0_2 = arith.constant 0 : index
    %0 = vector.load %arg1[%c0, %c0_0, %c0_1, %c0_2] : memref<1x1x4x102xbf16, #tpu.memory_space<vmem>>, vector<1x1x4x102xbf16>
    %1 = vector.shape_cast %0 : vector<1x1x4x102xbf16> to vector<1x4x102xbf16>
    %cst = arith.constant 0.000000e+00 : bf16
    %2 = vector.broadcast %cst : bf16 to vector<1x4x102xbf16>
    %3 = arith.maximumf %1, %2 : vector<1x4x102xbf16>
    %4 = vector.extract_strided_slice %3 {offsets = [0, 0, 0], sizes = [1, 4, 80], strides = [1, 1, 1]} : vector<1x4x102xbf16> to vector<1x4x80xbf16>
    %5 = vector.shape_cast %4 : vector<1x4x80xbf16> to vector<4x80xbf16>
    %6 = vector.extract_strided_slice %3 {offsets = [0, 0, 1], sizes = [1, 4, 80], strides = [1, 1, 1]} : vector<1x4x102xbf16> to vector<1x4x80xbf16>
    %7 = vector.shape_cast %6 : vector<1x4x80xbf16> to vector<4x80xbf16>
    %8 = vector.extract_strided_slice %3 {offsets = [0, 0, 2], sizes = [1, 4, 80], strides = [1, 1, 1]} : vector<1x4x102xbf16> to vector<1x4x80xbf16>
    %9 = vector.shape_cast %8 : vector<1x4x80xbf16> to vector<4x80xbf16>
    %10 = vector.extract_strided_slice %3 {offsets = [0, 0, 10], sizes = [1, 4, 80], strides = [1, 1, 1]} : vector<1x4x102xbf16> to vector<1x4x80xbf16>
    %11 = vector.shape_cast %10 : vector<1x4x80xbf16> to vector<4x80xbf16>
    %12 = vector.extract_strided_slice %3 {offsets = [0, 0, 11], sizes = [1, 4, 80], strides = [1, 1, 1]} : vector<1x4x102xbf16> to vector<1x4x80xbf16>
    %13 = vector.shape_cast %12 : vector<1x4x80xbf16> to vector<4x80xbf16>
    %14 = vector.extract_strided_slice %3 {offsets = [0, 0, 12], sizes = [1, 4, 80], strides = [1, 1, 1]} : vector<1x4x102xbf16> to vector<1x4x80xbf16>
    %15 = vector.shape_cast %14 : vector<1x4x80xbf16> to vector<4x80xbf16>
    %16 = vector.extract_strided_slice %3 {offsets = [0, 0, 20], sizes = [1, 4, 80], strides = [1, 1, 1]} : vector<1x4x102xbf16> to vector<1x4x80xbf16>
    %17 = vector.shape_cast %16 : vector<1x4x80xbf16> to vector<4x80xbf16>
    %18 = vector.extract_strided_slice %3 {offsets = [0, 0, 21], sizes = [1, 4, 80], strides = [1, 1, 1]} : vector<1x4x102xbf16> to vector<1x4x80xbf16>
    %19 = vector.shape_cast %18 : vector<1x4x80xbf16> to vector<4x80xbf16>
    %20 = vector.extract_strided_slice %3 {offsets = [0, 0, 22], sizes = [1, 4, 80], strides = [1, 1, 1]} : vector<1x4x102xbf16> to vector<1x4x80xbf16>
    %21 = vector.shape_cast %20 : vector<1x4x80xbf16> to vector<4x80xbf16>
    %22 = vector.shape_cast %5 : vector<4x80xbf16> to vector<1x4x80xbf16>
    %23 = vector.shape_cast %7 : vector<4x80xbf16> to vector<1x4x80xbf16>
    %24 = vector.shape_cast %9 : vector<4x80xbf16> to vector<1x4x80xbf16>
    %25 = vector.shape_cast %11 : vector<4x80xbf16> to vector<1x4x80xbf16>
    %26 = vector.shape_cast %13 : vector<4x80xbf16> to vector<1x4x80xbf16>
    %27 = vector.shape_cast %15 : vector<4x80xbf16> to vector<1x4x80xbf16>
    %28 = vector.shape_cast %17 : vector<4x80xbf16> to vector<1x4x80xbf16>
    %29 = vector.shape_cast %19 : vector<4x80xbf16> to vector<1x4x80xbf16>
    %30 = vector.shape_cast %21 : vector<4x80xbf16> to vector<1x4x80xbf16>
    %31 = tpu.concatenate %22, %23, %24, %25, %26, %27, %28, %29, %30 in 0 : vector<1x4x80xbf16>, vector<1x4x80xbf16>, vector<1x4x80xbf16>, vector<1x4x80xbf16>, vector<1x4x80xbf16>, vector<1x4x80xbf16>, vector<1x4x80xbf16>, vector<1x4x80xbf16>, vector<1x4x80xbf16> -> vector<9x4x80xbf16>
    %32 = vector.shape_cast %31 : vector<9x4x80xbf16> to vector<36x80xbf16>
    %c0_3 = arith.constant 0 : index
    %c0_4 = arith.constant 0 : index
    %33 = vector.load %arg2[%c0_3, %c0_4] : memref<4x36xbf16, #tpu.memory_space<vmem>>, vector<4x36xbf16>
    %cst_5 = arith.constant dense<0.000000e+00> : vector<4x80xf32>
    %34 = tpu.matmul %33, %32, %cst_5 {dimension_numbers = #tpu.dot_dimension_numbers<[1], [0], [0], [1], [0, 0, 1, 1], [], []>} : vector<4x36xbf16>, vector<36x80xbf16>, vector<4x80xf32> -> vector<4x80xf32>
    %c0_6 = arith.constant 0 : index
    %c0_7 = arith.constant 0 : index
    %35 = vector.load %arg3[%c0_6, %c0_7] : memref<4x1xf32, #tpu.memory_space<vmem>>, vector<4x1xf32>
    %36 = vector.broadcast %35 : vector<4x1xf32> to vector<4x80xf32>
    %37 = arith.addf %34, %36 : vector<4x80xf32>
    %38 = arith.truncf %37 : vector<4x80xf32> to vector<4x80xbf16>
    %c0_8 = arith.constant 0 : index
    %c0_9 = arith.constant 0 : index
    %c0_10 = arith.constant 0 : index
    %39 = vector.load %arg4[%c0_8, %c0_9, %c0_10] : memref<1x4x80xbf16, #tpu.memory_space<vmem>>, vector<1x4x80xbf16>
    %40 = vector.shape_cast %39 : vector<1x4x80xbf16> to vector<4x80xbf16>
    %41 = vector.shape_cast %38 : vector<4x80xbf16> to vector<1x4x80xbf16>
    tpu.vector_store %arg4[%c0_8, %c0_9, %c0_10], %41 {strides = array<i32>} : memref<1x4x80xbf16, #tpu.memory_space<vmem>>, vector<1x4x80xbf16>,
    return
  }
  func.func @transform_0(%arg0: i32) -> (i32, i32, i32, i32) {
    %c0_i32 = arith.constant 0 : i32
    %c0_i32_0 = arith.constant 0 : i32
    %c0_i32_1 = arith.constant 0 : i32
    %c0_i32_2 = arith.constant 0 : i32
    return %arg0, %c0_i32, %c0_i32_0, %c0_i32_1 : i32, i32, i32, i32
  }
  func.func @transform_1(%arg0: i32) -> (i32, i32) {
    %c0_i32 = arith.constant 0 : i32
    %c0_i32_0 = arith.constant 0 : i32
    %c0_i32_1 = arith.constant 0 : i32
    return %c0_i32, %c0_i32_0 : i32, i32
  }
  func.func @transform_2(%arg0: i32) -> (i32, i32) {
    %c0_i32 = arith.constant 0 : i32
    %c0_i32_0 = arith.constant 0 : i32
    %c0_i32_1 = arith.constant 0 : i32
    return %c0_i32, %c0_i32_0 : i32, i32
  }
  func.func @transform_3(%arg0: i32) -> (i32, i32, i32) {
    %c0_i32 = arith.constant 0 : i32
    %c0_i32_0 = arith.constant 0 : i32
    %c0_i32_1 = arith.constant 0 : i32
    return %arg0, %c0_i32, %c0_i32_0 : i32, i32, i32
  }
}

module attributes {stable_mosaic.version = 11 : i64} {
  func.func @_tap_conv_kernel(%arg0: i32, %arg1: memref<1x1x16x64xbf16, #tpu.memory_space<vmem>>, %arg2: memref<8x16xbf16, #tpu.memory_space<vmem>>, %arg3: memref<8x1xf32, #tpu.memory_space<vmem>>, %arg4: memref<1x8x64xbf16, #tpu.memory_space<vmem>>) attributes {dimension_semantics = [#tpu.dimension_semantics<parallel>], iteration_bounds = array<i64: 2>, scalar_prefetch = 0 : i64, scratch_operands = 0 : i64, tpu.core_type = #tpu.core_type<tc>, window_params = [{transform_indices = @transform_0, window_bounds = array<i64: 1, 1, 16, 64>}, {pipeline_mode = #tpu.pipeline_mode<synchronous>, transform_indices = @transform_1, window_bounds = array<i64: 8, 16>}, {pipeline_mode = #tpu.pipeline_mode<synchronous>, transform_indices = @transform_2, window_bounds = array<i64: 8, 1>}, {transform_indices = @transform_3, window_bounds = array<i64: 1, 8, 64>}]} {
    %c0 = arith.constant 0 : index
    %c0_0 = arith.constant 0 : index
    %c0_1 = arith.constant 0 : index
    %c0_2 = arith.constant 0 : index
    %0 = vector.load %arg1[%c0, %c0_0, %c0_1, %c0_2] : memref<1x1x16x64xbf16, #tpu.memory_space<vmem>>, vector<1x1x16x64xbf16>
    %1 = vector.shape_cast %0 : vector<1x1x16x64xbf16> to vector<1x16x64xbf16>
    %cst = arith.constant 0.000000e+00 : bf16
    %2 = vector.broadcast %cst : bf16 to vector<1x16x64xbf16>
    %3 = arith.maximumf %1, %2 : vector<1x16x64xbf16>
    %4 = vector.shape_cast %3 : vector<1x16x64xbf16> to vector<16x64xbf16>
    %c0_3 = arith.constant 0 : index
    %c0_4 = arith.constant 0 : index
    %5 = vector.load %arg2[%c0_3, %c0_4] : memref<8x16xbf16, #tpu.memory_space<vmem>>, vector<8x16xbf16>
    %cst_5 = arith.constant dense<0.000000e+00> : vector<8x64xf32>
    %6 = tpu.matmul %5, %4, %cst_5 {dimension_numbers = #tpu.dot_dimension_numbers<[1], [0], [0], [1], [0, 0, 1, 1], [], []>} : vector<8x16xbf16>, vector<16x64xbf16>, vector<8x64xf32> -> vector<8x64xf32>
    %c0_6 = arith.constant 0 : index
    %c0_7 = arith.constant 0 : index
    %7 = vector.load %arg3[%c0_6, %c0_7] : memref<8x1xf32, #tpu.memory_space<vmem>>, vector<8x1xf32>
    %8 = vector.broadcast %7 : vector<8x1xf32> to vector<8x64xf32>
    %9 = arith.addf %6, %8 : vector<8x64xf32>
    %10 = arith.truncf %9 : vector<8x64xf32> to vector<8x64xbf16>
    %c0_8 = arith.constant 0 : index
    %c0_9 = arith.constant 0 : index
    %c0_10 = arith.constant 0 : index
    %11 = vector.load %arg4[%c0_8, %c0_9, %c0_10] : memref<1x8x64xbf16, #tpu.memory_space<vmem>>, vector<1x8x64xbf16>
    %12 = vector.shape_cast %11 : vector<1x8x64xbf16> to vector<8x64xbf16>
    %13 = vector.shape_cast %10 : vector<8x64xbf16> to vector<1x8x64xbf16>
    tpu.vector_store %arg4[%c0_8, %c0_9, %c0_10], %13 {strides = array<i32>} : memref<1x8x64xbf16, #tpu.memory_space<vmem>>, vector<1x8x64xbf16>,
    return
  }
  func.func @transform_0(%arg0: i32) -> (i32, i32, i32, i32) {
    %c0_i32 = arith.constant 0 : i32
    %c0_i32_0 = arith.constant 0 : i32
    %c0_i32_1 = arith.constant 0 : i32
    %c0_i32_2 = arith.constant 0 : i32
    return %arg0, %c0_i32, %c0_i32_0, %c0_i32_1 : i32, i32, i32, i32
  }
  func.func @transform_1(%arg0: i32) -> (i32, i32) {
    %c0_i32 = arith.constant 0 : i32
    %c0_i32_0 = arith.constant 0 : i32
    %c0_i32_1 = arith.constant 0 : i32
    return %c0_i32, %c0_i32_0 : i32, i32
  }
  func.func @transform_2(%arg0: i32) -> (i32, i32) {
    %c0_i32 = arith.constant 0 : i32
    %c0_i32_0 = arith.constant 0 : i32
    %c0_i32_1 = arith.constant 0 : i32
    return %c0_i32, %c0_i32_0 : i32, i32
  }
  func.func @transform_3(%arg0: i32) -> (i32, i32, i32) {
    %c0_i32 = arith.constant 0 : i32
    %c0_i32_0 = arith.constant 0 : i32
    %c0_i32_1 = arith.constant 0 : i32
    return %arg0, %c0_i32, %c0_i32_0 : i32, i32, i32
  }
}

module attributes {stable_mosaic.version = 11 : i64} {
  func.func @_tap_conv_kernel(%arg0: i32, %arg1: memref<1x1x8x102xbf16, #tpu.memory_space<vmem>>, %arg2: memref<16x72xbf16, #tpu.memory_space<vmem>>, %arg3: memref<16x1xf32, #tpu.memory_space<vmem>>, %arg4: memref<1x16x80xbf16, #tpu.memory_space<vmem>>) attributes {dimension_semantics = [#tpu.dimension_semantics<parallel>], iteration_bounds = array<i64: 2>, scalar_prefetch = 0 : i64, scratch_operands = 0 : i64, tpu.core_type = #tpu.core_type<tc>, window_params = [{transform_indices = @transform_0, window_bounds = array<i64: 1, 1, 8, 102>}, {pipeline_mode = #tpu.pipeline_mode<synchronous>, transform_indices = @transform_1, window_bounds = array<i64: 16, 72>}, {pipeline_mode = #tpu.pipeline_mode<synchronous>, transform_indices = @transform_2, window_bounds = array<i64: 16, 1>}, {transform_indices = @transform_3, window_bounds = array<i64: 1, 16, 80>}]} {
    %c0 = arith.constant 0 : index
    %c0_0 = arith.constant 0 : index
    %c0_1 = arith.constant 0 : index
    %c0_2 = arith.constant 0 : index
    %0 = vector.load %arg1[%c0, %c0_0, %c0_1, %c0_2] : memref<1x1x8x102xbf16, #tpu.memory_space<vmem>>, vector<1x1x8x102xbf16>
    %1 = vector.shape_cast %0 : vector<1x1x8x102xbf16> to vector<1x8x102xbf16>
    %cst = arith.constant 0.000000e+00 : bf16
    %2 = vector.broadcast %cst : bf16 to vector<1x8x102xbf16>
    %3 = arith.maximumf %1, %2 : vector<1x8x102xbf16>
    %4 = vector.extract_strided_slice %3 {offsets = [0, 0, 0], sizes = [1, 8, 80], strides = [1, 1, 1]} : vector<1x8x102xbf16> to vector<1x8x80xbf16>
    %5 = vector.shape_cast %4 : vector<1x8x80xbf16> to vector<8x80xbf16>
    %6 = vector.extract_strided_slice %3 {offsets = [0, 0, 1], sizes = [1, 8, 80], strides = [1, 1, 1]} : vector<1x8x102xbf16> to vector<1x8x80xbf16>
    %7 = vector.shape_cast %6 : vector<1x8x80xbf16> to vector<8x80xbf16>
    %8 = vector.extract_strided_slice %3 {offsets = [0, 0, 2], sizes = [1, 8, 80], strides = [1, 1, 1]} : vector<1x8x102xbf16> to vector<1x8x80xbf16>
    %9 = vector.shape_cast %8 : vector<1x8x80xbf16> to vector<8x80xbf16>
    %10 = vector.extract_strided_slice %3 {offsets = [0, 0, 10], sizes = [1, 8, 80], strides = [1, 1, 1]} : vector<1x8x102xbf16> to vector<1x8x80xbf16>
    %11 = vector.shape_cast %10 : vector<1x8x80xbf16> to vector<8x80xbf16>
    %12 = vector.extract_strided_slice %3 {offsets = [0, 0, 11], sizes = [1, 8, 80], strides = [1, 1, 1]} : vector<1x8x102xbf16> to vector<1x8x80xbf16>
    %13 = vector.shape_cast %12 : vector<1x8x80xbf16> to vector<8x80xbf16>
    %14 = vector.extract_strided_slice %3 {offsets = [0, 0, 12], sizes = [1, 8, 80], strides = [1, 1, 1]} : vector<1x8x102xbf16> to vector<1x8x80xbf16>
    %15 = vector.shape_cast %14 : vector<1x8x80xbf16> to vector<8x80xbf16>
    %16 = vector.extract_strided_slice %3 {offsets = [0, 0, 20], sizes = [1, 8, 80], strides = [1, 1, 1]} : vector<1x8x102xbf16> to vector<1x8x80xbf16>
    %17 = vector.shape_cast %16 : vector<1x8x80xbf16> to vector<8x80xbf16>
    %18 = vector.extract_strided_slice %3 {offsets = [0, 0, 21], sizes = [1, 8, 80], strides = [1, 1, 1]} : vector<1x8x102xbf16> to vector<1x8x80xbf16>
    %19 = vector.shape_cast %18 : vector<1x8x80xbf16> to vector<8x80xbf16>
    %20 = vector.extract_strided_slice %3 {offsets = [0, 0, 22], sizes = [1, 8, 80], strides = [1, 1, 1]} : vector<1x8x102xbf16> to vector<1x8x80xbf16>
    %21 = vector.shape_cast %20 : vector<1x8x80xbf16> to vector<8x80xbf16>
    %22 = vector.shape_cast %5 : vector<8x80xbf16> to vector<1x8x80xbf16>
    %23 = vector.shape_cast %7 : vector<8x80xbf16> to vector<1x8x80xbf16>
    %24 = vector.shape_cast %9 : vector<8x80xbf16> to vector<1x8x80xbf16>
    %25 = vector.shape_cast %11 : vector<8x80xbf16> to vector<1x8x80xbf16>
    %26 = vector.shape_cast %13 : vector<8x80xbf16> to vector<1x8x80xbf16>
    %27 = vector.shape_cast %15 : vector<8x80xbf16> to vector<1x8x80xbf16>
    %28 = vector.shape_cast %17 : vector<8x80xbf16> to vector<1x8x80xbf16>
    %29 = vector.shape_cast %19 : vector<8x80xbf16> to vector<1x8x80xbf16>
    %30 = vector.shape_cast %21 : vector<8x80xbf16> to vector<1x8x80xbf16>
    %31 = tpu.concatenate %22, %23, %24, %25, %26, %27, %28, %29, %30 in 0 : vector<1x8x80xbf16>, vector<1x8x80xbf16>, vector<1x8x80xbf16>, vector<1x8x80xbf16>, vector<1x8x80xbf16>, vector<1x8x80xbf16>, vector<1x8x80xbf16>, vector<1x8x80xbf16>, vector<1x8x80xbf16> -> vector<9x8x80xbf16>
    %32 = vector.shape_cast %31 : vector<9x8x80xbf16> to vector<72x80xbf16>
    %c0_3 = arith.constant 0 : index
    %c0_4 = arith.constant 0 : index
    %33 = vector.load %arg2[%c0_3, %c0_4] : memref<16x72xbf16, #tpu.memory_space<vmem>>, vector<16x72xbf16>
    %cst_5 = arith.constant dense<0.000000e+00> : vector<16x80xf32>
    %34 = tpu.matmul %33, %32, %cst_5 {dimension_numbers = #tpu.dot_dimension_numbers<[1], [0], [0], [1], [0, 0, 1, 1], [], []>} : vector<16x72xbf16>, vector<72x80xbf16>, vector<16x80xf32> -> vector<16x80xf32>
    %c0_6 = arith.constant 0 : index
    %c0_7 = arith.constant 0 : index
    %35 = vector.load %arg3[%c0_6, %c0_7] : memref<16x1xf32, #tpu.memory_space<vmem>>, vector<16x1xf32>
    %36 = vector.broadcast %35 : vector<16x1xf32> to vector<16x80xf32>
    %37 = arith.addf %34, %36 : vector<16x80xf32>
    %38 = arith.truncf %37 : vector<16x80xf32> to vector<16x80xbf16>
    %c0_8 = arith.constant 0 : index
    %c0_9 = arith.constant 0 : index
    %c0_10 = arith.constant 0 : index
    %39 = vector.load %arg4[%c0_8, %c0_9, %c0_10] : memref<1x16x80xbf16, #tpu.memory_space<vmem>>, vector<1x16x80xbf16>
    %40 = vector.shape_cast %39 : vector<1x16x80xbf16> to vector<16x80xbf16>
    %41 = vector.shape_cast %38 : vector<16x80xbf16> to vector<1x16x80xbf16>
    tpu.vector_store %arg4[%c0_8, %c0_9, %c0_10], %41 {strides = array<i32>} : memref<1x16x80xbf16, #tpu.memory_space<vmem>>, vector<1x16x80xbf16>,
    return
  }
  func.func @transform_0(%arg0: i32) -> (i32, i32, i32, i32) {
    %c0_i32 = arith.constant 0 : i32
    %c0_i32_0 = arith.constant 0 : i32
    %c0_i32_1 = arith.constant 0 : i32
    %c0_i32_2 = arith.constant 0 : i32
    return %arg0, %c0_i32, %c0_i32_0, %c0_i32_1 : i32, i32, i32, i32
  }
  func.func @transform_1(%arg0: i32) -> (i32, i32) {
    %c0_i32 = arith.constant 0 : i32
    %c0_i32_0 = arith.constant 0 : i32
    %c0_i32_1 = arith.constant 0 : i32
    return %c0_i32, %c0_i32_0 : i32, i32
  }
  func.func @transform_2(%arg0: i32) -> (i32, i32) {
    %c0_i32 = arith.constant 0 : i32
    %c0_i32_0 = arith.constant 0 : i32
    %c0_i32_1 = arith.constant 0 : i32
    return %c0_i32, %c0_i32_0 : i32, i32
  }
  func.func @transform_3(%arg0: i32) -> (i32, i32, i32) {
    %c0_i32 = arith.constant 0 : i32
    %c0_i32_0 = arith.constant 0 : i32
    %c0_i32_1 = arith.constant 0 : i32
    return %arg0, %c0_i32, %c0_i32_0 : i32, i32, i32
  }
}

module attributes {stable_mosaic.version = 11 : i64} {
  func.func @_tap_conv_kernel(%arg0: i32, %arg1: memref<1x1x4x326xbf16, #tpu.memory_space<vmem>>, %arg2: memref<4x36xbf16, #tpu.memory_space<vmem>>, %arg3: memref<4x1xf32, #tpu.memory_space<vmem>>, %arg4: memref<1x4x288xbf16, #tpu.memory_space<vmem>>) attributes {dimension_semantics = [#tpu.dimension_semantics<parallel>], iteration_bounds = array<i64: 2>, scalar_prefetch = 0 : i64, scratch_operands = 0 : i64, tpu.core_type = #tpu.core_type<tc>, window_params = [{transform_indices = @transform_0, window_bounds = array<i64: 1, 1, 4, 326>}, {pipeline_mode = #tpu.pipeline_mode<synchronous>, transform_indices = @transform_1, window_bounds = array<i64: 4, 36>}, {pipeline_mode = #tpu.pipeline_mode<synchronous>, transform_indices = @transform_2, window_bounds = array<i64: 4, 1>}, {transform_indices = @transform_3, window_bounds = array<i64: 1, 4, 288>}]} {
    %c0 = arith.constant 0 : index
    %c0_0 = arith.constant 0 : index
    %c0_1 = arith.constant 0 : index
    %c0_2 = arith.constant 0 : index
    %0 = vector.load %arg1[%c0, %c0_0, %c0_1, %c0_2] : memref<1x1x4x326xbf16, #tpu.memory_space<vmem>>, vector<1x1x4x326xbf16>
    %1 = vector.shape_cast %0 : vector<1x1x4x326xbf16> to vector<1x4x326xbf16>
    %cst = arith.constant 0.000000e+00 : bf16
    %2 = vector.broadcast %cst : bf16 to vector<1x4x326xbf16>
    %3 = arith.maximumf %1, %2 : vector<1x4x326xbf16>
    %4 = vector.extract_strided_slice %3 {offsets = [0, 0, 0], sizes = [1, 4, 288], strides = [1, 1, 1]} : vector<1x4x326xbf16> to vector<1x4x288xbf16>
    %5 = vector.shape_cast %4 : vector<1x4x288xbf16> to vector<4x288xbf16>
    %6 = vector.extract_strided_slice %3 {offsets = [0, 0, 1], sizes = [1, 4, 288], strides = [1, 1, 1]} : vector<1x4x326xbf16> to vector<1x4x288xbf16>
    %7 = vector.shape_cast %6 : vector<1x4x288xbf16> to vector<4x288xbf16>
    %8 = vector.extract_strided_slice %3 {offsets = [0, 0, 2], sizes = [1, 4, 288], strides = [1, 1, 1]} : vector<1x4x326xbf16> to vector<1x4x288xbf16>
    %9 = vector.shape_cast %8 : vector<1x4x288xbf16> to vector<4x288xbf16>
    %10 = vector.extract_strided_slice %3 {offsets = [0, 0, 18], sizes = [1, 4, 288], strides = [1, 1, 1]} : vector<1x4x326xbf16> to vector<1x4x288xbf16>
    %11 = vector.shape_cast %10 : vector<1x4x288xbf16> to vector<4x288xbf16>
    %12 = vector.extract_strided_slice %3 {offsets = [0, 0, 19], sizes = [1, 4, 288], strides = [1, 1, 1]} : vector<1x4x326xbf16> to vector<1x4x288xbf16>
    %13 = vector.shape_cast %12 : vector<1x4x288xbf16> to vector<4x288xbf16>
    %14 = vector.extract_strided_slice %3 {offsets = [0, 0, 20], sizes = [1, 4, 288], strides = [1, 1, 1]} : vector<1x4x326xbf16> to vector<1x4x288xbf16>
    %15 = vector.shape_cast %14 : vector<1x4x288xbf16> to vector<4x288xbf16>
    %16 = vector.extract_strided_slice %3 {offsets = [0, 0, 36], sizes = [1, 4, 288], strides = [1, 1, 1]} : vector<1x4x326xbf16> to vector<1x4x288xbf16>
    %17 = vector.shape_cast %16 : vector<1x4x288xbf16> to vector<4x288xbf16>
    %18 = vector.extract_strided_slice %3 {offsets = [0, 0, 37], sizes = [1, 4, 288], strides = [1, 1, 1]} : vector<1x4x326xbf16> to vector<1x4x288xbf16>
    %19 = vector.shape_cast %18 : vector<1x4x288xbf16> to vector<4x288xbf16>
    %20 = vector.extract_strided_slice %3 {offsets = [0, 0, 38], sizes = [1, 4, 288], strides = [1, 1, 1]} : vector<1x4x326xbf16> to vector<1x4x288xbf16>
    %21 = vector.shape_cast %20 : vector<1x4x288xbf16> to vector<4x288xbf16>
    %22 = vector.shape_cast %5 : vector<4x288xbf16> to vector<1x4x288xbf16>
    %23 = vector.shape_cast %7 : vector<4x288xbf16> to vector<1x4x288xbf16>
    %24 = vector.shape_cast %9 : vector<4x288xbf16> to vector<1x4x288xbf16>
    %25 = vector.shape_cast %11 : vector<4x288xbf16> to vector<1x4x288xbf16>
    %26 = vector.shape_cast %13 : vector<4x288xbf16> to vector<1x4x288xbf16>
    %27 = vector.shape_cast %15 : vector<4x288xbf16> to vector<1x4x288xbf16>
    %28 = vector.shape_cast %17 : vector<4x288xbf16> to vector<1x4x288xbf16>
    %29 = vector.shape_cast %19 : vector<4x288xbf16> to vector<1x4x288xbf16>
    %30 = vector.shape_cast %21 : vector<4x288xbf16> to vector<1x4x288xbf16>
    %31 = tpu.concatenate %22, %23, %24, %25, %26, %27, %28, %29, %30 in 0 : vector<1x4x288xbf16>, vector<1x4x288xbf16>, vector<1x4x288xbf16>, vector<1x4x288xbf16>, vector<1x4x288xbf16>, vector<1x4x288xbf16>, vector<1x4x288xbf16>, vector<1x4x288xbf16>, vector<1x4x288xbf16> -> vector<9x4x288xbf16>
    %32 = vector.shape_cast %31 : vector<9x4x288xbf16> to vector<36x288xbf16>
    %c0_3 = arith.constant 0 : index
    %c0_4 = arith.constant 0 : index
    %33 = vector.load %arg2[%c0_3, %c0_4] : memref<4x36xbf16, #tpu.memory_space<vmem>>, vector<4x36xbf16>
    %cst_5 = arith.constant dense<0.000000e+00> : vector<4x288xf32>
    %34 = tpu.matmul %33, %32, %cst_5 {dimension_numbers = #tpu.dot_dimension_numbers<[1], [0], [0], [1], [0, 0, 1, 1], [], []>} : vector<4x36xbf16>, vector<36x288xbf16>, vector<4x288xf32> -> vector<4x288xf32>
    %c0_6 = arith.constant 0 : index
    %c0_7 = arith.constant 0 : index
    %35 = vector.load %arg3[%c0_6, %c0_7] : memref<4x1xf32, #tpu.memory_space<vmem>>, vector<4x1xf32>
    %36 = vector.broadcast %35 : vector<4x1xf32> to vector<4x288xf32>
    %37 = arith.addf %34, %36 : vector<4x288xf32>
    %38 = arith.truncf %37 : vector<4x288xf32> to vector<4x288xbf16>
    %c0_8 = arith.constant 0 : index
    %c0_9 = arith.constant 0 : index
    %c0_10 = arith.constant 0 : index
    %39 = vector.load %arg4[%c0_8, %c0_9, %c0_10] : memref<1x4x288xbf16, #tpu.memory_space<vmem>>, vector<1x4x288xbf16>
    %40 = vector.shape_cast %39 : vector<1x4x288xbf16> to vector<4x288xbf16>
    %41 = vector.shape_cast %38 : vector<4x288xbf16> to vector<1x4x288xbf16>
    tpu.vector_store %arg4[%c0_8, %c0_9, %c0_10], %41 {strides = array<i32>} : memref<1x4x288xbf16, #tpu.memory_space<vmem>>, vector<1x4x288xbf16>,
    return
  }
  func.func @transform_0(%arg0: i32) -> (i32, i32, i32, i32) {
    %c0_i32 = arith.constant 0 : i32
    %c0_i32_0 = arith.constant 0 : i32
    %c0_i32_1 = arith.constant 0 : i32
    %c0_i32_2 = arith.constant 0 : i32
    return %arg0, %c0_i32, %c0_i32_0, %c0_i32_1 : i32, i32, i32, i32
  }
  func.func @transform_1(%arg0: i32) -> (i32, i32) {
    %c0_i32 = arith.constant 0 : i32
    %c0_i32_0 = arith.constant 0 : i32
    %c0_i32_1 = arith.constant 0 : i32
    return %c0_i32, %c0_i32_0 : i32, i32
  }
  func.func @transform_2(%arg0: i32) -> (i32, i32) {
    %c0_i32 = arith.constant 0 : i32
    %c0_i32_0 = arith.constant 0 : i32
    %c0_i32_1 = arith.constant 0 : i32
    return %c0_i32, %c0_i32_0 : i32, i32
  }
  func.func @transform_3(%arg0: i32) -> (i32, i32, i32) {
    %c0_i32 = arith.constant 0 : i32
    %c0_i32_0 = arith.constant 0 : i32
    %c0_i32_1 = arith.constant 0 : i32
    return %arg0, %c0_i32, %c0_i32_0 : i32, i32, i32
  }
}

module attributes {stable_mosaic.version = 11 : i64} {
  func.func @_tap_conv_kernel(%arg0: i32, %arg1: memref<1x1x8x326xbf16, #tpu.memory_space<vmem>>, %arg2: memref<3x72xbf16, #tpu.memory_space<vmem>>, %arg3: memref<3x1xf32, #tpu.memory_space<vmem>>, %arg4: memref<1x3x288xf32, #tpu.memory_space<vmem>>) attributes {dimension_semantics = [#tpu.dimension_semantics<parallel>], iteration_bounds = array<i64: 2>, scalar_prefetch = 0 : i64, scratch_operands = 0 : i64, tpu.core_type = #tpu.core_type<tc>, window_params = [{transform_indices = @transform_0, window_bounds = array<i64: 1, 1, 8, 326>}, {pipeline_mode = #tpu.pipeline_mode<synchronous>, transform_indices = @transform_1, window_bounds = array<i64: 3, 72>}, {pipeline_mode = #tpu.pipeline_mode<synchronous>, transform_indices = @transform_2, window_bounds = array<i64: 3, 1>}, {transform_indices = @transform_3, window_bounds = array<i64: 1, 3, 288>}]} {
    %c0 = arith.constant 0 : index
    %c0_0 = arith.constant 0 : index
    %c0_1 = arith.constant 0 : index
    %c0_2 = arith.constant 0 : index
    %0 = vector.load %arg1[%c0, %c0_0, %c0_1, %c0_2] : memref<1x1x8x326xbf16, #tpu.memory_space<vmem>>, vector<1x1x8x326xbf16>
    %1 = vector.shape_cast %0 : vector<1x1x8x326xbf16> to vector<1x8x326xbf16>
    %cst = arith.constant 0.000000e+00 : bf16
    %2 = vector.broadcast %cst : bf16 to vector<1x8x326xbf16>
    %3 = arith.maximumf %1, %2 : vector<1x8x326xbf16>
    %4 = vector.extract_strided_slice %3 {offsets = [0, 0, 0], sizes = [1, 8, 288], strides = [1, 1, 1]} : vector<1x8x326xbf16> to vector<1x8x288xbf16>
    %5 = vector.shape_cast %4 : vector<1x8x288xbf16> to vector<8x288xbf16>
    %6 = vector.extract_strided_slice %3 {offsets = [0, 0, 1], sizes = [1, 8, 288], strides = [1, 1, 1]} : vector<1x8x326xbf16> to vector<1x8x288xbf16>
    %7 = vector.shape_cast %6 : vector<1x8x288xbf16> to vector<8x288xbf16>
    %8 = vector.extract_strided_slice %3 {offsets = [0, 0, 2], sizes = [1, 8, 288], strides = [1, 1, 1]} : vector<1x8x326xbf16> to vector<1x8x288xbf16>
    %9 = vector.shape_cast %8 : vector<1x8x288xbf16> to vector<8x288xbf16>
    %10 = vector.extract_strided_slice %3 {offsets = [0, 0, 18], sizes = [1, 8, 288], strides = [1, 1, 1]} : vector<1x8x326xbf16> to vector<1x8x288xbf16>
    %11 = vector.shape_cast %10 : vector<1x8x288xbf16> to vector<8x288xbf16>
    %12 = vector.extract_strided_slice %3 {offsets = [0, 0, 19], sizes = [1, 8, 288], strides = [1, 1, 1]} : vector<1x8x326xbf16> to vector<1x8x288xbf16>
    %13 = vector.shape_cast %12 : vector<1x8x288xbf16> to vector<8x288xbf16>
    %14 = vector.extract_strided_slice %3 {offsets = [0, 0, 20], sizes = [1, 8, 288], strides = [1, 1, 1]} : vector<1x8x326xbf16> to vector<1x8x288xbf16>
    %15 = vector.shape_cast %14 : vector<1x8x288xbf16> to vector<8x288xbf16>
    %16 = vector.extract_strided_slice %3 {offsets = [0, 0, 36], sizes = [1, 8, 288], strides = [1, 1, 1]} : vector<1x8x326xbf16> to vector<1x8x288xbf16>
    %17 = vector.shape_cast %16 : vector<1x8x288xbf16> to vector<8x288xbf16>
    %18 = vector.extract_strided_slice %3 {offsets = [0, 0, 37], sizes = [1, 8, 288], strides = [1, 1, 1]} : vector<1x8x326xbf16> to vector<1x8x288xbf16>
    %19 = vector.shape_cast %18 : vector<1x8x288xbf16> to vector<8x288xbf16>
    %20 = vector.extract_strided_slice %3 {offsets = [0, 0, 38], sizes = [1, 8, 288], strides = [1, 1, 1]} : vector<1x8x326xbf16> to vector<1x8x288xbf16>
    %21 = vector.shape_cast %20 : vector<1x8x288xbf16> to vector<8x288xbf16>
    %22 = vector.shape_cast %5 : vector<8x288xbf16> to vector<1x8x288xbf16>
    %23 = vector.shape_cast %7 : vector<8x288xbf16> to vector<1x8x288xbf16>
    %24 = vector.shape_cast %9 : vector<8x288xbf16> to vector<1x8x288xbf16>
    %25 = vector.shape_cast %11 : vector<8x288xbf16> to vector<1x8x288xbf16>
    %26 = vector.shape_cast %13 : vector<8x288xbf16> to vector<1x8x288xbf16>
    %27 = vector.shape_cast %15 : vector<8x288xbf16> to vector<1x8x288xbf16>
    %28 = vector.shape_cast %17 : vector<8x288xbf16> to vector<1x8x288xbf16>
    %29 = vector.shape_cast %19 : vector<8x288xbf16> to vector<1x8x288xbf16>
    %30 = vector.shape_cast %21 : vector<8x288xbf16> to vector<1x8x288xbf16>
    %31 = tpu.concatenate %22, %23, %24, %25, %26, %27, %28, %29, %30 in 0 : vector<1x8x288xbf16>, vector<1x8x288xbf16>, vector<1x8x288xbf16>, vector<1x8x288xbf16>, vector<1x8x288xbf16>, vector<1x8x288xbf16>, vector<1x8x288xbf16>, vector<1x8x288xbf16>, vector<1x8x288xbf16> -> vector<9x8x288xbf16>
    %32 = vector.shape_cast %31 : vector<9x8x288xbf16> to vector<72x288xbf16>
    %c0_3 = arith.constant 0 : index
    %c0_4 = arith.constant 0 : index
    %33 = vector.load %arg2[%c0_3, %c0_4] : memref<3x72xbf16, #tpu.memory_space<vmem>>, vector<3x72xbf16>
    %cst_5 = arith.constant dense<0.000000e+00> : vector<3x288xf32>
    %34 = tpu.matmul %33, %32, %cst_5 {dimension_numbers = #tpu.dot_dimension_numbers<[1], [0], [0], [1], [0, 0, 1, 1], [], []>} : vector<3x72xbf16>, vector<72x288xbf16>, vector<3x288xf32> -> vector<3x288xf32>
    %c0_6 = arith.constant 0 : index
    %c0_7 = arith.constant 0 : index
    %35 = vector.load %arg3[%c0_6, %c0_7] : memref<3x1xf32, #tpu.memory_space<vmem>>, vector<3x1xf32>
    %36 = vector.broadcast %35 : vector<3x1xf32> to vector<3x288xf32>
    %37 = arith.addf %34, %36 : vector<3x288xf32>
    %38 = math.tanh %37 : vector<3x288xf32>
    %cst_8 = arith.constant 0.0392156877 : f32
    %39 = vector.broadcast %cst_8 : f32 to vector<3x288xf32>
    %40 = arith.mulf %38, %39 : vector<3x288xf32>
    %c0_9 = arith.constant 0 : index
    %c0_10 = arith.constant 0 : index
    %c0_11 = arith.constant 0 : index
    %41 = vector.load %arg4[%c0_9, %c0_10, %c0_11] : memref<1x3x288xf32, #tpu.memory_space<vmem>>, vector<1x3x288xf32>
    %42 = vector.shape_cast %41 : vector<1x3x288xf32> to vector<3x288xf32>
    %43 = vector.shape_cast %40 : vector<3x288xf32> to vector<1x3x288xf32>
    tpu.vector_store %arg4[%c0_9, %c0_10, %c0_11], %43 {strides = array<i32>} : memref<1x3x288xf32, #tpu.memory_space<vmem>>, vector<1x3x288xf32>,
    return
  }
  func.func @transform_0(%arg0: i32) -> (i32, i32, i32, i32) {
    %c0_i32 = arith.constant 0 : i32
    %c0_i32_0 = arith.constant 0 : i32
    %c0_i32_1 = arith.constant 0 : i32
    %c0_i32_2 = arith.constant 0 : i32
    return %arg0, %c0_i32, %c0_i32_0, %c0_i32_1 : i32, i32, i32, i32
  }
  func.func @transform_1(%arg0: i32) -> (i32, i32) {
    %c0_i32 = arith.constant 0 : i32
    %c0_i32_0 = arith.constant 0 : i32
    %c0_i32_1 = arith.constant 0 : i32
    return %c0_i32, %c0_i32_0 : i32, i32
  }
  func.func @transform_2(%arg0: i32) -> (i32, i32) {
    %c0_i32 = arith.constant 0 : i32
    %c0_i32_0 = arith.constant 0 : i32
    %c0_i32_1 = arith.constant 0 : i32
    return %c0_i32, %c0_i32_0 : i32, i32
  }
  func.func @transform_3(%arg0: i32) -> (i32, i32, i32) {
    %c0_i32 = arith.constant 0 : i32
    %c0_i32_0 = arith.constant 0 : i32
    %c0_i32_1 = arith.constant 0 : i32
    return %arg0, %c0_i32, %c0_i32_0 : i32, i32, i32
  }
}

</mosaic_0001>

<bundles_post_ra>
// kernel: _lambda_.16
= control target key start
LH: loop header
LB: loop body
LE: loop exit
PB: predicated region body
PF: predicated region fallthrough
CT: control target
= control target key end

     0   :  { %s364_s12 = smov 0   ;;  %s387_s0 = inlined_call_operand.vmem [shape: bf16[2,1,4,256], index: 0, kind: input, shape index: {}]   ;;  %s388_s1 = inlined_call_operand.vmem [shape: bf16[8,4], index: 1, kind: input, shape index: {}]   ;;  %s389_s2 = inlined_call_operand.vmem [shape: f32[8,1], index: 2, kind: input, shape index: {}]   ;;  %s390_s3 = inlined_call_operand.vmem [shape: bf16[2,8,256], index: 3, kind: output, shape index: {}]  }
   0x1 LB: > { %s306_s13 = sadd.s32 4294967295, %s340_s12   ;;  %p310_p0 = scmp.ge.s32.totalorder %s340_s12, 1  ;;  %s340_s12 = sphi %s364_s12, %s13_s12  }
   0x2   : > { %p137_p1 = scmp.lt.s32.totalorder %s340_s12, 3 }
   0x4   : > { %p138_p2 = pnand %p310_p0, %p137_p1 }
   0x5   : > { %p161_p3 = scmp.lt.s32.totalorder (!%p138_p2), %s306_s13, 1  ;;  %v185_v0 = vlaneseq (!%p138_p2)  ;;  %v175_v1 = vld [vmem:[%s389_s2] sm:$0xff] (!%p138_p2)  ;;  %v342_v2 = vmov (!%p138_p2), 1983009808   ;;  %v343_v4 = vmov (!%p138_p2), 0   ;;  %vm194_vm0 = vcmask (!%p138_p2), 1041408  }
   0x6   : > { %141 = sbr.rel (%p138_p2) target bundleno = 245 (0xf5), region = 32  ;;  %v183_v3 = vunpack.c.l.s4 (!%p138_p2), %v342_v2  ;;  %233 = vmatprep.mubr.bf16.mxu0 (!%p138_p2), %v343_v4  ;;  %333 = vset.pattern.permute.xlu0 (!%p138_p2), %v343_v4  ;;  %v174_v13 = vld [vmem:[%s388_s1] sm:$0xf] (!%p138_p2)  ;;  %vm190_vm1 = vcmask (!%p138_p2), 31744  }
   0x7   : > { %v186_v5 = vshrl.u32 (!%p138_p2), %v185_v0, 7  ;;  %178 = vperm.xlu0 (!%p138_p2), %333, %v175_v1  }
   0x8   : > { %v184_v6 = vunpack.c.0.s8 (!%p138_p2), %v183_v3 }
   0xa   : > { %v187_v7 = vsub.s32 (!%p138_p2), %v184_v6, %v186_v5 }
   0xd   : > { %s392_s13 = smov (!%p161_p3, %s306_s13), 1 }
   0xe   : > { %s320_s16 = sshll.u32 %s392_s13, 2  ;;  %s321_s22 = sshll.u32 %s392_s13, 3 }
   0xf   : > { %s165_s19 = scalar_lea.vmem %s387_s0, %s320_s16  ;;  %s170_s25 = scalar_lea.vmem %s390_s3, %s321_s22 }
  0x10   : > { %v172_v8 = vld [vmem:[%s165_s19] sm:$0xf] }
  0x11   : > { %v173_v9 = vmax.bf16 %v343_v4, %v172_v8 }
  0x13   : > { %v188_v10 = vrot.slane %v173_v9, %v187_v7 }
  0x15   : > { %v189_v11 = vcombine.high %v188_v10, %v188_v10  ;;  %v196_v12 = vsel %vm194_vm0, %v188_v10, 0 }
  0x17   : > { %315 = vmatprep.subr.msk.bf16.mxu0 %vm194_vm0, %v189_v11 }
  0x18   : > { %202 = vmatpush1.bf16.msra.mxu0 %v196_v12 }
  0x1b   : > { %316 = vmatmul.mubr.msk.bf16.vlgmr.msra.gmra.mrb[0].mxu0 %vm190_vm1, %v174_v13 }
  0x86   : > { %v179_v14 = vpop.permute.xlu0 %178 }
  0xee   : > { %v235_v15 = vpop.f32.mrb[0].mxu0 }
  0xef   : > { %v236_v16 = vadd.f32 %v235_v15, %v179_v14  ;;  %v237_v17 = vpop.f32.mrb[1].mxu0 }
  0xf0   : > { %v238_v18 = vadd.f32 %v237_v17, %v179_v14  ;;  %v239_v19 = vpop.f32.mrb[2].mxu0 }
  0xf1   : > { %v240_v20 = vpop.f32.mrb[3].mxu0 }
  0xf2   : > { %v322_v21 = vpack.c.bf16 %v238_v18, %v236_v16 }
  0xf4   : > { %250 = vst [vmem:[%s170_s25] sm:$0xff] %v322_v21 }
  0xf5 PF: > { %s13_s12 = sadd.s32 1, %s340_s12  }
  0xf6   : > { %p10_p4 = scmp.ge.s32.totalorder %s13_s12, 4  }
  0xf8   :  { %12 = sbr.rel (!%p10_p4) target bundleno = 1 (0x1), region = 62 }

// kernel: _lambda_.15
= control target key start
LH: loop header
LB: loop body
LE: loop exit
PB: predicated region body
PF: predicated region fallthrough
CT: control target
= control target key end

     0   :  { %s2051_s12 = smov 0   ;;  %s2515_s0 = inlined_call_operand.vmem [shape: bf16[2,1,3,490], index: 0, kind: input, shape index: {}]   ;;  %s2516_s1 = inlined_call_operand.vmem [shape: bf16[4,147], index: 1, kind: input, shape index: {}]   ;;  %s2517_s2 = inlined_call_operand.vmem [shape: f32[4,1], index: 2, kind: input, shape index: {}]   ;;  %s2518_s3 = inlined_call_operand.vmem [shape: bf16[2,4,352], index: 3, kind: output, shape index: {}]  }
   0x1 LB: > { %s1890_s13 = sadd.s32 4294967295, %s1999_s12   ;;  %p1894_p0 = scmp.ge.s32.totalorder %s1999_s12, 1  ;;  %s1999_s12 = sphi %s2051_s12, %s13_s12  }
   0x2   : > { %p137_p1 = scmp.lt.s32.totalorder %s1999_s12, 3 }
   0x4   : > { %p138_p2 = pnand %p1894_p0, %p137_p1 }
   0x5   : > { %p161_p3 = scmp.lt.s32.totalorder (!%p138_p2), %s1890_s13, 1  ;;  %s2001_s18 = smov (!%p138_p2), 125   ;;  %v2021_v1 = vmov (!%p138_p2), 0   ;;  %vm177_vm0 = vcmask (!%p138_p2), 1039360   ;;  %vm187_vm1 = vcmask (!%p138_p2), 1022976   ;;  %v428_v10 = vlaneseq (!%p138_p2) }
   0x6   : > { %141 = sbr.rel (%p138_p2) target bundleno = 566 (0x236), region = 32  ;;  %s2002_s19 = smov (!%p138_p2), 127   ;;  %1767 = vmatprep.subr.bf16.mxu1 (!%p138_p2), %v2021_v1  ;;  %1992 = vset.pattern.permute.xlu0 (!%p138_p2), %v2021_v1  ;;  %v2027_v8 = vmov (!%p138_p2), 1966171168   ;;  %vm182_vm2 = vcmask (!%p138_p2), 1031168   ;;  %vm192_vm3 = vcmask (!%p138_p2), 1014784  }
   0x7   : > { %s2003_s20 = smov (!%p138_p2), 124   ;;  %s2004_s21 = smov (!%p138_p2), 126   ;;  %v426_v9 = vunpack.c.l.s4 (!%p138_p2), %v2027_v8  ;;  %v2102_v17 = vshrl.u32 (!%p138_p2), %v428_v10, 7  ;;  %vm252_vm4 = vcmask (!%p138_p2), 883712   ;;  %vm207_vm5 = vcmask (!%p138_p2), 867328  }
   0x8   : > { %s2005_s22 = smov (!%p138_p2), 106   ;;  %s2006_s23 = smov (!%p138_p2), 108   ;;  %vm217_vm6 = vcmask (!%p138_p2), 850944   ;;  %vm212_vm7 = vcmask (!%p138_p2), 859136   ;;  %vm257_vm8 = vcmask (!%p138_p2), 875520   ;;  %vm227_vm9 = vcmask (!%p138_p2), 834560  }
   0x9   : > { %s2007_s24 = smov (!%p138_p2), 104   ;;  %s2008_s25 = smov (!%p138_p2), 105   ;;  %v427_v16 = vunpack.c.0.s8 (!%p138_p2), %v426_v9  ;;  %vm222_vm10 = vcmask (!%p138_p2), 842752   ;;  %vm262_vm11 = vcmask (!%p138_p2), 703488   ;;  %vm267_vm12 = vcmask (!%p138_p2), 695296  }
   0xa   : > { %s2009_s26 = smov (!%p138_p2), 103   ;;  %s2010_s27 = smov (!%p138_p2), 107   ;;  %vm242_vm13 = vcmask (!%p138_p2), 687104   ;;  %vm247_vm14 = vcmask (!%p138_p2), 678912   ;;  %vm197_vm15 = vcmask (!%p138_p2), 1006592  }
   0xb   : > { %s2011_s28 = smov (!%p138_p2), 84   ;;  %s2012_s29 = smov (!%p138_p2), 102   ;;  %v2112_v24 = vsub.s32 (!%p138_p2), %v427_v16, %v2102_v17 }
   0xc   : > { %s2013_s30 = smov (!%p138_p2), 86   ;;  %s2014_s4 = smov (!%p138_p2), 83  }
   0xd   : > { %s2520_s13 = smov (!%p161_p3, %s1890_s13), 1  ;;  %s2015_s5 = smov 110  }
   0xe   : > { %s1952_s14 = sshll.u32 %s2520_s13, 3  ;;  %s2016_s6 = smov 85  }
   0xf   : > { %s165_s17 = scalar_lea.vmem %s2515_s0, %s1952_s14  ;;  %s2017_s7 = smov 88  }
  0x10   : > { %v2065_v0 = vld [vmem:[%s165_s17] sm:$0xff]  ;;  %s2018_s8 = smov 109   ;;  %s2019_s9 = smov 123  }
  0x11   : > { %184 = vrot.lane.b32.xlu1 %v2065_v0, %s2001_s18  ;;  %174 = vrot.lane.b32.xlu0 %v2065_v0, %s2002_s19  ;;  %s2020_s10 = smov 87   ;;  %s2022_s11 = smov 122   ;;  %v2124_v31 = vrot.slane %v2065_v0, %v2112_v24 }
  0x12   : > { %s2023_s14 = smov 101   ;;  %s2024_s15 = smov 100  }
  0x13   : > { %s2025_s16 = smov 82   ;;  %s2026_s17 = smov 36   ;;  %v432_v40 = vcombine.high %v2124_v31, %v2124_v31 }
  0x14   : > { %s2028_s18 = smov 118  }
  0x15   : > { %189 = vrot.lane.b32.xlu1 %v2065_v0, %s2003_s20  ;;  %179 = vrot.lane.b32.xlu0 %v2065_v0, %s2004_s21 }
  0x19   : > { %204 = vrot.lane.b32.xlu1 %v2065_v0, %s2005_s22  ;;  %249 = vrot.lane.b32.xlu0 %v2065_v0, %s2006_s23  ;;  %s1953_s23 = smul.u32 6, %s2520_s13 }
  0x1d   : > { %214 = vrot.lane.b32.xlu1 %v2065_v0, %s2007_s24  ;;  %209 = vrot.lane.b32.xlu0 %v2065_v0, %s2008_s25 }
  0x21   : > { %219 = vrot.lane.b32.xlu1 %v2065_v0, %s2009_s26  ;;  %254 = vrot.lane.b32.xlu0 %v2065_v0, %s2010_s27  ;;  %s170_s26 = scalar_lea.vmem %s2518_s3, %s1953_s23 }
  0x25   : > { %239 = vrot.lane.b32.xlu1 %v2065_v0, %s2011_s28  ;;  %224 = vrot.lane.b32.xlu0 %v2065_v0, %s2012_s29 }
  0x29   : > { %259 = vrot.lane.b32.xlu1 %v2065_v0, %s2013_s30  ;;  %244 = vrot.lane.b32.xlu0 %v2065_v0, %s2014_s4 }
  0x2d   : > { %269 = vrot.lane.b32.xlu1 %v2065_v0, %s2015_s5  ;;  %264 = vrot.lane.b32.xlu0 %v2065_v0, %s2016_s6 }
  0x31   : > { %279 = vrot.lane.b32.xlu1 %v2065_v0, %s2017_s7  ;;  %274 = vrot.lane.b32.xlu0 %v2065_v0, %s2018_s8 }
  0x35   : > { %194 = vrot.lane.b32.xlu1 %v2065_v0, %s2019_s9  ;;  %284 = vrot.lane.b32.xlu0 %v2065_v0, %s2020_s10 }
  0x39   : > { %199 = vrot.lane.b32.xlu0 %v2065_v0, %s2022_s11  ;;  %229 = vrot.lane.b32.xlu1 %v2065_v0, %s2023_s14 }
  0x3d   : > { %234 = vrot.lane.b32.xlu0 %v2065_v0, %s2024_s15  ;;  %289 = vrot.lane.b32.xlu1 %v2065_v0, %s2025_s16 }
  0x41   : > { %354 = vrot.lane.b32.xlu1 %v2065_v0, %s2026_s17 }
  0x83   : > { %v185_v2 = vpop.permute.xlu1 %184  ;;  %v175_v3 = vpop.permute.xlu0 %174 }
  0x84   : > { %v186_v4 = vrot.slane %v185_v2, 2  ;;  %v176_v5 = vrot.slane %v175_v3, 2 }
  0x86   : > { %v2096_v6 = vsel %vm177_vm0, %v175_v3, %v176_v5  ;;  %v188_v14 = vsel %vm187_vm1, %v185_v2, %v186_v4  ;;  %vm272_vm0 = vcmask 900096   ;;  %vm202_vm1 = vcmask 998400  }
  0x87   : > { %v190_v7 = vpop.permute.xlu1 %189  ;;  %291 = vrot.lane.b32.xlu0 %v2096_v6, %s2025_s16  ;;  %v180_v11 = vpop.permute.xlu0 %179  ;;  %v439_v30 = vrot.slane %v2096_v6, %v2112_v24  ;;  %v455_v47 = vrot.slane %v188_v14, %v2112_v24 }
  0x88   : > { %v191_v12 = vrot.slane %v190_v7, 2  ;;  %v181_v13 = vrot.slane %v180_v11, 2 }
  0x89   : > { %v440_v37 = vcombine.high %v439_v30, %v439_v30  ;;  %v821_v38 = vunpack.i.h.s16 %v439_v30  ;;  %v1899_v51 = vpack.i.b16 %v439_v30, %v432_v40  ;;  %v456_v59 = vcombine.high %v455_v47, %v455_v47 }
  0x8a   : > { %v2100_v15 = vsel %vm182_vm2, %v180_v11, %v181_v13  ;;  %v2107_v22 = vsel %vm192_vm3, %v190_v7, %v191_v12  ;;  %v827_v60 = vunpack.i.h.s16 %v455_v47  ;;  %vm277_vm2 = vcmask 891904  }
  0x8b   : > { %v205_v18 = vpop.permute.xlu1 %204  ;;  %295 = vrot.lane.b32.xlu0 %v188_v14, %s2025_s16  ;;  %293 = vrot.lane.b32.xlu1 %v2100_v15, %s2025_s16  ;;  %v250_v19 = vpop.permute.xlu0 %249  ;;  %v1900_v48 = vpack.i.b16 %v440_v37, %v821_v38  ;;  %v447_v49 = vrot.slane %v2100_v15, %v2112_v24  ;;  %v1055_v7 = vcombine.low %v2124_v31, %v1899_v51  ;;  %vm232_vm3 = vcmask 826368  }
  0x8c   : > { %v206_v20 = vrot.slane %v205_v18, 2  ;;  %v251_v21 = vrot.slane %v250_v19, 2  ;;  %v1902_v11 = vpack.i.b16 %v456_v59, %v827_v60 }
  0x8d   : > { %v448_v61 = vcombine.high %v447_v49, %v447_v49  ;;  %v1056_v62 = vcombine.low %v1900_v48, %v447_v49 }
  0x8e   : > { %v2109_v23 = vsel %vm252_vm4, %v250_v19, %v251_v21  ;;  %v2118_v29 = vsel %vm207_vm5, %v205_v18, %v206_v20  ;;  %vm237_vm4 = vcmask 818176   ;;  %vm282_vm5 = vcmask 719872  }
  0x8f   : > { %v215_v25 = vpop.permute.xlu1 %214  ;;  %297 = vrot.lane.b32.xlu1 %v2107_v22, %s2025_s16  ;;  %299 = vrot.lane.b32.xlu0 %v2109_v23, %s2025_s16  ;;  %v210_v26 = vpop.permute.xlu0 %209  ;;  %v2163_v8 = vrot.slane %v2118_v29, %v2112_v24  ;;  %v1901_v12 = vpack.i.b16 %v455_v47, %v448_v61  ;;  %v1072_v14 = vrot.slane %v1056_v62, %v2112_v24 }
  0x90   : > { %v216_v27 = vrot.slane %v215_v25, 2  ;;  %v211_v28 = vrot.slane %v210_v26, 2 }
  0x91   : > { %v839_v30 = vunpack.i.h.s16 %v2163_v8 }
  0x92   : > { %v2128_v35 = vsel %vm217_vm6, %v215_v25, %v216_v27  ;;  %v2130_v36 = vsel %vm212_vm7, %v210_v26, %v211_v28  ;;  %v1065_v26 = vrot.slane %v1055_v7, %v2112_v24  ;;  %v2182_v27 = vrot.slane %v2107_v22, %v2112_v24 }
  0x93   : > { %v220_v32 = vpop.permute.xlu1 %219  ;;  %303 = vrot.lane.b32.xlu0 %v2118_v29, %s2025_s16  ;;  %v255_v33 = vpop.permute.xlu0 %254  ;;  %v503_v42 = vrot.slane %v2128_v35, %v2112_v24  ;;  %v2144_v44 = vrot.slane %v2130_v36, %v2112_v24  ;;  %v488_v28 = vcombine.high %v2163_v8, %v2163_v8  ;;  %vm287_vm6 = vcmask 711680  }
  0x94   : > { %v256_v34 = vrot.slane %v255_v33, 2  ;;  %v221_v45 = vrot.slane %v220_v32, 2  ;;  %v1087_v37 = vcombine.low %v1065_v26, %v1072_v14  ;;  %vm1709_vm7 = vcmask 154624  }
  0x95   : > { %v504_v52 = vcombine.high %v503_v42, %v503_v42  ;;  %v845_v53 = vunpack.i.h.s16 %v503_v42  ;;  %v496_v55 = vcombine.high %v2144_v44, %v2144_v44  ;;  %v2210_v47 = vpack.i.b16 %v488_v28, %v839_v30 }
  0x96   : > { %v2132_v39 = vsel %vm257_vm8, %v255_v33, %v256_v34  ;;  %v223_v58 = vsel %vm222_vm10, %v220_v32, %v221_v45  ;;  %v1057_v32 = vcombine.low %v1901_v12, %v1902_v11  ;;  %v1088_v33 = vcombine.high %v1065_v26, %v1072_v14 }
  0x97   : > { %v240_v41 = vpop.permute.xlu1 %239  ;;  %307 = vrot.lane.b32.xlu0 %v2128_v35, %s2025_s16  ;;  %301 = vrot.lane.b32.xlu1 %v2132_v39, %s2025_s16  ;;  %v225_v43 = vpop.permute.xlu0 %224  ;;  %v1907_v63 = vpack.i.b16 %v503_v42, %v496_v55  ;;  %v2157_v3 = vrot.slane %v223_v58, %v2112_v24  ;;  %v1908_v4 = vpack.i.b16 %v504_v52, %v845_v53  ;;  %vm337_vm8 = vcmask 670720  }
  0x98   : > { %v226_v46 = vrot.slane %v225_v43, 2  ;;  %v241_v13 = vrot.slane %v240_v41, 2  ;;  %v2215_v49 = vrot.slane %v1057_v32, %v2112_v24  ;;  %vm423_vm10 = vcmask 965632  }
  0x99   : > { %v1124_v19 = vcombine.low %v2144_v44, %v1907_v63  ;;  %v1125_v20 = vcombine.low %v1908_v4, %v2157_v3  ;;  %v512_v52 = vcombine.high %v2157_v3, %v2157_v3 }
  0x9a   : > { %v228_v50 = vsel %vm227_vm9, %v225_v43, %v226_v46  ;;  %v2187_v31 = vsel %vm242_vm13, %v240_v41, %v241_v13  ;;  %v464_v43 = vcombine.high %v2182_v27, %v2182_v27  ;;  %vm402_vm9 = vcmask 293888  }
  0x9b   : > { %v260_v54 = vpop.permute.xlu1 %259  ;;  %305 = vrot.lane.b32.xlu1 %v2130_v36, %s2025_s16  ;;  %311 = vrot.lane.b32.xlu0 %v228_v50, %s2025_s16  ;;  %v245_v56 = vpop.permute.xlu0 %244  ;;  %v2192_v38 = vrot.slane %v1124_v19, %v2112_v24  ;;  %v519_v22 = vrot.slane %v228_v50, %v2112_v24  ;;  %v2196_v40 = vrot.slane %v1125_v20, %v2112_v24  ;;  %vm1830_vm13 = vcmask 1043458  }
  0x9c   : > { %v261_v57 = vrot.slane %v260_v54, 2  ;;  %v246_v16 = vrot.slane %v245_v56, 2  ;;  %v2208_v46 = vrot.slane %v2187_v31, %v2112_v24  ;;  %v2218_v50 = vrot.slane %v1088_v33, %v2112_v24 }
  0x9d   : > { %v520_v55 = vcombine.high %v519_v22, %v519_v22  ;;  %v1157_v60 = vcombine.high %v2192_v38, %v2196_v40  ;;  %v1909_v20 = vpack.i.b16 %v519_v22, %v512_v52  ;;  %v1156_v28 = vcombine.low %v2192_v38, %v2196_v40 }
  0x9e   : > { %v2165_v10 = vsel %vm262_vm11, %v260_v54, %v261_v57  ;;  %v2189_v34 = vsel %vm247_vm14, %v245_v56, %v246_v16  ;;  %v2225_v54 = vrot.slane %v1087_v37, %v2112_v24  ;;  %v851_v56 = vunpack.i.h.s16 %v519_v22 }
  0x9f   : > { %v2154_v2 = vpop.permute.xlu1 %269  ;;  %309 = vrot.lane.b32.xlu1 %v223_v58, %s2025_s16  ;;  %v265_v5 = vpop.permute.xlu0 %264  ;;  %v551_v48 = vrot.slane %v2189_v34, %v2112_v24  ;;  %v544_v61 = vcombine.high %v2208_v46, %v2208_v46  ;;  %vm1713_vm11 = vcmask 1040384  }
  0xa0   : > { %v266_v9 = vrot.slane %v265_v5, 2  ;;  %v271_v51 = vrot.slane %v2154_v2, 2  ;;  %v1910_v30 = vpack.i.b16 %v520_v55, %v851_v56 }
  0xa2   : > { %v2169_v18 = vsel %vm267_vm12, %v265_v5, %v266_v9  ;;  %v552_v9 = vcombine.high %v551_v48, %v551_v48  ;;  %v273_v12 = vsel %vm272_vm0, %v2154_v2, %v271_v51  ;;  %v1189_v56 = vcombine.low %v1909_v20, %v1910_v30 }
  0xa3   : > { %v2173_v21 = vpop.permute.xlu1 %279  ;;  %313 = vrot.lane.b32.xlu1 %v2165_v10, %s2025_s16  ;;  %315 = vrot.lane.b32.xlu0 %v2169_v18, %s2025_s16  ;;  %v275_v25 = vpop.permute.xlu0 %274  ;;  %vm1714_vm12 = vcmask 1041408  }
  0xa4   : > { %v276_v44 = vrot.slane %v275_v25, 2  ;;  %vm1831_vm14 = vmor %vm1830_vm13, %vm1714_vm12 }
  0xa6   : > { %v278_v3 = vsel %vm277_vm2, %v275_v25, %v276_v44  ;;  %v1185_v44 = vrot.slane %v1157_v60, %v2112_v24 }
  0xa7   : > { %v195_v42 = vpop.permute.xlu1 %194  ;;  %317 = vrot.lane.b32.xlu1 %v2187_v31, %s2025_s16  ;;  %319 = vrot.lane.b32.xlu0 %v2189_v34, %s2025_s16  ;;  %v2202_v41 = vpop.permute.xlu0 %284 }
  0xa8   : > { %v196_v45 = vrot.slane %v195_v42, 2 }
  0xaa   : > { %v198_v53 = vsel %vm197_vm15, %v195_v42, %v196_v45  ;;  %v1913_v45 = vpack.i.b16 %v551_v48, %v544_v61  ;;  %vm1832_vm15 = vcmask 783364  }
  0xab   : > { %v471_v57 = vrot.slane %v198_v53, %v2112_v24  ;;  %358 = vrot.lane.b32.xlu1 %v2100_v15, %s2026_s17  ;;  %356 = vrot.lane.b32.xlu0 %v2096_v6, %s2026_s17  ;;  %v200_v58 = vpop.permute.xlu0 %199  ;;  %v230_v59 = vpop.permute.xlu1 %229  ;;  %v863_v15 = vunpack.i.h.s16 %v551_v48  ;;  %vm1833_vm0 = vmor %vm1832_vm15, %vm1831_vm14 }
  0xac   : > { %v201_v62 = vrot.slane %v200_v58, 2  ;;  %v231_v63 = vrot.slane %v230_v59, 2 }
  0xad   : > { %v472_v4 = vcombine.high %v471_v57, %v471_v57  ;;  %v833_v5 = vunpack.i.h.s16 %v471_v57  ;;  %v1903_v7 = vpack.i.b16 %v471_v57, %v464_v43  ;;  %v1914_v37 = vpack.i.b16 %v552_v9, %v863_v15 }
  0xae   : > { %v203_v11 = vsel %vm202_vm1, %v200_v58, %v201_v62  ;;  %v233_v6 = vsel %vm232_vm3, %v230_v59, %v231_v63 }
  0xaf   : > { %v1904_v13 = vpack.i.b16 %v472_v4, %v833_v5  ;;  %v479_v14 = vrot.slane %v203_v11, %v2112_v24  ;;  %v527_v16 = vrot.slane %v233_v6, %v2112_v24  ;;  %360 = vrot.lane.b32.xlu0 %v273_v12, %s2026_s17  ;;  %362 = vrot.lane.b32.xlu1 %v278_v3, %s2026_s17  ;;  %v235_v19 = vpop.permute.xlu0 %234  ;;  %v286_v5 = vrot.slane %v2202_v41, 2 }
  0xb0   : > { %v236_v25 = vrot.slane %v235_v19, 2  ;;  %v1058_v26 = vcombine.low %v2182_v27, %v1903_v7  ;;  %v281_v27 = vrot.slane %v2173_v21, 2  ;;  %v1192_v57 = vcombine.low %v1913_v45, %v1914_v37 }
  0xb1   : > { %v480_v2 = vcombine.high %v479_v14, %v479_v14  ;;  %v1122_v32 = vcombine.low %v1904_v13, %v479_v14  ;;  %v528_v33 = vcombine.high %v527_v16, %v527_v16  ;;  %v288_v14 = vsel %vm287_vm6, %v2202_v41, %v286_v5 }
  0xb2   : > { %v238_v42 = vsel %vm237_vm4, %v235_v19, %v236_v25  ;;  %v1086_v43 = vrot.slane %v1058_v26, %v2112_v24  ;;  %v283_v62 = vsel %vm282_vm5, %v2173_v21, %v281_v27  ;;  %v1220_v7 = vrot.slane %v1192_v57, %v2112_v24 }
  0xb3   : > { %v1905_v51 = vpack.i.b16 %v2163_v8, %v480_v2  ;;  %v535_v22 = vrot.slane %v238_v42, %v2112_v24  ;;  %364 = vrot.lane.b32.xlu0 %v2109_v23, %s2026_s17  ;;  %366 = vrot.lane.b32.xlu1 %v2132_v39, %s2026_s17  ;;  %v1132_v38 = vrot.slane %v1122_v32, %v2112_v24 }
  0xb4   : > { %v1090_v40 = vcombine.high %v2215_v49, %v1086_v43  ;;  %v1089_v52 = vcombine.low %v2215_v49, %v1086_v43 }
  0xb5   : > { %v1123_v48 = vcombine.low %v1905_v51, %v2210_v47  ;;  %v536_v8 = vcombine.high %v535_v22, %v535_v22  ;;  %v857_v53 = vunpack.i.h.s16 %v535_v22  ;;  %v1911_v55 = vpack.i.b16 %v535_v22, %v528_v33 }
  0xb6   : > { %v1118_v23 = vrot.slane %v1090_v40, %v2112_v24  ;;  %v1111_v39 = vrot.slane %v1089_v52, %v2112_v24 }
  0xb7   : > { %v1912_v58 = vpack.i.b16 %v536_v8, %v857_v53  ;;  %v1190_v59 = vcombine.low %v527_v16, %v1911_v55  ;;  %368 = vrot.lane.b32.xlu0 %v2118_v29, %s2026_s17  ;;  %370 = vrot.lane.b32.xlu1 %v2130_v36, %s2026_s17  ;;  %v1139_v49 = vrot.slane %v1123_v48, %v2112_v24 }
  0xb8   : > { %v1121_v47 = vcombine.low %v2218_v50, %v1118_v23  ;;  %v1120_v60 = vcombine.high %v2225_v54, %v1111_v39  ;;  %v1119_v61 = vcombine.low %v2225_v54, %v1111_v39  ;;  %v1178_v36 = vrot.slane %v1156_v28, %v2112_v24 }
  0xb9   : > { %v1191_v63 = vcombine.low %v1912_v58, %v2208_v46  ;;  %v1155_v3 = vcombine.high %v1132_v38, %v1139_v49  ;;  %v1154_v4 = vcombine.low %v1132_v38, %v1139_v49  ;;  %v1206_v29 = vrot.slane %v1190_v59, %v2112_v24 }
  0xba   : > { %1726 = vmatprep.subr.bf16.mxu0 %v1121_v47  ;;  %1768 = vmatpush1.bf16.msra.mxu1 %v1120_v60  ;;  %v1199_v50 = vrot.slane %v1189_v56, %v2112_v24 }
  0xbb   : > { %1727 = vmatpush1.bf16.msra.mxu0 %v1119_v61  ;;  %372 = vrot.lane.b32.xlu0 %v2128_v35, %s2026_s17  ;;  %v1171_v21 = vrot.slane %v1155_v3, %v2112_v24  ;;  %v1164_v46 = vrot.slane %v1154_v4, %v2112_v24  ;;  %v1213_v54 = vrot.slane %v1191_v63, %v2112_v24 }
  0xbc   : > { %374 = vrot.lane.b32.xlu1 %v283_v62, %s2026_s17  ;;  %1769 = vmatprep.subr.bf16.mxu1 %v2021_v1  ;;  %v1222_v9 = vcombine.high %v1199_v50, %v1206_v29  ;;  %v1221_v15 = vcombine.low %v1199_v50, %v1206_v29 }
  0xbd   : > { %v1188_v11 = vcombine.low %v1171_v21, %v1185_v44  ;;  %v1187_v6 = vcombine.high %v1164_v46, %v1178_v36  ;;  %v1186_v12 = vcombine.low %v1164_v46, %v1178_v36  ;;  %v1224_v13 = vcombine.high %v1213_v54, %v1220_v7 }
  0xbe   : > { %v1223_v35 = vcombine.low %v1213_v54, %v1220_v7  ;;  %v1238_v16 = vrot.slane %v1222_v9, %v2112_v24  ;;  %v1231_v20 = vrot.slane %v1221_v15, %v2112_v24 }
  0xbf   : > { %376 = vrot.lane.b32.xlu0 %v288_v14, %s2026_s17  ;;  %1728 = vmatprep.subr.bf16.mxu0 %v1188_v11  ;;  %v1252_v19 = vrot.slane %v1224_v13, %v2112_v24 }
  0xc0   : > { %378 = vrot.lane.b32.xlu1 %v2165_v10, %s2026_s17  ;;  %1770 = vmatpush1.bf16.msra.mxu1 %v1187_v6  ;;  %v1245_v25 = vrot.slane %v1223_v35, %v2112_v24  ;;  %v2306_v10 = vld.sshfl [vmem:[%s2516_s1] sm:$0x33 pattern:$0x76325410] }
  0xc1   : > { %1729 = vmatpush1.bf16.msra.mxu0 %v1186_v12  ;;  %1771 = vmatprep.subr.bf16.mxu1 %v2021_v1  ;;  %v1255_v41 = vcombine.low %v1238_v16, %v1252_v19 }
  0xc2   : > { %v1254_v26 = vcombine.high %v1231_v20, %v1245_v25  ;;  %v1253_v28 = vcombine.low %v1231_v20, %v1245_v25 }
  0xc3   : > { %380 = vrot.lane.b32.xlu0 %v2169_v18, %s2026_s17  ;;  %1730 = vmatprep.subr.bf16.mxu0 %v1255_v41  ;;  %v979_v18 = vcombine.high %v2306_v10, %v2306_v10 }
  0xc4   : > { %382 = vrot.lane.b32.xlu1 %v2187_v31, %s2026_s17  ;;  %1772 = vmatpush1.bf16.msra.mxu1 %v1254_v26  ;;  %v965_v31 = vld [vmem:[%s2517_s2] sm:$0xf] }
  0xc5   : > { %1731 = vmatpush1.bf16.msra.mxu0 %v1253_v28  ;;  %1773 = vmatprep.subr.bf16.mxu1 %v2021_v1 }
  0xc6   : > { %1948 = vmatprep.mubr.msk.bf16.mxu1 %vm1709_vm7, %v979_v18  ;;  %1947 = vmatprep.mubr.msk.bf16.mxu0 %vm1709_vm7, %v979_v18 }
  0xc7   : > { %384 = vrot.lane.b32.xlu0 %v2189_v34, %s2026_s17  ;;  %v290_v34 = vpop.permute.xlu1 %289 }
  0xc8   : > { %419 = vrot.lane.b32.xlu1 %v2065_v0, %s2028_s18  ;;  %v321_v30 = vrot.slane %v290_v34, 2 }
  0xca   : > { %v338_v0 = vsel %vm337_vm8, %v290_v34, %v321_v30 }
  0xcb   : > { %968 = vperm.xlu0 %1992, %v965_v31   ;;  %v355_v2 = vpop.permute.xlu1 %354  ;;  %v559_v32 = vrot.slane %v338_v0, %v2112_v24 }
  0xcc   : > { %v386_v46 = vrot.slane %v355_v2, 2 }
  0xcd   : > { %v560_v42 = vcombine.high %v559_v32, %v559_v32 }
  0xce   : > { %v403_v18 = vsel %vm402_vm9, %v355_v2, %v386_v46 }
  0xf9   : > { %v292_v33 = vpop.permute.xlu0 %291 }
  0xfa   : > { %v322_v37 = vrot.slane %v292_v33, 2 }
  0xfc   : > { %v339_v43 = vsel %vm337_vm8, %v292_v33, %v322_v37 }
  0xfd   : > { %v567_v44 = vrot.slane %v339_v43, %v2112_v24  ;;  %v294_v45 = vpop.permute.xlu1 %293  ;;  %v296_v51 = vpop.permute.xlu0 %295 }
  0xfe   : > { %v323_v22 = vrot.slane %v294_v45, 2  ;;  %v324_v27 = vrot.slane %v296_v51, 2 }
  0xff   : > { %v568_v38 = vcombine.high %v567_v44, %v567_v44  ;;  %v869_v40 = vunpack.i.h.s16 %v567_v44  ;;  %v1915_v52 = vpack.i.b16 %v567_v44, %v560_v42 }
 0x100   : > { %v340_v48 = vsel %vm337_vm8, %v294_v45, %v323_v22  ;;  %v341_v8 = vsel %vm337_vm8, %v296_v51, %v324_v27 }
 0x101   : > { %v575_v53 = vrot.slane %v340_v48, %v2112_v24  ;;  %v1916_v55 = vpack.i.b16 %v568_v38, %v869_v40  ;;  %v583_v56 = vrot.slane %v341_v8, %v2112_v24  ;;  %v298_v57 = vpop.permute.xlu1 %297  ;;  %v300_v23 = vpop.permute.xlu0 %299  ;;  %v1256_v61 = vcombine.low %v559_v32, %v1915_v52 }
 0x102   : > { %v325_v39 = vrot.slane %v298_v57, 2  ;;  %v326_v58 = vrot.slane %v300_v23, 2 }
 0x103   : > { %v576_v59 = vcombine.high %v575_v53, %v575_v53  ;;  %v1257_v49 = vcombine.low %v1916_v55, %v575_v53  ;;  %v584_v47 = vcombine.high %v583_v56, %v583_v56  ;;  %v875_v60 = vunpack.i.h.s16 %v583_v56 }
 0x104   : > { %v342_v62 = vsel %vm337_vm8, %v298_v57, %v325_v39  ;;  %v343_v63 = vsel %vm337_vm8, %v300_v23, %v326_v58  ;;  %v1266_v9 = vrot.slane %v1256_v61, %v2112_v24 }
 0x105   : > { %v1273_v3 = vrot.slane %v1257_v49, %v2112_v24  ;;  %v591_v4 = vrot.slane %v342_v62, %v2112_v24  ;;  %v304_v29 = vpop.permute.xlu0 %303  ;;  %v1917_v5 = vpack.i.b16 %v583_v56, %v576_v59  ;;  %v1918_v36 = vpack.i.b16 %v584_v47, %v875_v60 }
 0x106   : > { %v599_v50 = vrot.slane %v343_v63, %v2112_v24  ;;  %v328_v7 = vrot.slane %v304_v29, 2  ;;  %v2345_v47 = vrot.slane %v403_v18, %v2112_v24 }
 0x107   : > { %v592_v21 = vcombine.high %v591_v4, %v591_v4  ;;  %v1258_v35 = vcombine.low %v1917_v5, %v1918_v36  ;;  %v1289_v20 = vcombine.high %v1266_v9, %v1273_v3  ;;  %v1288_v28 = vcombine.low %v1266_v9, %v1273_v3 }
 0x108   : > { %v345_v54 = vsel %vm337_vm8, %v304_v29, %v328_v7  ;;  %v600_v15 = vcombine.high %v599_v50, %v599_v50  ;;  %v881_v11 = vunpack.i.h.s16 %v599_v50 }
 0x109   : > { %v1919_v6 = vpack.i.b16 %v599_v50, %v592_v21  ;;  %v615_v12 = vrot.slane %v345_v54, %v2112_v24  ;;  %v302_v13 = vpop.permute.xlu1 %301  ;;  %v308_v14 = vpop.permute.xlu0 %307  ;;  %v1280_v45 = vrot.slane %v1258_v35, %v2112_v24  ;;  %v1305_v51 = vrot.slane %v1289_v20, %v2112_v24 }
 0x10a   : > { %v327_v16 = vrot.slane %v302_v13, 2  ;;  %v330_v19 = vrot.slane %v308_v14, 2  ;;  %v1920_v0 = vpack.i.b16 %v600_v15, %v881_v11  ;;  %v1298_v38 = vrot.slane %v1288_v28, %v2112_v24 }
 0x10b   : > { %v1259_v25 = vcombine.low %v591_v4, %v1919_v6  ;;  %v616_v41 = vcombine.high %v615_v12, %v615_v12  ;;  %v887_v26 = vunpack.i.h.s16 %v615_v12 }
 0x10c   : > { %v344_v31 = vsel %vm337_vm8, %v302_v13, %v327_v16  ;;  %v347_v34 = vsel %vm337_vm8, %v308_v14, %v330_v19  ;;  %v688_v14 = vcombine.high %v2345_v47, %v2345_v47 }
 0x10d   : > { %v607_v30 = vrot.slane %v344_v31, %v2112_v24  ;;  %v631_v32 = vrot.slane %v347_v34, %v2112_v24  ;;  %v306_v33 = vpop.permute.xlu1 %305  ;;  %v312_v37 = vpop.permute.xlu0 %311  ;;  %v1287_v42 = vrot.slane %v1259_v25, %v2112_v24  ;;  %v1922_v2 = vpack.i.b16 %v616_v41, %v887_v26 }
 0x10e   : > { %v329_v43 = vrot.slane %v306_v33, 2  ;;  %v332_v44 = vrot.slane %v312_v37, 2 }
 0x10f   : > { %v608_v22 = vcombine.high %v607_v30, %v607_v30  ;;  %v1323_v27 = vcombine.low %v1920_v0, %v607_v30  ;;  %v1291_v48 = vcombine.high %v1280_v45, %v1287_v42  ;;  %v1290_v8 = vcombine.low %v1280_v45, %v1287_v42 }
 0x110   : > { %v346_v40 = vsel %vm337_vm8, %v306_v33, %v329_v43  ;;  %v349_v52 = vsel %vm337_vm8, %v312_v37, %v332_v44  ;;  %v632_v55 = vcombine.high %v631_v32, %v631_v32  ;;  %v893_v56 = vunpack.i.h.s16 %v631_v32 }
 0x111   : > { %v1921_v53 = vpack.i.b16 %v615_v12, %v608_v22  ;;  %v623_v57 = vrot.slane %v346_v40, %v2112_v24  ;;  %v310_v23 = vpop.permute.xlu1 %309  ;;  %v647_v39 = vrot.slane %v349_v52, %v2112_v24  ;;  %v1319_v59 = vrot.slane %v1291_v48, %v2112_v24 }
 0x112   : > { %v331_v58 = vrot.slane %v310_v23, 2  ;;  %v1312_v49 = vrot.slane %v1290_v8, %v2112_v24  ;;  %v2348_v61 = vrot.slane %v1323_v27, %v2112_v24  ;;  %v1924_v50 = vpack.i.b16 %v632_v55, %v893_v56 }
 0x113   : > { %v1324_v60 = vcombine.low %v1921_v53, %v1922_v2  ;;  %v624_v62 = vcombine.high %v623_v57, %v623_v57  ;;  %v1322_v3 = vcombine.low %v1305_v51, %v1319_v59  ;;  %v648_v54 = vcombine.high %v647_v39, %v647_v39 }
 0x114   : > { %v348_v63 = vsel %vm337_vm8, %v310_v23, %v331_v58  ;;  %v1321_v4 = vcombine.high %v1298_v38, %v1312_v49  ;;  %v1320_v29 = vcombine.low %v1298_v38, %v1312_v49  ;;  %v899_v9 = vunpack.i.h.s16 %v647_v39 }
 0x115   : > { %v1923_v5 = vpack.i.b16 %v631_v32, %v624_v62  ;;  %v639_v36 = vrot.slane %v348_v63, %v2112_v24  ;;  %v314_v7 = vpop.permute.xlu1 %313  ;;  %v316_v21 = vpop.permute.xlu0 %315  ;;  %v1340_v46 = vrot.slane %v1324_v60, %v2112_v24  ;;  %1732 = vmatprep.subr.bf16.mxu0 %v1322_v3 }
 0x116   : > { %v333_v15 = vrot.slane %v314_v7, 2  ;;  %v334_v11 = vrot.slane %v316_v21, 2  ;;  %1774 = vmatpush1.bf16.msra.mxu1 %v1321_v4  ;;  %1733 = vmatpush1.bf16.msra.mxu0 %v1320_v29  ;;  %v2364_v18 = vpack.i.b16 %v648_v54, %v899_v9 }
 0x117   : > { %v1325_v6 = vcombine.low %v623_v57, %v1923_v5  ;;  %v640_v12 = vcombine.high %v639_v36, %v639_v36  ;;  %v1326_v13 = vcombine.low %v1924_v50, %v639_v36  ;;  %1775 = vmatprep.subr.bf16.mxu1 %v2021_v1  ;;  %v1356_v28 = vcombine.high %v2348_v61, %v1340_v46 }
 0x118   : > { %v350_v35 = vsel %vm337_vm8, %v314_v7, %v333_v15  ;;  %v351_v16 = vsel %vm337_vm8, %v316_v21, %v334_v11  ;;  %v1355_v37 = vcombine.low %v2348_v61, %v1340_v46 }
 0x119   : > { %v1347_v19 = vrot.slane %v1325_v6, %v2112_v24  ;;  %v1354_v20 = vrot.slane %v1326_v13, %v2112_v24  ;;  %v2361_v25 = vrot.slane %v350_v35, %v2112_v24  ;;  %v318_v41 = vpop.permute.xlu1 %317  ;;  %v320_v26 = vpop.permute.xlu0 %319  ;;  %v663_v31 = vrot.slane %v351_v16, %v2112_v24 }
 0x11a   : > { %v335_v34 = vrot.slane %v318_v41, 2  ;;  %v336_v30 = vrot.slane %v320_v26, 2  ;;  %v2367_v0 = vpack.i.b16 %v647_v39, %v640_v12  ;;  %v1372_v38 = vrot.slane %v1356_v28, %v2112_v24 }
 0x11b   : > { %v656_v32 = vcombine.high %v2361_v25, %v2361_v25  ;;  %v1358_v33 = vcombine.high %v1347_v19, %v1354_v20  ;;  %v664_v42 = vcombine.high %v663_v31, %v663_v31  ;;  %v905_v43 = vunpack.i.h.s16 %v663_v31 }
 0x11c   : > { %v352_v44 = vsel %vm337_vm8, %v318_v41, %v335_v34  ;;  %v353_v45 = vsel %vm337_vm8, %v320_v26, %v336_v30  ;;  %v1357_v53 = vcombine.low %v1347_v19, %v1354_v20  ;;  %v1390_v39 = vcombine.low %v2367_v0, %v2364_v18 }
 0x11d   : > { %v671_v51 = vrot.slane %v352_v44, %v2112_v24  ;;  %v679_v2 = vrot.slane %v353_v45, %v2112_v24  ;;  %v359_v22 = vpop.permute.xlu1 %358  ;;  %v357_v27 = vpop.permute.xlu0 %356  ;;  %v1386_v40 = vrot.slane %v1358_v33, %v2112_v24  ;;  %v1927_v52 = vpack.i.b16 %v663_v31, %v656_v32 }
 0x11e   : > { %v388_v48 = vrot.slane %v359_v22, 2  ;;  %v387_v8 = vrot.slane %v357_v27, 2  ;;  %v1928_v56 = vpack.i.b16 %v664_v42, %v905_v43  ;;  %v1365_v4 = vrot.slane %v1355_v37, %v2112_v24 }
 0x11f   : > { %v672_v55 = vcombine.high %v671_v51, %v671_v51  ;;  %v680_v57 = vcombine.high %v679_v2, %v679_v2  ;;  %v911_v23 = vunpack.i.h.s16 %v679_v2  ;;  %v1389_v49 = vcombine.low %v1372_v38, %v1386_v40 }
 0x120   : > { %v405_v58 = vsel %vm402_vm9, %v359_v22, %v388_v48  ;;  %v404_v59 = vsel %vm402_vm9, %v357_v27, %v387_v8  ;;  %v1391_v29 = vcombine.low %v2361_v25, %v1927_v52  ;;  %v1379_v50 = vrot.slane %v1357_v53, %v2112_v24 }
 0x121   : > { %v1929_v60 = vpack.i.b16 %v679_v2, %v672_v55  ;;  %v1930_v61 = vpack.i.b16 %v680_v57, %v911_v23  ;;  %v695_v62 = vrot.slane %v404_v59, %v2112_v24  ;;  %v363_v63 = vpop.permute.xlu1 %362  ;;  %v361_v3 = vpop.permute.xlu0 %360  ;;  %1734 = vmatprep.subr.bf16.mxu0 %v1389_v49  ;;  %v1392_v7 = vcombine.low %v1928_v56, %v671_v51 }
 0x122   : > { %v390_v5 = vrot.slane %v363_v63, 2  ;;  %v389_v36 = vrot.slane %v361_v3, 2  ;;  %v2387_v21 = vrot.slane %v405_v58, %v2112_v24  ;;  %v1388_v6 = vcombine.high %v1365_v4, %v1379_v50 }
 0x123   : > { %v696_v46 = vcombine.high %v695_v62, %v695_v62  ;;  %v917_v54 = vunpack.i.h.s16 %v695_v62  ;;  %v2389_v9 = vpack.i.b16 %v695_v62, %v688_v14  ;;  %v1393_v12 = vcombine.low %v1929_v60, %v1930_v61 }
 0x124   : > { %v407_v15 = vsel %vm402_vm9, %v363_v63, %v390_v5  ;;  %v406_v11 = vsel %vm402_vm9, %v361_v3, %v389_v36  ;;  %v1387_v16 = vcombine.low %v1365_v4, %v1379_v50  ;;  %1776 = vmatpush1.bf16.msra.mxu1 %v1388_v6  ;;  %v1414_v26 = vrot.slane %v1392_v7, %v2112_v24 }
 0x125   : > { %v2393_v13 = vpack.i.b16 %v696_v46, %v917_v54  ;;  %v711_v35 = vrot.slane %v406_v11, %v2112_v24  ;;  %v367_v19 = vpop.permute.xlu1 %366  ;;  %v365_v20 = vpop.permute.xlu0 %364  ;;  %v2397_v25 = vrot.slane %v407_v15, %v2112_v24  ;;  %v704_v28 = vcombine.high %v2387_v21, %v2387_v21  ;;  %1777 = vmatprep.subr.bf16.mxu1 %v2021_v1 }
 0x126   : > { %v392_v41 = vrot.slane %v367_v19, 2  ;;  %v391_v14 = vrot.slane %v365_v20, 2  ;;  %1735 = vmatpush1.bf16.msra.mxu0 %v1387_v16  ;;  %v1457_v34 = vcombine.low %v2345_v47, %v2389_v9  ;;  %v1400_v0 = vrot.slane %v1390_v39, %v2112_v24 }
 0x127   : > { %v712_v18 = vcombine.high %v711_v35, %v711_v35  ;;  %v923_v31 = vunpack.i.h.s16 %v711_v35  ;;  %v1407_v32 = vrot.slane %v1391_v29, %v2112_v24  ;;  %v1458_v33 = vcombine.low %v2393_v13, %v2387_v21 }
 0x128   : > { %v408_v30 = vsel %vm402_vm9, %v365_v20, %v391_v14  ;;  %v409_v37 = vsel %vm402_vm9, %v367_v19, %v392_v41  ;;  %v1421_v45 = vrot.slane %v1393_v12, %v2112_v24  ;;  %v720_v47 = vcombine.high %v2397_v25, %v2397_v25 }
 0x129   : > { %v727_v42 = vrot.slane %v408_v30, %v2112_v24  ;;  %v371_v43 = vpop.permute.xlu1 %370  ;;  %v369_v44 = vpop.permute.xlu0 %368  ;;  %v1423_v22 = vcombine.high %v1400_v0, %v1407_v32  ;;  %v2415_v27 = vpack.i.b16 %v711_v35, %v704_v28  ;;  %v2417_v38 = vpack.i.b16 %v712_v18, %v923_v31 }
 0x12a   : > { %v394_v51 = vrot.slane %v371_v43, 2  ;;  %v393_v2 = vrot.slane %v369_v44, 2  ;;  %v2420_v48 = vrot.slane %v409_v37, %v2112_v24  ;;  %v1425_v55 = vcombine.high %v1414_v26, %v1421_v45 }
 0x12b   : > { %v728_v40 = vcombine.high %v727_v42, %v727_v42  ;;  %v929_v52 = vunpack.i.h.s16 %v727_v42  ;;  %v1935_v56 = vpack.i.b16 %v727_v42, %v720_v47  ;;  %v1422_v58 = vcombine.low %v1400_v0, %v1407_v32 }
 0x12c   : > { %v411_v8 = vsel %vm402_vm9, %v371_v43, %v394_v51  ;;  %v410_v53 = vsel %vm402_vm9, %v369_v44, %v393_v2  ;;  %v1439_v60 = vrot.slane %v1423_v22, %v2112_v24  ;;  %v1453_v61 = vrot.slane %v1425_v55, %v2112_v24 }
 0x12d   : > { %v2424_v57 = vpack.i.b16 %v728_v40, %v929_v52  ;;  %v743_v23 = vrot.slane %v410_v53, %v2112_v24  ;;  %v373_v39 = vpop.permute.xlu0 %372  ;;  %v1424_v62 = vcombine.low %v1414_v26, %v1421_v45  ;;  %v1459_v63 = vcombine.low %v2415_v27, %v2417_v38 }
 0x12e   : > { %v375_v59 = vpop.permute.xlu1 %374  ;;  %v395_v49 = vrot.slane %v373_v39, 2  ;;  %v2432_v3 = vrot.slane %v411_v8, %v2112_v24  ;;  %v736_v5 = vcombine.high %v2420_v48, %v2420_v48  ;;  %v1456_v7 = vcombine.low %v1439_v60, %v1453_v61 }
 0x12f   : > { %v744_v4 = vcombine.high %v743_v23, %v743_v23  ;;  %v935_v29 = vunpack.i.h.s16 %v743_v23  ;;  %v396_v36 = vrot.slane %v375_v59, 2  ;;  %v1460_v21 = vcombine.low %v2397_v25, %v1935_v56 }
 0x130   : > { %v412_v50 = vsel %vm402_vm9, %v373_v39, %v395_v49  ;;  %v1446_v9 = vrot.slane %v1424_v62, %v2112_v24  ;;  %v1524_v11 = vcombine.low %v2424_v57, %v2420_v48  ;;  %1736 = vmatprep.subr.bf16.mxu0 %v1456_v7  ;;  %v1432_v12 = vrot.slane %v1422_v58, %v2112_v24 }
 0x131   : > { %v2438_v46 = vpack.i.b16 %v744_v4, %v935_v29  ;;  %v759_v54 = vrot.slane %v412_v50, %v2112_v24  ;;  %v377_v15 = vpop.permute.xlu0 %376  ;;  %v413_v6 = vsel %vm402_vm9, %v375_v59, %v396_v36  ;;  %v752_v16 = vcombine.high %v2432_v3, %v2432_v3 }
 0x132   : > { %v379_v13 = vpop.permute.xlu1 %378  ;;  %v397_v35 = vrot.slane %v377_v15, 2  ;;  %v1937_v19 = vpack.i.b16 %v743_v23, %v736_v5  ;;  %v2449_v41 = vrot.slane %v413_v6, %v2112_v24  ;;  %v1455_v14 = vcombine.high %v1432_v12, %v1446_v9 }
 0x133   : > { %v760_v20 = vcombine.high %v759_v54, %v759_v54  ;;  %v941_v25 = vunpack.i.h.s16 %v759_v54  ;;  %v1454_v26 = vcombine.low %v1432_v12, %v1446_v9  ;;  %v398_v28 = vrot.slane %v379_v13, 2 }
 0x134   : > { %v1525_v18 = vcombine.low %v1937_v19, %v2438_v46  ;;  %v414_v31 = vsel %vm402_vm9, %v377_v15, %v397_v35  ;;  %v1467_v0 = vrot.slane %v1457_v34, %v2112_v24  ;;  %v1474_v32 = vrot.slane %v1458_v33, %v2112_v24  ;;  %1778 = vmatpush1.bf16.msra.mxu1 %v1455_v14 }
 0x135   : > { %v381_v30 = vpop.permute.xlu0 %380  ;;  %v1939_v37 = vpack.i.b16 %v759_v54, %v752_v16  ;;  %1737 = vmatpush1.bf16.msra.mxu0 %v1454_v26  ;;  %v415_v42 = vsel %vm402_vm9, %v379_v13, %v398_v28  ;;  %v775_v43 = vrot.slane %v414_v31, %v2112_v24  ;;  %v1940_v47 = vpack.i.b16 %v760_v20, %v941_v25 }
 0x136   : > { %v383_v44 = vpop.permute.xlu1 %382  ;;  %v399_v45 = vrot.slane %v381_v30, 2  ;;  %v783_v51 = vrot.slane %v415_v42, %v2112_v24  ;;  %1779 = vmatprep.subr.bf16.mxu1 %v2021_v1  ;;  %v1488_v34 = vrot.slane %v1460_v21, %v2112_v24  ;;  %v768_v33 = vcombine.high %v2449_v41, %v2449_v41 }
 0x137   : > { %v400_v2 = vrot.slane %v383_v44, 2  ;;  %v776_v22 = vcombine.high %v775_v43, %v775_v43  ;;  %v1481_v38 = vrot.slane %v1459_v63, %v2112_v24  ;;  %v947_v52 = vunpack.i.h.s16 %v775_v43 }
 0x138   : > { %v416_v27 = vsel %vm402_vm9, %v381_v30, %v399_v45  ;;  %v784_v40 = vcombine.high %v783_v51, %v783_v51  ;;  %v1490_v53 = vcombine.high %v1467_v0, %v1474_v32  ;;  %v1526_v55 = vcombine.low %v2432_v3, %v1939_v37 }
 0x139   : > { %v791_v8 = vrot.slane %v416_v27, %v2112_v24  ;;  %v417_v56 = vsel %vm402_vm9, %v383_v44, %v400_v2  ;;  %v1492_v23 = vcombine.high %v1481_v38, %v1488_v34  ;;  %v1489_v39 = vcombine.low %v1467_v0, %v1474_v32  ;;  %v385_v62 = vpop.permute.xlu0 %384 }
 0x13a   : > { %v420_v58 = vpop.permute.xlu1 %419  ;;  %v1527_v59 = vcombine.low %v1940_v47, %v2449_v41  ;;  %v1941_v4 = vpack.i.b16 %v775_v43, %v768_v33  ;;  %v1506_v63 = vrot.slane %v1490_v53, %v2112_v24  ;;  %v1491_v5 = vcombine.low %v1481_v38, %v1488_v34 }
 0x13b   : > { %v792_v49 = vcombine.high %v791_v8, %v791_v8  ;;  %v953_v60 = vunpack.i.h.s16 %v791_v8  ;;  %v1943_v61 = vpack.i.b16 %v791_v8, %v784_v40  ;;  %v1520_v29 = vrot.slane %v1492_v23, %v2112_v24 }
 0x13c   : > { %v1942_v36 = vpack.i.b16 %v776_v22, %v947_v52  ;;  %v799_v3 = vrot.slane %v417_v56, %v2112_v24  ;;  %v1499_v50 = vrot.slane %v1489_v39, %v2112_v24  ;;  %v421_v7 = vrot.slane %v420_v58, 2 }
 0x13d   : > { %v1523_v21 = vcombine.low %v1506_v63, %v1520_v29  ;;  %v1513_v46 = vrot.slane %v1491_v5, %v2112_v24  ;;  %v422_v54 = vrot.slane %v420_v58, 4  ;;  %v401_v9 = vrot.slane %v385_v62, 2 }
 0x13e   : > { %v1944_v15 = vpack.i.b16 %v792_v49, %v953_v60  ;;  %v1592_v6 = vcombine.low %v783_v51, %v1943_v61  ;;  %v1534_v12 = vrot.slane %v1524_v11, %v2112_v24  ;;  %v1541_v13 = vrot.slane %v1525_v18, %v2112_v24 }
 0x13f   : > { %1738 = vmatprep.subr.bf16.mxu0 %v1523_v21  ;;  %v1522_v35 = vcombine.high %v1499_v50, %v1513_v46  ;;  %v1521_v16 = vcombine.low %v1499_v50, %v1513_v46  ;;  %v424_v19 = vsel %vm423_vm10, %v421_v7, %v422_v54  ;;  %v418_v20 = vsel %vm402_vm9, %v385_v62, %v401_v9 }
 0x140   : > { %v1591_v25 = vcombine.low %v1941_v4, %v1942_v36  ;;  %v815_v41 = vrot.slane %v424_v19, %v2112_v24  ;;  %v807_v14 = vrot.slane %v418_v20, %v2112_v24  ;;  %v1555_v26 = vrot.slane %v1527_v59, %v2112_v24 }
 0x141   : > { %1780 = vmatpush1.bf16.msra.mxu1 %v1522_v35  ;;  %1739 = vmatpush1.bf16.msra.mxu0 %v1521_v16  ;;  %v1548_v48 = vrot.slane %v1526_v55, %v2112_v24  ;;  %v1557_v57 = vcombine.high %v1534_v12, %v1541_v13  ;;  %v1556_v11 = vcombine.low %v1534_v12, %v1541_v13  ;;  %v2029_v60 = vmov 65535  }
 0x142   : > { %v800_v28 = vcombine.high %v799_v3, %v799_v3  ;;  %v816_v18 = vcombine.high %v815_v41, %v815_v41  ;;  %v808_v31 = vcombine.high %v807_v14, %v807_v14  ;;  %v959_v30 = vunpack.i.h.s16 %v807_v14  ;;  %1781 = vmatprep.subr.bf16.mxu1 %v2021_v1 }
 0x143   : > { %v1593_v0 = vcombine.low %v1944_v15, %v799_v3  ;;  %v1559_v32 = vcombine.high %v1548_v48, %v1555_v26  ;;  %v1558_v37 = vcombine.low %v1548_v48, %v1555_v26  ;;  %v1608_v42 = vrot.slane %v1592_v6, %v2112_v24 }
 0x144   : > { %v963_v43 = vunpack.i.l.s16 %v816_v18  ;;  %v1945_v44 = vpack.i.b16 %v807_v14, %v800_v28  ;;  %v1946_v45 = vpack.i.b16 %v808_v31, %v959_v30  ;;  %v1601_v47 = vrot.slane %v1591_v25, %v2112_v24 }
 0x145   : > { %v1573_v51 = vrot.slane %v1557_v57, %v2112_v24  ;;  %v1587_v2 = vrot.slane %v1559_v32, %v2112_v24  ;;  %v1566_v34 = vrot.slane %v1556_v11, %v2112_v24  ;;  %v1580_v33 = vrot.slane %v1558_v37, %v2112_v24 }
 0x146   : > { %v1658_v22 = vcombine.low %v815_v41, %v963_v43  ;;  %v1594_v27 = vcombine.low %v1945_v44, %v1946_v45  ;;  %v1624_v8 = vcombine.high %v1601_v47, %v1608_v42  ;;  %v1615_v53 = vrot.slane %v1593_v0, %v2112_v24 }
 0x147   : > { %v1590_v38 = vcombine.low %v1573_v51, %v1587_v2  ;;  %v1589_v40 = vcombine.high %v1566_v34, %v1580_v33  ;;  %v1588_v52 = vcombine.low %v1566_v34, %v1580_v33  ;;  %v1623_v56 = vcombine.low %v1601_v47, %v1608_v42 }
 0x148   : > { %v1622_v55 = vrot.slane %v1594_v27, %v2112_v24  ;;  %v1665_v23 = vrot.slane %v1658_v22, %v2112_v24  ;;  %v1640_v49 = vrot.slane %v1624_v8, %v2112_v24  ;;  %v1715_v61 = vsel %vm1713_vm11, 4294967295, %v2029_v60 }
 0x149   : > { %1740 = vmatprep.subr.bf16.mxu0 %v1590_v38  ;;  %1782 = vmatpush1.bf16.msra.mxu1 %v1589_v40  ;;  %v1633_v63 = vrot.slane %v1623_v56, %v2112_v24  ;;  %v1716_v21 = vsel %vm1714_vm12, %v1715_v61, 0 }
 0x14a   : > { %1741 = vmatpush1.bf16.msra.mxu0 %v1588_v52  ;;  %1783 = vmatprep.subr.bf16.mxu1 %v2021_v1  ;;  %v1626_v39 = vcombine.high %v1615_v53, %v1622_v55  ;;  %v1625_v58 = vcombine.low %v1615_v53, %v1622_v55  ;;  %v1666_v59 = vcombine.high %v1665_v23, %v1665_v23  ;;  %v969_v12 = vpop.permute.xlu0 %968 }
 0x14b   : > { %v1673_v62 = vrot.slane %v1665_v23, %v2112_v24 }
 0x14c   : > { %v1654_v4 = vrot.slane %v1626_v39, %v2112_v24  ;;  %v1647_v29 = vrot.slane %v1625_v58, %v2112_v24  ;;  %v1680_v5 = vrot.slane %v1666_v59, %v2112_v24  ;;  %v2030_v24 = vmov 1983009808  }
 0x14d   : > { %v1681_v7 = vcombine.high %v1673_v62, %v1673_v62  ;;  %v1718_v9 = vand.u32 %v1716_v21, %v1673_v62  ;;  %v1815_v15 = vunpack.c.l.s4 %v2030_v24 }
 0x14e   : > { %v1657_v36 = vcombine.low %v1640_v49, %v1654_v4  ;;  %v1656_v3 = vcombine.high %v1633_v63, %v1647_v29  ;;  %v1655_v50 = vcombine.low %v1633_v63, %v1647_v29  ;;  %v1721_v46 = vand.u32 %v1716_v21, %v1680_v5 }
 0x14f   : > { %v1724_v54 = vand.u32 %v1716_v21, %v1681_v7  ;;  %v1816_v6 = vunpack.c.0.s8 %v1815_v15 }
 0x150   : > { %1742 = vmatprep.subr.bf16.mxu0 %v1657_v36  ;;  %1784 = vmatpush1.bf16.msra.mxu1 %v1656_v3 }
 0x151   : > { %1743 = vmatpush1.bf16.msra.mxu0 %v1655_v50  ;;  %1785 = vmatprep.subr.bf16.mxu1 %v2021_v1  ;;  %v1819_v35 = vsub.s32 %v1816_v6, %v2102_v17 }
 0x152   : > { %1744 = vmatprep.subr.bf16.mxu0 %v1721_v46 }
 0x154   : > { %1786 = vmatpush1.bf16.msra.mxu1 %v1724_v54 }
 0x155   : > { %1745 = vmatpush1.bf16.msra.mxu0 %v1718_v9 }
 0x157   : > { %1800 = vmatmul.mubr.bf16.vlgmr.msra.gmra.mrb[0].mxu1 %v2306_v10 }
 0x158   : > { %1759 = vmatmul.mubr.bf16.vlgmr.msra.gmra.mrb[0].mxu0 %v2306_v10 }
 0x22a   : > { %v1801_v13 = vpop.f32.mrb[0].mxu1 }
 0x22b   : > { %v1802_v16 = vadd.f32 %v1801_v13, %v969_v12  ;;  %v1760_v19 = vpop.f32.mrb[0].mxu0  ;;  %v1803_v1 = vpop.f32.mrb[1].mxu1 }
 0x22c   : > { %v1761_v20 = vadd.f32 %v1760_v19, %v969_v12  ;;  %v1762_v25 = vpop.f32.mrb[1].mxu0  ;;  %v1804_v41 = vpop.f32.mrb[2].mxu1 }
 0x22d   : > { %v1809_v14 = vpack.c.bf16 %v1802_v16, %v1802_v16  ;;  %v1763_v26 = vadd.f32 %v1762_v25, %v969_v12  ;;  %v1764_v48 = vpop.f32.mrb[2].mxu0  ;;  %v1805_v57 = vpop.f32.mrb[3].mxu1 }
 0x22e   : > { %v1765_v10 = vpop.f32.mrb[3].mxu0 }
 0x22f   : > { %v1827_v11 = vrot.slane %v1809_v14, %v1819_v35  ;;  %v1949_v28 = vpack.c.bf16 %v1763_v26, %v1761_v20 }
 0x231   : > { %v1820_v18 = vrot.slane %v1949_v28, %v1819_v35 }
 0x233   : > { %v1828_v17 = vcombine.low %v1820_v18, %v1827_v11 }
 0x235   : > { %1834 = vst.msk [vmem:[%s170_s26] sm:$0x3f] %vm1833_vm0, %v1828_v17 }
 0x236 PF: > { %s13_s12 = sadd.s32 1, %s1999_s12  }
 0x237   : > { %p10_p4 = scmp.ge.s32.totalorder %s13_s12, 4  }
 0x239   :  { %12 = sbr.rel (!%p10_p4) target bundleno = 1 (0x1), region = 62 }

// kernel: _lambda_.19
= control target key start
LH: loop header
LB: loop body
LE: loop exit
PB: predicated region body
PF: predicated region fallthrough
CT: control target
= control target key end

     0   :  { %s372_s12 = smov 0   ;;  %s399_s0 = inlined_call_operand.vmem [shape: bf16[2,4,4,64], index: 0, kind: input, shape index: {}]   ;;  %s400_s1 = inlined_call_operand.vmem [shape: bf16[4,16], index: 1, kind: input, shape index: {}]   ;;  %s401_s2 = inlined_call_operand.vmem [shape: f32[4,1], index: 2, kind: input, shape index: {}]   ;;  %s402_s3 = inlined_call_operand.vmem [shape: bf16[2,4,64], index: 3, kind: output, shape index: {}]  }
   0x1 LB: > { %s307_s13 = sadd.s32 4294967295, %s346_s12   ;;  %p311_p0 = scmp.ge.s32.totalorder %s346_s12, 1  ;;  %s346_s12 = sphi %s372_s12, %s13_s12  }
   0x2   : > { %p137_p1 = scmp.lt.s32.totalorder %s346_s12, 3 }
   0x4   : > { %p138_p2 = pnand %p311_p0, %p137_p1 }
   0x5   : > { %p160_p3 = scmp.lt.s32.totalorder (!%p138_p2), %s307_s13, 1  ;;  %v194_v0 = vlaneseq (!%p138_p2)  ;;  %v348_v1 = vmov (!%p138_p2), 0.0   ;;  %v349_v2 = vmov (!%p138_p2), 1983009808   ;;  %v350_v4 = vmov (!%p138_p2), 0  }
   0x6   : > { %141 = sbr.rel (%p138_p2) target bundleno = 246 (0xf6), region = 32  ;;  %321 = vmatprep.subr.bf16.mxu0 (!%p138_p2), %v348_v1  ;;  %v192_v3 = vunpack.c.l.s4 (!%p138_p2), %v349_v2  ;;  %339 = vset.pattern.permute.xlu0 (!%p138_p2), %v350_v4  ;;  %v179_v5 = vld [vmem:[%s401_s2] sm:$0xf] (!%p138_p2)  ;;  %vm351_vm0 = vmmov (!%p138_p2), 0   ;;  %vm207_vm1 = vcmask (!%p138_p2), 130048   ;;  %vm252_vm2 = vcmask (!%p138_p2), 517120  }
   0x7   : > { %323 = vmatprep.mubr.msk.bf16.mxu0 (!%p138_p2), %vm351_vm0, %v348_v1  ;;  %182 = vperm.xlu0 (!%p138_p2), %339, %v179_v5   ;;  %v195_v7 = vshrl.u32 (!%p138_p2), %v194_v0, 7  ;;  %v178_v22 = vld [vmem:[%s400_s1] sm:$0x3] (!%p138_p2) }
   0x8   : > { %v193_v6 = vunpack.c.0.s8 (!%p138_p2), %v192_v3 }
   0xa   : > { %v196_v15 = vsub.s32 (!%p138_p2), %v193_v6, %v195_v7 }
   0xd   : > { %s404_s13 = smov (!%p160_p3, %s307_s13), 1 }
   0xe   : > { %s318_s16 = sshll.u32 %s404_s13, 3  ;;  %s314_s22 = sshll.u32 %s404_s13, 1 }
   0xf   : > { %s164_s19 = scalar_lea.vmem %s399_s0, %s318_s16  ;;  %s168_s25 = scalar_lea.vmem %s402_s3, %s314_s22 }
  0x10   : > { %v170_v8 = vld [vmem:[%s164_s19] sm:$0x3]  ;;  %v171_v9 = vld [vmem:[%s164_s19 + $0x2] sm:$0x3]  ;;  %v172_v10 = vld [vmem:[%s164_s19 + $0x4] sm:$0x3] }
  0x11   : > { %v173_v11 = vld [vmem:[%s164_s19 + $0x6] sm:$0x3]  ;;  %v174_v12 = vmax.bf16 %v350_v4, %v170_v8  ;;  %v175_v13 = vmax.bf16 %v350_v4, %v171_v9  ;;  %v176_v14 = vmax.bf16 %v350_v4, %v172_v10 }
  0x12   : > { %v177_v16 = vmax.bf16 %v350_v4, %v173_v11 }
  0x13   : > { %v189_v17 = vcombine.low %v174_v12, %v175_v13 }
  0x14   : > { %v190_v18 = vcombine.low %v176_v14, %v177_v16 }
  0x15   : > { %v197_v19 = vrot.slane %v189_v17, %v196_v15 }
  0x16   : > { %v204_v20 = vrot.slane %v190_v18, %v196_v15 }
  0x18   : > { %v205_v21 = vcombine.low %v197_v19, %v204_v20 }
  0x1a   : > { %322 = vmatpush3.bf16.msra.mxu0 %v205_v21 }
  0x1d   : > { %324 = vmatmul.mubr.msk.bf16.vlgmr.msra.gmra.mrb[0].mxu0 %vm207_vm1, %v178_v22 }
  0x86   : > { %v183_v23 = vpop.permute.xlu0 %182 }
  0xf0   : > { %v245_v24 = vpop.f32.mrb[0].mxu0 }
  0xf1   : > { %v246_v25 = vadd.f32 %v245_v24, %v183_v23  ;;  %v325_v26 = vpop.f32.mrb[1].mxu0 }
  0xf2   : > { %v248_v27 = vpop.f32.mrb[2].mxu0 }
  0xf3   : > { %v251_v28 = vpack.c.bf16 %v246_v25, %v246_v25  ;;  %v326_v29 = vpop.f32.mrb[3].mxu0 }
  0xf5   : > { %253 = vst.msk [vmem:[%s168_s25] sm:$0x3] %vm252_vm2, %v251_v28 }
  0xf6 PF: > { %s13_s12 = sadd.s32 1, %s346_s12  }
  0xf7   : > { %p10_p4 = scmp.ge.s32.totalorder %s13_s12, 4  }
  0xf9   :  { %12 = sbr.rel (!%p10_p4) target bundleno = 1 (0x1), region = 62 }

// kernel: _lambda_.22
= control target key start
LH: loop header
LB: loop body
LE: loop exit
PB: predicated region body
PF: predicated region fallthrough
CT: control target
= control target key end

     0   :  { %s424_s12 = smov 0   ;;  %s451_s0 = inlined_call_operand.vmem [shape: bf16[2,4,4,26], index: 0, kind: input, shape index: {}]   ;;  %s452_s1 = inlined_call_operand.vmem [shape: bf16[4,36], index: 1, kind: input, shape index: {}]   ;;  %s453_s2 = inlined_call_operand.vmem [shape: f32[4,1], index: 2, kind: input, shape index: {}]   ;;  %s454_s3 = inlined_call_operand.vmem [shape: bf16[2,4,20], index: 3, kind: output, shape index: {}]  }
   0x1 LB: > { %s346_s13 = sadd.s32 4294967295, %s395_s12   ;;  %p350_p0 = scmp.ge.s32.totalorder %s395_s12, 1  ;;  %s395_s12 = sphi %s424_s12, %s13_s12  }
   0x2   : > { %p137_p1 = scmp.lt.s32.totalorder %s395_s12, 3 }
   0x4   : > { %p138_p2 = pnand %p350_p0, %p137_p1 }
   0x5   : > { %p160_p3 = scmp.lt.s32.totalorder (!%p138_p2), %s346_s13, 1  ;;  %v397_v0 = vmov (!%p138_p2), 0.0   ;;  %v398_v1 = vmov (!%p138_p2), 0   ;;  %s399_s18 = smov (!%p138_p2), 123   ;;  %vm401_vm0 = vmmov (!%p138_p2), 0   ;;  %v204_v14 = vlaneseq (!%p138_p2) }
   0x6   : > { %141 = sbr.rel (%p138_p2) target bundleno = 368 (0x170), region = 32  ;;  %362 = vmatprep.subr.bf16.mxu0 (!%p138_p2), %v397_v0  ;;  %387 = vset.pattern.permute.xlu1 (!%p138_p2), %v398_v1  ;;  %s400_s19 = smov (!%p138_p2), 127   ;;  %v192_v11 = vld [vmem:[%s453_s2] sm:$0xf] (!%p138_p2)  ;;  %v403_v12 = vmov (!%p138_p2), 1983009808  }
   0x7   : > { %388 = vset.pattern.permute.xlu0 (!%p138_p2), %v398_v1  ;;  %368 = vmatprep.mubr.msk.bf16.mxu0 (!%p138_p2), %vm401_vm0, %v397_v0  ;;  %s402_s22 = smov (!%p138_p2), 122   ;;  %v202_v13 = vunpack.c.l.s4 (!%p138_p2), %v403_v12  ;;  %v205_v16 = vshrl.u32 (!%p138_p2), %v204_v14, 7  ;;  %vm246_vm1 = vcmask (!%p138_p2), 1041408   ;;  %v191_v34 = vld [vmem:[%s452_s1] sm:$0x3] (!%p138_p2)  ;;  %vm242_vm2 = vcmask (!%p138_p2), 293888  }
   0x8   : > { %vm291_vm3 = vcmask (!%p138_p2), 156672  }
   0x9   : > { %v203_v15 = vunpack.c.0.s8 (!%p138_p2), %v202_v13 }
   0xb   : > { %v206_v17 = vsub.s32 (!%p138_p2), %v203_v15, %v205_v16 }
   0xd   : > { %s456_s13 = smov (!%p160_p3, %s346_s13), 1 }
   0xe   : > { %s357_s14 = sshll.u32 %s456_s13, 3  ;;  %s353_s25 = sshll.u32 %s456_s13, 1 }
   0xf   : > { %s164_s17 = scalar_lea.vmem %s451_s0, %s357_s14  ;;  %s168_s28 = scalar_lea.vmem %s454_s3, %s353_s25 }
  0x10   : > { %v170_v2 = vld [vmem:[%s164_s17] sm:$0x3]  ;;  %v171_v3 = vld [vmem:[%s164_s17 + $0x2] sm:$0x3]  ;;  %v172_v4 = vld [vmem:[%s164_s17 + $0x4] sm:$0x3] }
  0x11   : > { %v174_v5 = vmax.bf16 %v398_v1, %v170_v2  ;;  %v175_v6 = vmax.bf16 %v398_v1, %v171_v3  ;;  %v173_v7 = vld [vmem:[%s164_s17 + $0x6] sm:$0x3]  ;;  %v176_v9 = vmax.bf16 %v398_v1, %v172_v4 }
  0x12   : > { %v177_v8 = vmax.bf16 %v398_v1, %v173_v7 }
  0x13   : > { %184 = vrot.lane.b32.xlu1 %v174_v5, %s399_s18  ;;  %179 = vrot.lane.b32.xlu0 %v174_v5, %s400_s19  ;;  %v199_v10 = vcombine.low %v174_v5, %v175_v6 }
  0x15   : > { %v207_v21 = vrot.slane %v199_v10, %v206_v17 }
  0x17   : > { %187 = vrot.lane.b32.xlu1 %v175_v6, %s399_s18  ;;  %182 = vrot.lane.b32.xlu0 %v176_v9, %s400_s19 }
  0x1b   : > { %189 = vrot.lane.b32.xlu0 %v174_v5, %s402_s22  ;;  %195 = vperm.xlu1 %387, %v192_v11  }
  0x85   : > { %v185_v18 = vpop.permute.xlu1 %184  ;;  %v180_v19 = vpop.permute.xlu0 %179 }
  0x86   : > { %v200_v20 = vcombine.low %v180_v19, %v176_v9 }
  0x88   : > { %v214_v22 = vrot.slane %v200_v20, %v206_v17 }
  0x89   : > { %v188_v23 = vpop.permute.xlu1 %187  ;;  %v183_v24 = vpop.permute.xlu0 %182 }
  0x8a   : > { %v217_v25 = vcombine.low %v185_v18, %v188_v23  ;;  %v216_v26 = vcombine.low %v177_v8, %v183_v24  ;;  %v215_v27 = vcombine.low %v207_v21, %v214_v22 }
  0x8c   : > { %v231_v28 = vrot.slane %v217_v25, %v206_v17  ;;  %v224_v29 = vrot.slane %v216_v26, %v206_v17  ;;  %363 = vmatpush3.bf16.msra.mxu0 %v215_v27 }
  0x8d   : > { %364 = vmatprep.subr.bf16.mxu0 %v397_v0  ;;  %v190_v30 = vpop.permute.xlu0 %189 }
  0x8e   : > { %v239_v31 = vrot.slane %v190_v30, %v206_v17  ;;  %v232_v32 = vcombine.low %v224_v29, %v231_v28 }
  0x90   : > { %365 = vmatpush3.bf16.msra.mxu0 %v232_v32  ;;  %v248_v33 = vsel %vm246_vm1, %v239_v31, 0 }
  0x91   : > { %366 = vmatprep.subr.bf16.mxu0 %v397_v0 }
  0x94   : > { %367 = vmatpush3.bf16.msra.mxu0 %v248_v33 }
  0x97   : > { %369 = vmatmul.mubr.msk.bf16.vlgmr.msra.gmra.mrb[0].mxu0 %vm242_vm2, %v191_v34 }
  0x9a   : > { %v196_v35 = vpop.permute.xlu1 %195 }
 0x16a   : > { %v284_v36 = vpop.f32.mrb[0].mxu0 }
 0x16b   : > { %v285_v37 = vadd.f32 %v284_v36, %v196_v35  ;;  %v370_v38 = vpop.f32.mrb[1].mxu0 }
 0x16c   : > { %v287_v39 = vpop.f32.mrb[2].mxu0 }
 0x16d   : > { %v290_v40 = vpack.c.bf16 %v285_v37, %v285_v37  ;;  %v371_v41 = vpop.f32.mrb[3].mxu0 }
 0x16f   : > { %292 = vst.msk [vmem:[%s168_s28] sm:$0x3] %vm291_vm3, %v290_v40 }
 0x170 PF: > { %s13_s12 = sadd.s32 1, %s395_s12  }
 0x171   : > { %p10_p4 = scmp.ge.s32.totalorder %s13_s12, 4  }
 0x173   :  { %12 = sbr.rel (!%p10_p4) target bundleno = 1 (0x1), region = 62 }

// kernel: _lambda_.18
= control target key start
LH: loop header
LB: loop body
LE: loop exit
PB: predicated region body
PF: predicated region fallthrough
CT: control target
= control target key end

     0   :  { %s424_s12 = smov 0   ;;  %s451_s0 = inlined_call_operand.vmem [shape: bf16[2,4,4,82], index: 0, kind: input, shape index: {}]   ;;  %s452_s1 = inlined_call_operand.vmem [shape: bf16[4,36], index: 1, kind: input, shape index: {}]   ;;  %s453_s2 = inlined_call_operand.vmem [shape: f32[4,1], index: 2, kind: input, shape index: {}]   ;;  %s454_s3 = inlined_call_operand.vmem [shape: bf16[2,4,72], index: 3, kind: output, shape index: {}]  }
   0x1 LB: > { %s346_s13 = sadd.s32 4294967295, %s395_s12   ;;  %p350_p0 = scmp.ge.s32.totalorder %s395_s12, 1  ;;  %s395_s12 = sphi %s424_s12, %s13_s12  }
   0x2   : > { %p137_p1 = scmp.lt.s32.totalorder %s395_s12, 3 }
   0x4   : > { %p138_p2 = pnand %p350_p0, %p137_p1 }
   0x5   : > { %p160_p3 = scmp.lt.s32.totalorder (!%p138_p2), %s346_s13, 1  ;;  %v397_v0 = vmov (!%p138_p2), 0.0   ;;  %v398_v1 = vmov (!%p138_p2), 0   ;;  %s399_s18 = smov (!%p138_p2), 119   ;;  %vm401_vm0 = vmmov (!%p138_p2), 0   ;;  %v204_v14 = vlaneseq (!%p138_p2) }
   0x6   : > { %141 = sbr.rel (%p138_p2) target bundleno = 368 (0x170), region = 32  ;;  %362 = vmatprep.subr.bf16.mxu0 (!%p138_p2), %v397_v0  ;;  %387 = vset.pattern.permute.xlu1 (!%p138_p2), %v398_v1  ;;  %s400_s19 = smov (!%p138_p2), 127   ;;  %v192_v11 = vld [vmem:[%s453_s2] sm:$0xf] (!%p138_p2)  ;;  %v403_v12 = vmov (!%p138_p2), 1983009808  }
   0x7   : > { %388 = vset.pattern.permute.xlu0 (!%p138_p2), %v398_v1  ;;  %368 = vmatprep.mubr.msk.bf16.mxu0 (!%p138_p2), %vm401_vm0, %v397_v0  ;;  %s402_s22 = smov (!%p138_p2), 118   ;;  %v202_v13 = vunpack.c.l.s4 (!%p138_p2), %v403_v12  ;;  %v205_v16 = vshrl.u32 (!%p138_p2), %v204_v14, 7  ;;  %vm246_vm1 = vcmask (!%p138_p2), 1041408   ;;  %v191_v34 = vld [vmem:[%s452_s1] sm:$0x3] (!%p138_p2)  ;;  %vm242_vm2 = vcmask (!%p138_p2), 293888  }
   0x8   : > { %vm291_vm3 = vcmask (!%p138_p2), 582656  }
   0x9   : > { %v203_v15 = vunpack.c.0.s8 (!%p138_p2), %v202_v13 }
   0xb   : > { %v206_v17 = vsub.s32 (!%p138_p2), %v203_v15, %v205_v16 }
   0xd   : > { %s456_s13 = smov (!%p160_p3, %s346_s13), 1 }
   0xe   : > { %s357_s14 = sshll.u32 %s456_s13, 3  ;;  %s353_s25 = sshll.u32 %s456_s13, 1 }
   0xf   : > { %s164_s17 = scalar_lea.vmem %s451_s0, %s357_s14  ;;  %s168_s28 = scalar_lea.vmem %s454_s3, %s353_s25 }
  0x10   : > { %v170_v2 = vld [vmem:[%s164_s17] sm:$0x3]  ;;  %v171_v3 = vld [vmem:[%s164_s17 + $0x2] sm:$0x3]  ;;  %v172_v4 = vld [vmem:[%s164_s17 + $0x4] sm:$0x3] }
  0x11   : > { %v174_v5 = vmax.bf16 %v398_v1, %v170_v2  ;;  %v175_v6 = vmax.bf16 %v398_v1, %v171_v3  ;;  %v173_v7 = vld [vmem:[%s164_s17 + $0x6] sm:$0x3]  ;;  %v176_v9 = vmax.bf16 %v398_v1, %v172_v4 }
  0x12   : > { %v177_v8 = vmax.bf16 %v398_v1, %v173_v7 }
  0x13   : > { %184 = vrot.lane.b32.xlu1 %v174_v5, %s399_s18  ;;  %179 = vrot.lane.b32.xlu0 %v174_v5, %s400_s19  ;;  %v199_v10 = vcombine.low %v174_v5, %v175_v6 }
  0x15   : > { %v207_v21 = vrot.slane %v199_v10, %v206_v17 }
  0x17   : > { %187 = vrot.lane.b32.xlu1 %v175_v6, %s399_s18  ;;  %182 = vrot.lane.b32.xlu0 %v176_v9, %s400_s19 }
  0x1b   : > { %189 = vrot.lane.b32.xlu0 %v174_v5, %s402_s22  ;;  %195 = vperm.xlu1 %387, %v192_v11  }
  0x85   : > { %v185_v18 = vpop.permute.xlu1 %184  ;;  %v180_v19 = vpop.permute.xlu0 %179 }
  0x86   : > { %v200_v20 = vcombine.low %v180_v19, %v176_v9 }
  0x88   : > { %v214_v22 = vrot.slane %v200_v20, %v206_v17 }
  0x89   : > { %v188_v23 = vpop.permute.xlu1 %187  ;;  %v183_v24 = vpop.permute.xlu0 %182 }
  0x8a   : > { %v217_v25 = vcombine.low %v185_v18, %v188_v23  ;;  %v216_v26 = vcombine.low %v177_v8, %v183_v24  ;;  %v215_v27 = vcombine.low %v207_v21, %v214_v22 }
  0x8c   : > { %v231_v28 = vrot.slane %v217_v25, %v206_v17  ;;  %v224_v29 = vrot.slane %v216_v26, %v206_v17  ;;  %363 = vmatpush3.bf16.msra.mxu0 %v215_v27 }
  0x8d   : > { %364 = vmatprep.subr.bf16.mxu0 %v397_v0  ;;  %v190_v30 = vpop.permute.xlu0 %189 }
  0x8e   : > { %v239_v31 = vrot.slane %v190_v30, %v206_v17  ;;  %v232_v32 = vcombine.low %v224_v29, %v231_v28 }
  0x90   : > { %365 = vmatpush3.bf16.msra.mxu0 %v232_v32  ;;  %v248_v33 = vsel %vm246_vm1, %v239_v31, 0 }
  0x91   : > { %366 = vmatprep.subr.bf16.mxu0 %v397_v0 }
  0x94   : > { %367 = vmatpush3.bf16.msra.mxu0 %v248_v33 }
  0x97   : > { %369 = vmatmul.mubr.msk.bf16.vlgmr.msra.gmra.mrb[0].mxu0 %vm242_vm2, %v191_v34 }
  0x9a   : > { %v196_v35 = vpop.permute.xlu1 %195 }
 0x16a   : > { %v284_v36 = vpop.f32.mrb[0].mxu0 }
 0x16b   : > { %v285_v37 = vadd.f32 %v284_v36, %v196_v35  ;;  %v370_v38 = vpop.f32.mrb[1].mxu0 }
 0x16c   : > { %v287_v39 = vpop.f32.mrb[2].mxu0 }
 0x16d   : > { %v290_v40 = vpack.c.bf16 %v285_v37, %v285_v37  ;;  %v371_v41 = vpop.f32.mrb[3].mxu0 }
 0x16f   : > { %292 = vst.msk [vmem:[%s168_s28] sm:$0x3] %vm291_vm3, %v290_v40 }
 0x170 PF: > { %s13_s12 = sadd.s32 1, %s395_s12  }
 0x171   : > { %p10_p4 = scmp.ge.s32.totalorder %s13_s12, 4  }
 0x173   :  { %12 = sbr.rel (!%p10_p4) target bundleno = 1 (0x1), region = 62 }

// kernel: _lambda_.17
= control target key start
LH: loop header
LB: loop body
LE: loop exit
PB: predicated region body
PF: predicated region fallthrough
CT: control target
= control target key end

     0   :  { %s408_s12 = smov 0   ;;  %s435_s0 = inlined_call_operand.vmem [shape: bf16[2,4,8,82], index: 0, kind: input, shape index: {}]   ;;  %s436_s1 = inlined_call_operand.vmem [shape: bf16[4,72], index: 1, kind: input, shape index: {}]   ;;  %s437_s2 = inlined_call_operand.vmem [shape: f32[4,1], index: 2, kind: input, shape index: {}]   ;;  %s438_s3 = inlined_call_operand.vmem [shape: bf16[2,4,72], index: 3, kind: output, shape index: {}]  }
   0x1 LB: > { %s321_s13 = sadd.s32 4294967295, %s380_s12   ;;  %p325_p0 = scmp.ge.s32.totalorder %s380_s12, 1  ;;  %s380_s12 = sphi %s408_s12, %s13_s12  }
   0x2   : > { %p137_p1 = scmp.lt.s32.totalorder %s380_s12, 3 }
   0x4   : > { %p138_p2 = pnand %p325_p0, %p137_p1 }
   0x5   : > { %p160_p3 = scmp.lt.s32.totalorder (!%p138_p2), %s321_s13, 1  ;;  %v382_v0 = vmov (!%p138_p2), 0.0   ;;  %v383_v1 = vmov (!%p138_p2), 0   ;;  %s384_s18 = smov (!%p138_p2), 119   ;;  %vm386_vm0 = vmmov (!%p138_p2), 0   ;;  %vm221_vm1 = vcmask (!%p138_p2), 1043456  }
   0x6   : > { %141 = sbr.rel (%p138_p2) target bundleno = 368 (0x170), region = 32  ;;  %344 = vmatprep.subr.bf16.mxu0 (!%p138_p2), %v382_v0  ;;  %372 = vset.pattern.permute.xlu1 (!%p138_p2), %v383_v1  ;;  %s385_s19 = smov (!%p138_p2), 127   ;;  %v192_v11 = vld [vmem:[%s437_s2] sm:$0xf] (!%p138_p2)  ;;  %vm217_vm2 = vcmask (!%p138_p2), 588800   ;;  %vm266_vm3 = vcmask (!%p138_p2), 582656  }
   0x7   : > { %373 = vset.pattern.permute.xlu0 (!%p138_p2), %v383_v1  ;;  %354 = vmatprep.mubr.msk.bf16.mxu0 (!%p138_p2), %vm386_vm0, %v382_v0  ;;  %s387_s22 = smov (!%p138_p2), 118   ;;  %v191_v22 = vld [vmem:[%s436_s1] sm:$0x3] (!%p138_p2) }
   0xd   : > { %s440_s13 = smov (!%p160_p3, %s321_s13), 1 }
   0xe   : > { %s337_s14 = sshll.u32 %s440_s13, 4  ;;  %s328_s25 = sshll.u32 %s440_s13, 1 }
   0xf   : > { %s164_s17 = scalar_lea.vmem %s435_s0, %s337_s14  ;;  %s168_s28 = scalar_lea.vmem %s438_s3, %s328_s25 }
  0x10   : > { %v170_v2 = vld [vmem:[%s164_s17] sm:$0xf]  ;;  %v171_v3 = vld [vmem:[%s164_s17 + $0x4] sm:$0xf]  ;;  %v172_v4 = vld [vmem:[%s164_s17 + $0x8] sm:$0xf] }
  0x11   : > { %v174_v5 = vmax.bf16 %v383_v1, %v170_v2  ;;  %v175_v6 = vmax.bf16 %v383_v1, %v171_v3  ;;  %v173_v7 = vld [vmem:[%s164_s17 + $0xc] sm:$0xf]  ;;  %v176_v9 = vmax.bf16 %v383_v1, %v172_v4 }
  0x12   : > { %v177_v8 = vmax.bf16 %v383_v1, %v173_v7 }
  0x13   : > { %184 = vrot.lane.b32.xlu1 %v174_v5, %s384_s18  ;;  %179 = vrot.lane.b32.xlu0 %v174_v5, %s385_s19  ;;  %v329_v10 = vcombine.low %v174_v5, %v175_v6 }
  0x15   : > { %345 = vmatpush3.bf16.msra.mxu0 %v329_v10 }
  0x16   : > { %346 = vmatprep.subr.bf16.mxu0 %v382_v0 }
  0x17   : > { %187 = vrot.lane.b32.xlu1 %v175_v6, %s384_s18  ;;  %182 = vrot.lane.b32.xlu0 %v176_v9, %s385_s19 }
  0x1b   : > { %189 = vrot.lane.b32.xlu0 %v174_v5, %s387_s22  ;;  %195 = vperm.xlu1 %372, %v192_v11  }
  0x85   : > { %v185_v12 = vpop.permute.xlu1 %184  ;;  %v180_v13 = vpop.permute.xlu0 %179 }
  0x86   : > { %v330_v14 = vcombine.low %v180_v13, %v176_v9 }
  0x88   : > { %347 = vmatpush3.bf16.msra.mxu0 %v330_v14 }
  0x89   : > { %v183_v15 = vpop.permute.xlu0 %182  ;;  %348 = vmatprep.subr.bf16.mxu0 %v382_v0  ;;  %v188_v17 = vpop.permute.xlu1 %187 }
  0x8a   : > { %v331_v16 = vcombine.low %v177_v8, %v183_v15  ;;  %v332_v19 = vcombine.low %v185_v12, %v188_v17 }
  0x8c   : > { %349 = vmatpush3.bf16.msra.mxu0 %v331_v16 }
  0x8d   : > { %350 = vmatprep.subr.bf16.mxu0 %v382_v0  ;;  %v190_v18 = vpop.permute.xlu0 %189 }
  0x8e   : > { %v333_v20 = vcombine.low %v190_v18, %v190_v18 }
  0x90   : > { %351 = vmatpush3.bf16.msra.mxu0 %v332_v19  ;;  %v223_v21 = vsel %vm221_vm1, %v333_v20, 0 }
  0x91   : > { %352 = vmatprep.subr.bf16.mxu0 %v382_v0 }
  0x94   : > { %353 = vmatpush3.bf16.msra.mxu0 %v223_v21 }
  0x97   : > { %355 = vmatmul.mubr.msk.bf16.vlgmr.msra.gmra.mrb[0].mxu0 %vm217_vm2, %v191_v22 }
  0x9a   : > { %v196_v23 = vpop.permute.xlu1 %195 }
 0x16a   : > { %v259_v24 = vpop.f32.mrb[0].mxu0 }
 0x16b   : > { %v260_v25 = vadd.f32 %v259_v24, %v196_v23  ;;  %v356_v26 = vpop.f32.mrb[1].mxu0 }
 0x16c   : > { %v262_v27 = vpop.f32.mrb[2].mxu0 }
 0x16d   : > { %v265_v28 = vpack.c.bf16 %v260_v25, %v260_v25  ;;  %v357_v29 = vpop.f32.mrb[3].mxu0 }
 0x16f   : > { %267 = vst.msk [vmem:[%s168_s28] sm:$0x3] %vm266_vm3, %v265_v28 }
 0x170 PF: > { %s13_s12 = sadd.s32 1, %s380_s12  }
 0x171   : > { %p10_p4 = scmp.ge.s32.totalorder %s13_s12, 4  }
 0x173   :  { %12 = sbr.rel (!%p10_p4) target bundleno = 1 (0x1), region = 62 }

// kernel: _lambda_.20
= control target key start
LH: loop header
LB: loop body
LE: loop exit
PB: predicated region body
PF: predicated region fallthrough
CT: control target
= control target key end

     0   :  { %s341_s12 = smov 0   ;;  %s364_s0 = inlined_call_operand.vmem [shape: bf16[2,1,8,64], index: 0, kind: input, shape index: {}]   ;;  %s365_s1 = inlined_call_operand.vmem [shape: bf16[4,8], index: 1, kind: input, shape index: {}]   ;;  %s366_s2 = inlined_call_operand.vmem [shape: f32[4,1], index: 2, kind: input, shape index: {}]   ;;  %s367_s3 = inlined_call_operand.vmem [shape: bf16[2,4,64], index: 3, kind: output, shape index: {}]  }
   0x1 LB: > { %s280_s13 = sadd.s32 4294967295, %s316_s12   ;;  %p284_p0 = scmp.ge.s32.totalorder %s316_s12, 1  ;;  %s316_s12 = sphi %s341_s12, %s13_s12  }
   0x2   : > { %p136_p1 = scmp.lt.s32.totalorder %s316_s12, 3 }
   0x4   : > { %p137_p2 = pnand %p284_p0, %p136_p1 }
   0x5   : > { %p158_p3 = scmp.lt.s32.totalorder (!%p137_p2), %s280_s13, 1  ;;  %v318_v0 = vmov (!%p137_p2), 0.0   ;;  %vm319_vm0 = vmmov (!%p137_p2), 0   ;;  %v170_v1 = vld [vmem:[%s366_s2] sm:$0xf] (!%p137_p2)  ;;  %v320_v2 = vmov (!%p137_p2), 0  }
   0x6   : > { %140 = sbr.rel (%p137_p2) target bundleno = 240 (0xf0), region = 32  ;;  %292 = vmatprep.subr.bf16.mxu0 (!%p137_p2), %v318_v0  ;;  %294 = vmatprep.mubr.msk.bf16.mxu0 (!%p137_p2), %vm319_vm0, %v318_v0  ;;  %vm180_vm1 = vcmask (!%p137_p2), 1043456   ;;  %v169_v6 = vld [vmem:[%s365_s1] sm:$0x3] (!%p137_p2)  ;;  %vm176_vm2 = vcmask (!%p137_p2), 64512   ;;  %vm225_vm3 = vcmask (!%p137_p2), 517120  }
   0x7   : > { %309 = vset.pattern.permute.xlu0 (!%p137_p2), %v320_v2 }
   0x8   : > { %173 = vperm.xlu0 (!%p137_p2), %309, %v170_v1  }
   0xd   : > { %s369_s13 = smov (!%p158_p3, %s280_s13), 1 }
   0xe   : > { %s285_s16 = sshll.u32 %s369_s13, 2  ;;  %s286_s22 = sshll.u32 %s369_s13, 1 }
   0xf   : > { %s161_s19 = scalar_lea.vmem %s364_s0, %s285_s16  ;;  %s165_s25 = scalar_lea.vmem %s367_s3, %s286_s22 }
  0x10   : > { %v167_v3 = vld [vmem:[%s161_s19] sm:$0xf] }
  0x11   : > { %v168_v4 = vmax.bf16 %v320_v2, %v167_v3 }
  0x13   : > { %v182_v5 = vsel %vm180_vm1, %v168_v4, 0 }
  0x14   : > { %293 = vmatpush3.bf16.msra.mxu0 %v182_v5 }
  0x17   : > { %295 = vmatmul.mubr.msk.bf16.vlgmr.msra.gmra.mrb[0].mxu0 %vm176_vm2, %v169_v6 }
  0x87   : > { %v174_v7 = vpop.permute.xlu0 %173 }
  0xea   : > { %v218_v8 = vpop.f32.mrb[0].mxu0 }
  0xeb   : > { %v219_v9 = vadd.f32 %v218_v8, %v174_v7  ;;  %v296_v10 = vpop.f32.mrb[1].mxu0 }
  0xec   : > { %v221_v11 = vpop.f32.mrb[2].mxu0 }
  0xed   : > { %v224_v12 = vpack.c.bf16 %v219_v9, %v219_v9  ;;  %v297_v13 = vpop.f32.mrb[3].mxu0 }
  0xef   : > { %226 = vst.msk [vmem:[%s165_s25] sm:$0x3] %vm225_vm3, %v224_v12 }
  0xf0 PF: > { %s13_s12 = sadd.s32 1, %s316_s12  }
  0xf1   : > { %p10_p4 = scmp.ge.s32.totalorder %s13_s12, 4  }
  0xf3   :  { %12 = sbr.rel (!%p10_p4) target bundleno = 1 (0x1), region = 62 }

// kernel: _lambda_.21
= control target key start
LH: loop header
LB: loop body
LE: loop exit
PB: predicated region body
PF: predicated region fallthrough
CT: control target
= control target key end

     0   :  { %s408_s12 = smov 0   ;;  %s435_s0 = inlined_call_operand.vmem [shape: bf16[2,4,8,26], index: 0, kind: input, shape index: {}]   ;;  %s436_s1 = inlined_call_operand.vmem [shape: bf16[4,72], index: 1, kind: input, shape index: {}]   ;;  %s437_s2 = inlined_call_operand.vmem [shape: f32[4,1], index: 2, kind: input, shape index: {}]   ;;  %s438_s3 = inlined_call_operand.vmem [shape: bf16[2,4,20], index: 3, kind: output, shape index: {}]  }
   0x1 LB: > { %s321_s13 = sadd.s32 4294967295, %s380_s12   ;;  %p325_p0 = scmp.ge.s32.totalorder %s380_s12, 1  ;;  %s380_s12 = sphi %s408_s12, %s13_s12  }
   0x2   : > { %p137_p1 = scmp.lt.s32.totalorder %s380_s12, 3 }
   0x4   : > { %p138_p2 = pnand %p325_p0, %p137_p1 }
   0x5   : > { %p160_p3 = scmp.lt.s32.totalorder (!%p138_p2), %s321_s13, 1  ;;  %v382_v0 = vmov (!%p138_p2), 0.0   ;;  %v383_v1 = vmov (!%p138_p2), 0   ;;  %s384_s18 = smov (!%p138_p2), 123   ;;  %vm386_vm0 = vmmov (!%p138_p2), 0   ;;  %vm221_vm1 = vcmask (!%p138_p2), 1043456  }
   0x6   : > { %141 = sbr.rel (%p138_p2) target bundleno = 368 (0x170), region = 32  ;;  %344 = vmatprep.subr.bf16.mxu0 (!%p138_p2), %v382_v0  ;;  %372 = vset.pattern.permute.xlu1 (!%p138_p2), %v383_v1  ;;  %s385_s19 = smov (!%p138_p2), 127   ;;  %v192_v11 = vld [vmem:[%s437_s2] sm:$0xf] (!%p138_p2)  ;;  %vm217_vm2 = vcmask (!%p138_p2), 588800   ;;  %vm266_vm3 = vcmask (!%p138_p2), 156672  }
   0x7   : > { %373 = vset.pattern.permute.xlu0 (!%p138_p2), %v383_v1  ;;  %354 = vmatprep.mubr.msk.bf16.mxu0 (!%p138_p2), %vm386_vm0, %v382_v0  ;;  %s387_s22 = smov (!%p138_p2), 122   ;;  %v191_v22 = vld [vmem:[%s436_s1] sm:$0x3] (!%p138_p2) }
   0xd   : > { %s440_s13 = smov (!%p160_p3, %s321_s13), 1 }
   0xe   : > { %s337_s14 = sshll.u32 %s440_s13, 4  ;;  %s328_s25 = sshll.u32 %s440_s13, 1 }
   0xf   : > { %s164_s17 = scalar_lea.vmem %s435_s0, %s337_s14  ;;  %s168_s28 = scalar_lea.vmem %s438_s3, %s328_s25 }
  0x10   : > { %v170_v2 = vld [vmem:[%s164_s17] sm:$0xf]  ;;  %v171_v3 = vld [vmem:[%s164_s17 + $0x4] sm:$0xf]  ;;  %v172_v4 = vld [vmem:[%s164_s17 + $0x8] sm:$0xf] }
  0x11   : > { %v174_v5 = vmax.bf16 %v383_v1, %v170_v2  ;;  %v175_v6 = vmax.bf16 %v383_v1, %v171_v3  ;;  %v173_v7 = vld [vmem:[%s164_s17 + $0xc] sm:$0xf]  ;;  %v176_v9 = vmax.bf16 %v383_v1, %v172_v4 }
  0x12   : > { %v177_v8 = vmax.bf16 %v383_v1, %v173_v7 }
  0x13   : > { %184 = vrot.lane.b32.xlu1 %v174_v5, %s384_s18  ;;  %179 = vrot.lane.b32.xlu0 %v174_v5, %s385_s19  ;;  %v329_v10 = vcombine.low %v174_v5, %v175_v6 }
  0x15   : > { %345 = vmatpush3.bf16.msra.mxu0 %v329_v10 }
  0x16   : > { %346 = vmatprep.subr.bf16.mxu0 %v382_v0 }
  0x17   : > { %187 = vrot.lane.b32.xlu1 %v175_v6, %s384_s18  ;;  %182 = vrot.lane.b32.xlu0 %v176_v9, %s385_s19 }
  0x1b   : > { %189 = vrot.lane.b32.xlu0 %v174_v5, %s387_s22  ;;  %195 = vperm.xlu1 %372, %v192_v11  }
  0x85   : > { %v185_v12 = vpop.permute.xlu1 %184  ;;  %v180_v13 = vpop.permute.xlu0 %179 }
  0x86   : > { %v330_v14 = vcombine.low %v180_v13, %v176_v9 }
  0x88   : > { %347 = vmatpush3.bf16.msra.mxu0 %v330_v14 }
  0x89   : > { %v183_v15 = vpop.permute.xlu0 %182  ;;  %348 = vmatprep.subr.bf16.mxu0 %v382_v0  ;;  %v188_v17 = vpop.permute.xlu1 %187 }
  0x8a   : > { %v331_v16 = vcombine.low %v177_v8, %v183_v15  ;;  %v332_v19 = vcombine.low %v185_v12, %v188_v17 }
  0x8c   : > { %349 = vmatpush3.bf16.msra.mxu0 %v331_v16 }
  0x8d   : > { %350 = vmatprep.subr.bf16.mxu0 %v382_v0  ;;  %v190_v18 = vpop.permute.xlu0 %189 }
  0x8e   : > { %v333_v20 = vcombine.low %v190_v18, %v190_v18 }
  0x90   : > { %351 = vmatpush3.bf16.msra.mxu0 %v332_v19  ;;  %v223_v21 = vsel %vm221_vm1, %v333_v20, 0 }
  0x91   : > { %352 = vmatprep.subr.bf16.mxu0 %v382_v0 }
  0x94   : > { %353 = vmatpush3.bf16.msra.mxu0 %v223_v21 }
  0x97   : > { %355 = vmatmul.mubr.msk.bf16.vlgmr.msra.gmra.mrb[0].mxu0 %vm217_vm2, %v191_v22 }
  0x9a   : > { %v196_v23 = vpop.permute.xlu1 %195 }
 0x16a   : > { %v259_v24 = vpop.f32.mrb[0].mxu0 }
 0x16b   : > { %v260_v25 = vadd.f32 %v259_v24, %v196_v23  ;;  %v356_v26 = vpop.f32.mrb[1].mxu0 }
 0x16c   : > { %v262_v27 = vpop.f32.mrb[2].mxu0 }
 0x16d   : > { %v265_v28 = vpack.c.bf16 %v260_v25, %v260_v25  ;;  %v357_v29 = vpop.f32.mrb[3].mxu0 }
 0x16f   : > { %267 = vst.msk [vmem:[%s168_s28] sm:$0x3] %vm266_vm3, %v265_v28 }
 0x170 PF: > { %s13_s12 = sadd.s32 1, %s380_s12  }
 0x171   : > { %p10_p4 = scmp.ge.s32.totalorder %s13_s12, 4  }
 0x173   :  { %12 = sbr.rel (!%p10_p4) target bundleno = 1 (0x1), region = 62 }

// kernel: _lambda_.23
= control target key start
LH: loop header
LB: loop body
LE: loop exit
PB: predicated region body
PF: predicated region fallthrough
CT: control target
= control target key end

     0   :  { %s341_s12 = smov 0   ;;  %s364_s0 = inlined_call_operand.vmem [shape: bf16[2,1,8,16], index: 0, kind: input, shape index: {}]   ;;  %s365_s1 = inlined_call_operand.vmem [shape: bf16[8,8], index: 1, kind: input, shape index: {}]   ;;  %s366_s2 = inlined_call_operand.vmem [shape: f32[8,1], index: 2, kind: input, shape index: {}]   ;;  %s367_s3 = inlined_call_operand.vmem [shape: bf16[2,8,16], index: 3, kind: output, shape index: {}]  }
   0x1 LB: > { %s280_s13 = sadd.s32 4294967295, %s316_s12   ;;  %p284_p0 = scmp.ge.s32.totalorder %s316_s12, 1  ;;  %s316_s12 = sphi %s341_s12, %s13_s12  }
   0x2   : > { %p136_p1 = scmp.lt.s32.totalorder %s316_s12, 3 }
   0x4   : > { %p137_p2 = pnand %p284_p0, %p136_p1 }
   0x5   : > { %p158_p3 = scmp.lt.s32.totalorder (!%p137_p2), %s280_s13, 1  ;;  %v170_v0 = vld [vmem:[%s366_s2] sm:$0xff] (!%p137_p2)  ;;  %v318_v1 = vmov (!%p137_p2), 0.0   ;;  %vm319_vm0 = vmmov (!%p137_p2), 0   ;;  %v320_v2 = vmov (!%p137_p2), 0   ;;  %vm180_vm1 = vcmask (!%p137_p2), 1043456  }
   0x6   : > { %140 = sbr.rel (%p137_p2) target bundleno = 240 (0xf0), region = 32  ;;  %292 = vmatprep.subr.bf16.mxu0 (!%p137_p2), %v318_v1  ;;  %294 = vmatprep.mubr.msk.bf16.mxu0 (!%p137_p2), %vm319_vm0, %v318_v1  ;;  %v169_v6 = vld [vmem:[%s365_s1] sm:$0xf] (!%p137_p2)  ;;  %vm176_vm2 = vcmask (!%p137_p2), 64512   ;;  %vm225_vm3 = vcmask (!%p137_p2), 125952  }
   0x7   : > { %309 = vset.pattern.permute.xlu0 (!%p137_p2), %v320_v2 }
   0x8   : > { %173 = vperm.xlu0 (!%p137_p2), %309, %v170_v0  }
   0xd   : > { %s369_s13 = smov (!%p158_p3, %s280_s13), 1 }
   0xe   : > { %s285_s16 = sshll.u32 %s369_s13, 2 }
   0xf   : > { %s161_s19 = scalar_lea.vmem %s364_s0, %s285_s16  ;;  %s165_s24 = scalar_lea.vmem %s367_s3, %s285_s16 }
  0x10   : > { %v167_v3 = vld [vmem:[%s161_s19] sm:$0xf] }
  0x11   : > { %v168_v4 = vmax.bf16 %v320_v2, %v167_v3 }
  0x13   : > { %v182_v5 = vsel %vm180_vm1, %v168_v4, 0 }
  0x14   : > { %293 = vmatpush3.bf16.msra.mxu0 %v182_v5 }
  0x17   : > { %295 = vmatmul.mubr.msk.bf16.vlgmr.msra.gmra.mrb[0].mxu0 %vm176_vm2, %v169_v6 }
  0x87   : > { %v174_v7 = vpop.permute.xlu0 %173 }
  0xea   : > { %v218_v8 = vpop.f32.mrb[0].mxu0 }
  0xeb   : > { %v219_v9 = vadd.f32 %v218_v8, %v174_v7  ;;  %v296_v10 = vpop.f32.mrb[1].mxu0 }
  0xec   : > { %v221_v11 = vpop.f32.mrb[2].mxu0 }
  0xed   : > { %v224_v12 = vpack.c.bf16 %v219_v9, %v219_v9  ;;  %v297_v13 = vpop.f32.mrb[3].mxu0 }
  0xef   : > { %226 = vst.msk [vmem:[%s165_s24] sm:$0xf] %vm225_vm3, %v224_v12 }
  0xf0 PF: > { %s13_s12 = sadd.s32 1, %s316_s12  }
  0xf1   : > { %p10_p4 = scmp.ge.s32.totalorder %s13_s12, 4  }
  0xf3   :  { %12 = sbr.rel (!%p10_p4) target bundleno = 1 (0x1), region = 62 }

// kernel: _lambda_.24
= control target key start
LH: loop header
LB: loop body
LE: loop exit
PB: predicated region body
PF: predicated region fallthrough
CT: control target
= control target key end

     0   :  { %s443_s12 = smov 0   ;;  %s473_s0 = inlined_call_operand.vmem [shape: bf16[2,1,8,38], index: 0, kind: input, shape index: {}]   ;;  %s474_s1 = inlined_call_operand.vmem [shape: bf16[16,72], index: 1, kind: input, shape index: {}]   ;;  %s475_s2 = inlined_call_operand.vmem [shape: f32[16,1], index: 2, kind: input, shape index: {}]   ;;  %s476_s3 = inlined_call_operand.vmem [shape: bf16[2,16,24], index: 3, kind: output, shape index: {}]  }
   0x1 LB: > { %s340_s13 = sadd.s32 4294967295, %s410_s12   ;;  %p344_p0 = scmp.ge.s32.totalorder %s410_s12, 1  ;;  %s410_s12 = sphi %s443_s12, %s13_s12  }
   0x2   : > { %p136_p1 = scmp.lt.s32.totalorder %s410_s12, 3 }
   0x4   : > { %p137_p2 = pnand %p344_p0, %p136_p1 }
   0x5   : > { %p159_p3 = scmp.lt.s32.totalorder (!%p137_p2), %s340_s13, 1  ;;  %v412_v0 = vmov (!%p137_p2), 0.0   ;;  %v413_v1 = vmov (!%p137_p2), 0   ;;  %s414_s18 = smov (!%p137_p2), 127   ;;  %vm418_vm0 = vmmov (!%p137_p2), 0   ;;  %v190_v4 = vld [vmem:[%s475_s2] sm:$0xff] (!%p137_p2) }
   0x6   : > { %140 = sbr.rel (%p137_p2) target bundleno = 374 (0x176), region = 32  ;;  %368 = vmatprep.subr.bf16.mxu0 (!%p137_p2), %v412_v0  ;;  %401 = vset.pattern.permute.xlu0 (!%p137_p2), %v413_v1  ;;  %s415_s19 = smov (!%p137_p2), 122   ;;  %v191_v5 = vld [vmem:[%s475_s2 + $0x8] sm:$0xff] (!%p137_p2)  ;;  %vm229_vm1 = vcmask (!%p137_p2), 1043456   ;;  %v403_v20 = vld [vmem:[%s474_s1] sm:$0xff] (!%p137_p2)   ;;  %vm225_vm2 = vcmask (!%p137_p2), 588800  }
   0x7   : > { %402 = vset.pattern.permute.xlu1 (!%p137_p2), %v413_v1  ;;  %s416_s20 = smov (!%p137_p2), 126   ;;  %s417_s21 = smov (!%p137_p2), 121   ;;  %378 = vmatprep.mubr.msk.bf16.mxu0 (!%p137_p2), %vm418_vm0, %v412_v0  ;;  %vm282_vm3 = vcmask (!%p137_p2), 191488  }
   0x8   : > { %s419_s22 = smov (!%p137_p2), 120   ;;  %s420_s23 = smov (!%p137_p2), 116  }
   0x9   : > { %s421_s24 = smov (!%p137_p2), 115   ;;  %s422_s25 = smov (!%p137_p2), 114  }
   0xd   : > { %s478_s13 = smov (!%p159_p3, %s340_s13), 1 }
   0xe   : > { %s345_s14 = sshll.u32 %s478_s13, 2  ;;  %s359_s5 = sshll.u32 %s478_s13, 3 }
   0xf   : > { %s162_s17 = scalar_lea.vmem %s473_s0, %s345_s14  ;;  %s167_s8 = scalar_lea.vmem %s476_s3, %s359_s5 }
  0x10   : > { %v169_v2 = vld [vmem:[%s162_s17] sm:$0xf] }
  0x11   : > { %v170_v3 = vmax.bf16 %v413_v1, %v169_v2 }
  0x13   : > { %172 = vrot.lane.b32.xlu0 %v170_v3, %s414_s18  ;;  %176 = vrot.lane.b32.xlu1 %v170_v3, %s415_s19 }
  0x17   : > { %174 = vrot.lane.b32.xlu0 %v170_v3, %s416_s20  ;;  %178 = vrot.lane.b32.xlu1 %v170_v3, %s417_s21 }
  0x1b   : > { %180 = vrot.lane.b32.xlu0 %v170_v3, %s419_s22  ;;  %182 = vrot.lane.b32.xlu1 %v170_v3, %s420_s23 }
  0x1f   : > { %184 = vrot.lane.b32.xlu0 %v170_v3, %s421_s24  ;;  %186 = vrot.lane.b32.xlu1 %v170_v3, %s422_s25 }
  0x23   : > { %194 = vperm.xlu0 %401, %v190_v4   ;;  %199 = vperm.xlu1 %402, %v191_v5  }
  0x85   : > { %v173_v6 = vpop.permute.xlu0 %172  ;;  %v177_v7 = vpop.permute.xlu1 %176 }
  0x86   : > { %v349_v8 = vcombine.low %v170_v3, %v173_v6 }
  0x88   : > { %369 = vmatpush3.bf16.msra.mxu0 %v349_v8 }
  0x89   : > { %v175_v9 = vpop.permute.xlu0 %174  ;;  %370 = vmatprep.subr.bf16.mxu0 %v412_v0  ;;  %v179_v10 = vpop.permute.xlu1 %178 }
  0x8a   : > { %v350_v11 = vcombine.low %v175_v9, %v177_v7 }
  0x8c   : > { %371 = vmatpush3.bf16.msra.mxu0 %v350_v11 }
  0x8d   : > { %v181_v12 = vpop.permute.xlu0 %180  ;;  %372 = vmatprep.subr.bf16.mxu0 %v412_v0  ;;  %v183_v13 = vpop.permute.xlu1 %182 }
  0x8e   : > { %v351_v14 = vcombine.low %v179_v10, %v181_v12 }
  0x90   : > { %373 = vmatpush3.bf16.msra.mxu0 %v351_v14 }
  0x91   : > { %v185_v15 = vpop.permute.xlu0 %184  ;;  %374 = vmatprep.subr.bf16.mxu0 %v412_v0  ;;  %v187_v16 = vpop.permute.xlu1 %186 }
  0x92   : > { %v352_v17 = vcombine.low %v183_v13, %v185_v15  ;;  %v353_v18 = vcombine.low %v187_v16, %v187_v16 }
  0x94   : > { %375 = vmatpush3.bf16.msra.mxu0 %v352_v17  ;;  %v231_v19 = vsel %vm229_vm1, %v353_v18, 0 }
  0x95   : > { %376 = vmatprep.subr.bf16.mxu0 %v412_v0 }
  0x98   : > { %377 = vmatpush3.bf16.msra.mxu0 %v231_v19 }
  0x9b   : > { %379 = vmatmul.mubr.msk.bf16.vlgmr.msra.gmra.mrb[0].mxu0 %vm225_vm2, %v403_v20 }
  0xa2   : > { %v195_v21 = vpop.permute.xlu0 %194  ;;  %v200_v23 = vpop.permute.xlu1 %199 }
 0x16e   : > { %v267_v22 = vpop.f32.mrb[0].mxu0 }
 0x16f   : > { %v268_v24 = vadd.f32 %v267_v22, %v195_v21  ;;  %v380_v25 = vpop.f32.mrb[1].mxu0 }
 0x170   : > { %v270_v26 = vpop.f32.mrb[2].mxu0 }
 0x171   : > { %v360_v27 = vpack.c.bf16 %v268_v24, %v268_v24  ;;  %v271_v28 = vadd.f32 %v270_v26, %v200_v23  ;;  %v381_v29 = vpop.f32.mrb[3].mxu0 }
 0x173   : > { %283 = vst.msk [vmem:[%s167_s8] sm:$0xf] %vm282_vm3, %v360_v27  ;;  %v361_v30 = vpack.c.bf16 %v271_v28, %v271_v28 }
 0x175   : > { %284 = vst.msk [vmem:[%s167_s8 + $0x4] sm:$0xf] %vm282_vm3, %v361_v30 }
 0x176 PF: > { %s13_s12 = sadd.s32 1, %s410_s12  }
 0x177   : > { %p10_p4 = scmp.ge.s32.totalorder %s13_s12, 4  }
 0x179   :  { %12 = sbr.rel (!%p10_p4) target bundleno = 1 (0x1), region = 62 }

// kernel: _lambda_.26
= control target key start
LH: loop header
LB: loop body
LE: loop exit
PB: predicated region body
PF: predicated region fallthrough
CT: control target
= control target key end

     0   :  { %s351_s12 = smov 0   ;;  %s374_s0 = inlined_call_operand.vmem [shape: bf16[2,1,16,64], index: 0, kind: input, shape index: {}]   ;;  %s375_s1 = inlined_call_operand.vmem [shape: bf16[8,16], index: 1, kind: input, shape index: {}]   ;;  %s376_s2 = inlined_call_operand.vmem [shape: f32[8,1], index: 2, kind: input, shape index: {}]   ;;  %s377_s3 = inlined_call_operand.vmem [shape: bf16[2,8,64], index: 3, kind: output, shape index: {}]  }
   0x1 LB: > { %s287_s13 = sadd.s32 4294967295, %s326_s12   ;;  %p291_p0 = scmp.ge.s32.totalorder %s326_s12, 1  ;;  %s326_s12 = sphi %s351_s12, %s13_s12  }
   0x2   : > { %p137_p1 = scmp.lt.s32.totalorder %s326_s12, 3 }
   0x4   : > { %p138_p2 = pnand %p291_p0, %p137_p1 }
   0x5   : > { %p160_p3 = scmp.lt.s32.totalorder (!%p138_p2), %s287_s13, 1  ;;  %v328_v0 = vmov (!%p138_p2), 0.0   ;;  %vm329_vm0 = vmmov (!%p138_p2), 0   ;;  %v175_v1 = vld [vmem:[%s376_s2] sm:$0xff] (!%p138_p2)  ;;  %v330_v2 = vmov (!%p138_p2), 0   ;;  %vm187_vm1 = vcmask (!%p138_p2), 130048  }
   0x6   : > { %141 = sbr.rel (%p138_p2) target bundleno = 241 (0xf1), region = 32  ;;  %302 = vmatprep.subr.bf16.mxu0 (!%p138_p2), %v328_v0  ;;  %304 = vmatprep.mubr.msk.bf16.mxu0 (!%p138_p2), %vm329_vm0, %v328_v0  ;;  %v174_v8 = vld [vmem:[%s375_s1] sm:$0xf] (!%p138_p2)  ;;  %vm232_vm2 = vcmask (!%p138_p2), 519168  }
   0x7   : > { %319 = vset.pattern.permute.xlu0 (!%p138_p2), %v330_v2 }
   0x8   : > { %178 = vperm.xlu0 (!%p138_p2), %319, %v175_v1  }
   0xd   : > { %s379_s13 = smov (!%p160_p3, %s287_s13), 1 }
   0xe   : > { %s299_s16 = sshll.u32 %s379_s13, 3  ;;  %s294_s22 = sshll.u32 %s379_s13, 2 }
   0xf   : > { %s164_s19 = scalar_lea.vmem %s374_s0, %s299_s16  ;;  %s168_s25 = scalar_lea.vmem %s377_s3, %s294_s22 }
  0x10   : > { %v170_v3 = vld [vmem:[%s164_s19] sm:$0xf]  ;;  %v171_v4 = vld [vmem:[%s164_s19 + $0x4] sm:$0xf] }
  0x11   : > { %v172_v5 = vmax.bf16 %v330_v2, %v170_v3  ;;  %v173_v6 = vmax.bf16 %v330_v2, %v171_v4 }
  0x13   : > { %v295_v7 = vcombine.low %v172_v5, %v173_v6 }
  0x15   : > { %303 = vmatpush3.bf16.msra.mxu0 %v295_v7 }
  0x18   : > { %305 = vmatmul.mubr.msk.bf16.vlgmr.msra.gmra.mrb[0].mxu0 %vm187_vm1, %v174_v8 }
  0x87   : > { %v179_v9 = vpop.permute.xlu0 %178 }
  0xeb   : > { %v225_v10 = vpop.f32.mrb[0].mxu0 }
  0xec   : > { %v226_v11 = vadd.f32 %v225_v10, %v179_v9  ;;  %v306_v12 = vpop.f32.mrb[1].mxu0 }
  0xed   : > { %v228_v13 = vpop.f32.mrb[2].mxu0 }
  0xee   : > { %v231_v14 = vpack.c.bf16 %v226_v11, %v226_v11  ;;  %v307_v15 = vpop.f32.mrb[3].mxu0 }
  0xf0   : > { %233 = vst.msk [vmem:[%s168_s25] sm:$0xf] %vm232_vm2, %v231_v14 }
  0xf1 PF: > { %s13_s12 = sadd.s32 1, %s326_s12  }
  0xf2   : > { %p10_p4 = scmp.ge.s32.totalorder %s13_s12, 4  }
  0xf4   :  { %12 = sbr.rel (!%p10_p4) target bundleno = 1 (0x1), region = 62 }

// kernel: _lambda_.25
= control target key start
LH: loop header
LB: loop body
LE: loop exit
PB: predicated region body
PF: predicated region fallthrough
CT: control target
= control target key end

     0   :  { %s425_s12 = smov 0   ;;  %s455_s0 = inlined_call_operand.vmem [shape: bf16[2,1,4,102], index: 0, kind: input, shape index: {}]   ;;  %s456_s1 = inlined_call_operand.vmem [shape: bf16[4,36], index: 1, kind: input, shape index: {}]   ;;  %s457_s2 = inlined_call_operand.vmem [shape: f32[4,1], index: 2, kind: input, shape index: {}]   ;;  %s458_s3 = inlined_call_operand.vmem [shape: bf16[2,4,80], index: 3, kind: output, shape index: {}]  }
   0x1 LB: > { %s340_s13 = sadd.s32 4294967295, %s391_s12   ;;  %p344_p0 = scmp.ge.s32.totalorder %s391_s12, 1  ;;  %s391_s12 = sphi %s425_s12, %s13_s12  }
   0x2   : > { %p136_p1 = scmp.lt.s32.totalorder %s391_s12, 3 }
   0x4   : > { %p137_p2 = pnand %p344_p0, %p136_p1 }
   0x5   : > { %p158_p3 = scmp.lt.s32.totalorder (!%p137_p2), %s340_s13, 1  ;;  %v393_v0 = vmov (!%p137_p2), 0   ;;  %v394_v1 = vmov (!%p137_p2), 0.0   ;;  %s395_s18 = smov (!%p137_p2), 127   ;;  %vm401_vm0 = vmmov (!%p137_p2), 0   ;;  %v198_v7 = vlaneseq (!%p137_p2) }
   0x6   : > { %140 = sbr.rel (%p137_p2) target bundleno = 376 (0x178), region = 32  ;;  %384 = vset.pattern.permute.xlu0 (!%p137_p2), %v393_v0  ;;  %354 = vmatprep.subr.bf16.mxu0 (!%p137_p2), %v394_v1  ;;  %s396_s19 = smov (!%p137_p2), 118   ;;  %v187_v4 = vld [vmem:[%s457_s2] sm:$0xf] (!%p137_p2)  ;;  %v404_v5 = vmov (!%p137_p2), 1983009808  }
   0x7   : > { %s397_s20 = smov (!%p137_p2), 126   ;;  %s398_s21 = smov (!%p137_p2), 117   ;;  %360 = vmatprep.mubr.msk.bf16.mxu0 (!%p137_p2), %vm401_vm0, %v394_v1  ;;  %v196_v6 = vunpack.c.l.s4 (!%p137_p2), %v404_v5  ;;  %v199_v9 = vshrl.u32 (!%p137_p2), %v198_v7, 7  ;;  %vm240_vm1 = vcmask (!%p137_p2), 1041408   ;;  %v186_v31 = vld [vmem:[%s456_s1] sm:$0x3] (!%p137_p2) }
   0x8   : > { %s399_s22 = smov (!%p137_p2), 116   ;;  %s400_s23 = smov (!%p137_p2), 108   ;;  %vm236_vm2 = vcmask (!%p137_p2), 293888   ;;  %vm285_vm3 = vcmask (!%p137_p2), 648192  }
   0x9   : > { %s402_s24 = smov (!%p137_p2), 107   ;;  %s403_s25 = smov (!%p137_p2), 106   ;;  %v197_v8 = vunpack.c.0.s8 (!%p137_p2), %v196_v6 }
   0xb   : > { %v200_v12 = vsub.s32 (!%p137_p2), %v197_v8, %v199_v9 }
   0xd   : > { %s460_s13 = smov (!%p158_p3, %s340_s13), 1 }
   0xe   : > { %s345_s14 = sshll.u32 %s460_s13, 1 }
   0xf   : > { %s161_s17 = scalar_lea.vmem %s455_s0, %s345_s14  ;;  %s165_s5 = scalar_lea.vmem %s458_s3, %s345_s14 }
  0x10   : > { %v167_v2 = vld [vmem:[%s161_s17] sm:$0x3] }
  0x11   : > { %v168_v3 = vmax.bf16 %v393_v0, %v167_v2 }
  0x13   : > { %170 = vrot.lane.b32.xlu0 %v168_v3, %s395_s18  ;;  %174 = vrot.lane.b32.xlu1 %v168_v3, %s396_s19 }
  0x17   : > { %172 = vrot.lane.b32.xlu0 %v168_v3, %s397_s20  ;;  %176 = vrot.lane.b32.xlu1 %v168_v3, %s398_s21 }
  0x1b   : > { %178 = vrot.lane.b32.xlu0 %v168_v3, %s399_s22  ;;  %180 = vrot.lane.b32.xlu1 %v168_v3, %s400_s23 }
  0x1f   : > { %182 = vrot.lane.b32.xlu0 %v168_v3, %s402_s24  ;;  %184 = vrot.lane.b32.xlu1 %v168_v3, %s403_s25 }
  0x23   : > { %190 = vperm.xlu0 %384, %v187_v4  }
  0x85   : > { %v171_v10 = vpop.permute.xlu0 %170  ;;  %v175_v11 = vpop.permute.xlu1 %174 }
  0x86   : > { %v193_v13 = vcombine.low %v168_v3, %v171_v10 }
  0x88   : > { %v201_v17 = vrot.slane %v193_v13, %v200_v12 }
  0x89   : > { %v173_v14 = vpop.permute.xlu0 %172  ;;  %v177_v15 = vpop.permute.xlu1 %176 }
  0x8a   : > { %v194_v16 = vcombine.low %v173_v14, %v175_v11 }
  0x8c   : > { %v208_v18 = vrot.slane %v194_v16, %v200_v12 }
  0x8d   : > { %v179_v19 = vpop.permute.xlu0 %178  ;;  %v181_v21 = vpop.permute.xlu1 %180 }
  0x8e   : > { %v209_v20 = vcombine.low %v201_v17, %v208_v18  ;;  %v210_v22 = vcombine.low %v177_v15, %v179_v19 }
  0x90   : > { %355 = vmatpush3.bf16.msra.mxu0 %v209_v20  ;;  %v218_v26 = vrot.slane %v210_v22, %v200_v12 }
  0x91   : > { %v183_v23 = vpop.permute.xlu0 %182  ;;  %356 = vmatprep.subr.bf16.mxu0 %v394_v1  ;;  %v185_v25 = vpop.permute.xlu1 %184 }
  0x92   : > { %v211_v24 = vcombine.low %v181_v21, %v183_v23  ;;  %v233_v28 = vrot.slane %v185_v25, %v200_v12 }
  0x94   : > { %v225_v27 = vrot.slane %v211_v24, %v200_v12  ;;  %v242_v30 = vsel %vm240_vm1, %v233_v28, 0 }
  0x96   : > { %v226_v29 = vcombine.low %v218_v26, %v225_v27 }
  0x98   : > { %357 = vmatpush3.bf16.msra.mxu0 %v226_v29 }
  0x99   : > { %358 = vmatprep.subr.bf16.mxu0 %v394_v1 }
  0x9c   : > { %359 = vmatpush3.bf16.msra.mxu0 %v242_v30 }
  0x9f   : > { %361 = vmatmul.mubr.msk.bf16.vlgmr.msra.gmra.mrb[0].mxu0 %vm236_vm2, %v186_v31 }
  0xa2   : > { %v191_v32 = vpop.permute.xlu0 %190 }
 0x172   : > { %v278_v33 = vpop.f32.mrb[0].mxu0 }
 0x173   : > { %v279_v34 = vadd.f32 %v278_v33, %v191_v32  ;;  %v362_v35 = vpop.f32.mrb[1].mxu0 }
 0x174   : > { %v281_v36 = vpop.f32.mrb[2].mxu0 }
 0x175   : > { %v284_v37 = vpack.c.bf16 %v279_v34, %v279_v34  ;;  %v363_v38 = vpop.f32.mrb[3].mxu0 }
 0x177   : > { %286 = vst.msk [vmem:[%s165_s5] sm:$0x3] %vm285_vm3, %v284_v37 }
 0x178 PF: > { %s13_s12 = sadd.s32 1, %s391_s12  }
 0x179   : > { %p10_p4 = scmp.ge.s32.totalorder %s13_s12, 4  }
 0x17b   :  { %12 = sbr.rel (!%p10_p4) target bundleno = 1 (0x1), region = 62 }

// kernel: _lambda_.27
= control target key start
LH: loop header
LB: loop body
LE: loop exit
PB: predicated region body
PF: predicated region fallthrough
CT: control target
= control target key end

     0   :  { %s443_s12 = smov 0   ;;  %s473_s0 = inlined_call_operand.vmem [shape: bf16[2,1,8,102], index: 0, kind: input, shape index: {}]   ;;  %s474_s1 = inlined_call_operand.vmem [shape: bf16[16,72], index: 1, kind: input, shape index: {}]   ;;  %s475_s2 = inlined_call_operand.vmem [shape: f32[16,1], index: 2, kind: input, shape index: {}]   ;;  %s476_s3 = inlined_call_operand.vmem [shape: bf16[2,16,80], index: 3, kind: output, shape index: {}]  }
   0x1 LB: > { %s340_s13 = sadd.s32 4294967295, %s410_s12   ;;  %p344_p0 = scmp.ge.s32.totalorder %s410_s12, 1  ;;  %s410_s12 = sphi %s443_s12, %s13_s12  }
   0x2   : > { %p136_p1 = scmp.lt.s32.totalorder %s410_s12, 3 }
   0x4   : > { %p137_p2 = pnand %p344_p0, %p136_p1 }
   0x5   : > { %p159_p3 = scmp.lt.s32.totalorder (!%p137_p2), %s340_s13, 1  ;;  %v412_v0 = vmov (!%p137_p2), 0.0   ;;  %v413_v1 = vmov (!%p137_p2), 0   ;;  %s414_s18 = smov (!%p137_p2), 127   ;;  %vm418_vm0 = vmmov (!%p137_p2), 0   ;;  %v190_v4 = vld [vmem:[%s475_s2] sm:$0xff] (!%p137_p2) }
   0x6   : > { %140 = sbr.rel (%p137_p2) target bundleno = 374 (0x176), region = 32  ;;  %368 = vmatprep.subr.bf16.mxu0 (!%p137_p2), %v412_v0  ;;  %401 = vset.pattern.permute.xlu0 (!%p137_p2), %v413_v1  ;;  %s415_s19 = smov (!%p137_p2), 118   ;;  %v191_v5 = vld [vmem:[%s475_s2 + $0x8] sm:$0xff] (!%p137_p2)  ;;  %vm229_vm1 = vcmask (!%p137_p2), 1043456   ;;  %v403_v20 = vld [vmem:[%s474_s1] sm:$0xff] (!%p137_p2)   ;;  %vm225_vm2 = vcmask (!%p137_p2), 588800  }
   0x7   : > { %402 = vset.pattern.permute.xlu1 (!%p137_p2), %v413_v1  ;;  %s416_s20 = smov (!%p137_p2), 126   ;;  %s417_s21 = smov (!%p137_p2), 117   ;;  %378 = vmatprep.mubr.msk.bf16.mxu0 (!%p137_p2), %vm418_vm0, %v412_v0  ;;  %vm282_vm3 = vcmask (!%p137_p2), 650240  }
   0x8   : > { %s419_s22 = smov (!%p137_p2), 116   ;;  %s420_s23 = smov (!%p137_p2), 108  }
   0x9   : > { %s421_s24 = smov (!%p137_p2), 107   ;;  %s422_s25 = smov (!%p137_p2), 106  }
   0xd   : > { %s478_s13 = smov (!%p159_p3, %s340_s13), 1 }
   0xe   : > { %s345_s14 = sshll.u32 %s478_s13, 2  ;;  %s359_s5 = sshll.u32 %s478_s13, 3 }
   0xf   : > { %s162_s17 = scalar_lea.vmem %s473_s0, %s345_s14  ;;  %s167_s8 = scalar_lea.vmem %s476_s3, %s359_s5 }
  0x10   : > { %v169_v2 = vld [vmem:[%s162_s17] sm:$0xf] }
  0x11   : > { %v170_v3 = vmax.bf16 %v413_v1, %v169_v2 }
  0x13   : > { %172 = vrot.lane.b32.xlu0 %v170_v3, %s414_s18  ;;  %176 = vrot.lane.b32.xlu1 %v170_v3, %s415_s19 }
  0x17   : > { %174 = vrot.lane.b32.xlu0 %v170_v3, %s416_s20  ;;  %178 = vrot.lane.b32.xlu1 %v170_v3, %s417_s21 }
  0x1b   : > { %180 = vrot.lane.b32.xlu0 %v170_v3, %s419_s22  ;;  %182 = vrot.lane.b32.xlu1 %v170_v3, %s420_s23 }
  0x1f   : > { %184 = vrot.lane.b32.xlu0 %v170_v3, %s421_s24  ;;  %186 = vrot.lane.b32.xlu1 %v170_v3, %s422_s25 }
  0x23   : > { %194 = vperm.xlu0 %401, %v190_v4   ;;  %199 = vperm.xlu1 %402, %v191_v5  }
  0x85   : > { %v173_v6 = vpop.permute.xlu0 %172  ;;  %v177_v7 = vpop.permute.xlu1 %176 }
  0x86   : > { %v349_v8 = vcombine.low %v170_v3, %v173_v6 }
  0x88   : > { %369 = vmatpush3.bf16.msra.mxu0 %v349_v8 }
  0x89   : > { %v175_v9 = vpop.permute.xlu0 %174  ;;  %370 = vmatprep.subr.bf16.mxu0 %v412_v0  ;;  %v179_v10 = vpop.permute.xlu1 %178 }
  0x8a   : > { %v350_v11 = vcombine.low %v175_v9, %v177_v7 }
  0x8c   : > { %371 = vmatpush3.bf16.msra.mxu0 %v350_v11 }
  0x8d   : > { %v181_v12 = vpop.permute.xlu0 %180  ;;  %372 = vmatprep.subr.bf16.mxu0 %v412_v0  ;;  %v183_v13 = vpop.permute.xlu1 %182 }
  0x8e   : > { %v351_v14 = vcombine.low %v179_v10, %v181_v12 }
  0x90   : > { %373 = vmatpush3.bf16.msra.mxu0 %v351_v14 }
  0x91   : > { %v185_v15 = vpop.permute.xlu0 %184  ;;  %374 = vmatprep.subr.bf16.mxu0 %v412_v0  ;;  %v187_v16 = vpop.permute.xlu1 %186 }
  0x92   : > { %v352_v17 = vcombine.low %v183_v13, %v185_v15  ;;  %v353_v18 = vcombine.low %v187_v16, %v187_v16 }
  0x94   : > { %375 = vmatpush3.bf16.msra.mxu0 %v352_v17  ;;  %v231_v19 = vsel %vm229_vm1, %v353_v18, 0 }
  0x95   : > { %376 = vmatprep.subr.bf16.mxu0 %v412_v0 }
  0x98   : > { %377 = vmatpush3.bf16.msra.mxu0 %v231_v19 }
  0x9b   : > { %379 = vmatmul.mubr.msk.bf16.vlgmr.msra.gmra.mrb[0].mxu0 %vm225_vm2, %v403_v20 }
  0xa2   : > { %v195_v21 = vpop.permute.xlu0 %194  ;;  %v200_v23 = vpop.permute.xlu1 %199 }
 0x16e   : > { %v267_v22 = vpop.f32.mrb[0].mxu0 }
 0x16f   : > { %v268_v24 = vadd.f32 %v267_v22, %v195_v21  ;;  %v380_v25 = vpop.f32.mrb[1].mxu0 }
 0x170   : > { %v270_v26 = vpop.f32.mrb[2].mxu0 }
 0x171   : > { %v360_v27 = vpack.c.bf16 %v268_v24, %v268_v24  ;;  %v271_v28 = vadd.f32 %v270_v26, %v200_v23  ;;  %v381_v29 = vpop.f32.mrb[3].mxu0 }
 0x173   : > { %283 = vst.msk [vmem:[%s167_s8] sm:$0xf] %vm282_vm3, %v360_v27  ;;  %v361_v30 = vpack.c.bf16 %v271_v28, %v271_v28 }
 0x175   : > { %284 = vst.msk [vmem:[%s167_s8 + $0x4] sm:$0xf] %vm282_vm3, %v361_v30 }
 0x176 PF: > { %s13_s12 = sadd.s32 1, %s410_s12  }
 0x177   : > { %p10_p4 = scmp.ge.s32.totalorder %s13_s12, 4  }
 0x179   :  { %12 = sbr.rel (!%p10_p4) target bundleno = 1 (0x1), region = 62 }

// kernel: _lambda_.28
= control target key start
LH: loop header
LB: loop body
LE: loop exit
PB: predicated region body
PF: predicated region fallthrough
CT: control target
= control target key end

     0   :  { %s581_s12 = smov 0   ;;  %s635_s0 = inlined_call_operand.vmem [shape: bf16[2,1,4,326], index: 0, kind: input, shape index: {}]   ;;  %s636_s1 = inlined_call_operand.vmem [shape: bf16[4,36], index: 1, kind: input, shape index: {}]   ;;  %s637_s2 = inlined_call_operand.vmem [shape: f32[4,1], index: 2, kind: input, shape index: {}]   ;;  %s638_s3 = inlined_call_operand.vmem [shape: bf16[2,4,288], index: 3, kind: output, shape index: {}]  }
   0x1 LB: > { %s492_s13 = sadd.s32 4294967295, %s547_s12   ;;  %p496_p0 = scmp.ge.s32.totalorder %s547_s12, 1  ;;  %s547_s12 = sphi %s581_s12, %s13_s12  }
   0x2   : > { %p137_p1 = scmp.lt.s32.totalorder %s547_s12, 3 }
   0x4   : > { %p138_p2 = pnand %p496_p0, %p137_p1 }
   0x5   : > { %p161_p3 = scmp.lt.s32.totalorder (!%p138_p2), %s492_s13, 1  ;;  %v549_v0 = vmov (!%p138_p2), 0   ;;  %v550_v3 = vmov (!%p138_p2), 0.0   ;;  %s551_s18 = smov (!%p138_p2), 127   ;;  %vm559_vm0 = vmmov (!%p138_p2), 0   ;;  %v229_v7 = vlaneseq (!%p138_p2) }
   0x6   : > { %141 = sbr.rel (%p138_p2) target bundleno = 386 (0x182), region = 32  ;;  %360 = vmatprep.mubr.bf16.mxu0 (!%p138_p2), %v549_v0  ;;  %540 = vset.pattern.permute.xlu0 (!%p138_p2), %v549_v0  ;;  %s552_s19 = smov (!%p138_p2), 110   ;;  %v216_v4 = vld [vmem:[%s637_s2] sm:$0xf] (!%p138_p2)  ;;  %v560_v5 = vmov (!%p138_p2), 1983009808  }
   0x7   : > { %509 = vmatprep.subr.bf16.mxu1 (!%p138_p2), %v550_v3  ;;  %s553_s20 = smov (!%p138_p2), 126   ;;  %s554_s21 = smov (!%p138_p2), 109   ;;  %515 = vmatprep.mubr.msk.bf16.mxu1 (!%p138_p2), %vm559_vm0, %v550_v3  ;;  %v227_v6 = vunpack.c.l.s4 (!%p138_p2), %v560_v5  ;;  %vm178_vm1 = vcmask (!%p138_p2), 1039360   ;;  %v230_v12 = vshrl.u32 (!%p138_p2), %v229_v7, 7  ;;  %vm188_vm2 = vcmask (!%p138_p2), 900096  }
   0x8   : > { %s555_s22 = smov (!%p138_p2), 108   ;;  %s556_s23 = smov (!%p138_p2), 92   ;;  %vm183_vm3 = vcmask (!%p138_p2), 1031168   ;;  %vm198_vm4 = vcmask (!%p138_p2), 883712   ;;  %vm193_vm5 = vcmask (!%p138_p2), 891904   ;;  %vm203_vm6 = vcmask (!%p138_p2), 752640  }
   0x9   : > { %s557_s24 = smov (!%p138_p2), 91   ;;  %s558_s25 = smov (!%p138_p2), 90   ;;  %v228_v11 = vunpack.c.0.s8 (!%p138_p2), %v227_v6  ;;  %vm208_vm7 = vcmask (!%p138_p2), 744448   ;;  %vm213_vm8 = vcmask (!%p138_p2), 736256   ;;  %vm318_vm9 = vcmask (!%p138_p2), 1041408  }
   0xa   : > { %v215_v63 = vld [vmem:[%s636_s1] sm:$0x3] (!%p138_p2)  ;;  %vm314_vm10 = vcmask (!%p138_p2), 293888   ;;  %vm432_vm11 = vcmask (!%p138_p2), 1043458   ;;  %vm434_vm13 = vcmask (!%p138_p2), 259076  }
   0xb   : > { %v602_v20 = vsub.s32 (!%p138_p2), %v228_v11, %v230_v12  ;;  %vm433_vm12 = vmor (!%p138_p2), %vm432_vm11, %vm318_vm9 }
   0xc   : > { %vm435_vm14 = vmor (!%p138_p2), %vm434_vm13, %vm433_vm12 }
   0xd   : > { %s640_s13 = smov (!%p161_p3, %s492_s13), 1 }
   0xe   : > { %s519_s14 = smul.u32 6, %s640_s13 }
  0x10   : > { %s165_s17 = scalar_lea.vmem %s635_s0, %s519_s14  ;;  %s170_s5 = scalar_lea.vmem %s638_s3, %s519_s14 }
  0x11   : > { %v172_v1 = vld [vmem:[%s165_s17] sm:$0x3f] }
  0x12   : > { %v173_v2 = vmax.bf16 %v549_v0, %v172_v1 }
  0x14   : > { %175 = vrot.lane.b32.xlu0 %v173_v2, %s551_s18  ;;  %185 = vrot.lane.b32.xlu1 %v173_v2, %s552_s19 }
  0x18   : > { %180 = vrot.lane.b32.xlu0 %v173_v2, %s553_s20  ;;  %190 = vrot.lane.b32.xlu1 %v173_v2, %s554_s21 }
  0x1c   : > { %195 = vrot.lane.b32.xlu0 %v173_v2, %s555_s22  ;;  %200 = vrot.lane.b32.xlu1 %v173_v2, %s556_s23 }
  0x20   : > { %205 = vrot.lane.b32.xlu0 %v173_v2, %s557_s24  ;;  %210 = vrot.lane.b32.xlu1 %v173_v2, %s558_s25 }
  0x24   : > { %219 = vperm.xlu0 %540, %v216_v4  }
  0x86   : > { %v176_v8 = vpop.permute.xlu0 %175  ;;  %v186_v9 = vpop.permute.xlu1 %185 }
  0x87   : > { %v177_v10 = vrot.slane %v176_v8, 2  ;;  %v187_v14 = vrot.slane %v186_v9, 2 }
  0x89   : > { %v179_v13 = vsel %vm178_vm1, %v176_v8, %v177_v10  ;;  %v189_v21 = vsel %vm188_vm2, %v186_v9, %v187_v14 }
  0x8a   : > { %v181_v15 = vpop.permute.xlu0 %180  ;;  %v191_v16 = vpop.permute.xlu1 %190  ;;  %v222_v18 = vcombine.low %v173_v2, %v179_v13  ;;  %v223_v19 = vcombine.high %v173_v2, %v179_v13 }
  0x8b   : > { %v182_v17 = vrot.slane %v181_v15, 2  ;;  %v192_v27 = vrot.slane %v191_v16, 2 }
  0x8c   : > { %v232_v29 = vrot.slane %v222_v18, %v602_v20  ;;  %v239_v31 = vrot.slane %v223_v19, %v602_v20 }
  0x8d   : > { %v184_v22 = vsel %vm183_vm3, %v181_v15, %v182_v17  ;;  %v194_v39 = vsel %vm193_vm5, %v191_v16, %v192_v27 }
  0x8e   : > { %v224_v23 = vcombine.low %v184_v22, %v189_v21  ;;  %v225_v24 = vcombine.high %v184_v22, %v189_v21  ;;  %v196_v25 = vpop.permute.xlu0 %195  ;;  %v201_v26 = vpop.permute.xlu1 %200 }
  0x8f   : > { %v197_v28 = vrot.slane %v196_v25, 2  ;;  %v202_v34 = vrot.slane %v201_v26, 2 }
  0x90   : > { %v246_v30 = vrot.slane %v224_v23, %v602_v20  ;;  %v253_v32 = vrot.slane %v225_v24, %v602_v20 }
  0x91   : > { %v199_v33 = vsel %vm198_vm4, %v196_v25, %v197_v28  ;;  %v204_v45 = vsel %vm203_vm6, %v201_v26, %v202_v34 }
  0x92   : > { %v206_v35 = vpop.permute.xlu0 %205  ;;  %v255_v36 = vcombine.high %v232_v29, %v246_v30  ;;  %v256_v37 = vcombine.low %v239_v31, %v253_v32  ;;  %v211_v38 = vpop.permute.xlu1 %210  ;;  %v254_v41 = vcombine.low %v232_v29, %v246_v30  ;;  %v257_v43 = vcombine.low %v194_v39, %v199_v33 }
  0x93   : > { %v207_v40 = vrot.slane %v206_v35, 2  ;;  %v212_v42 = vrot.slane %v211_v38, 2  ;;  %v258_v44 = vcombine.high %v194_v39, %v199_v33 }
  0x94   : > { %328 = vmatprep.subr.bf16.mxu0 %v255_v36  ;;  %510 = vmatpush3.bf16.msra.mxu1 %v256_v37  ;;  %v267_v52 = vrot.slane %v257_v43, %v602_v20 }
  0x95   : > { %v209_v46 = vsel %vm208_vm7, %v206_v35, %v207_v40  ;;  %329 = vmatpush1.bf16.msra.mxu0 %v254_v41  ;;  %v214_v47 = vsel %vm213_vm8, %v211_v38, %v212_v42  ;;  %511 = vmatprep.subr.bf16.mxu1 %v550_v3  ;;  %v274_v53 = vrot.slane %v258_v44, %v602_v20 }
  0x96   : > { %v259_v48 = vcombine.low %v204_v45, %v209_v46  ;;  %v260_v49 = vcombine.high %v204_v45, %v209_v46  ;;  %v292_v50 = vcombine.high %v214_v47, %v214_v47  ;;  %v299_v51 = vrot.slane %v214_v47, %v602_v20 }
  0x98   : > { %v281_v54 = vrot.slane %v259_v48, %v602_v20  ;;  %v288_v55 = vrot.slane %v260_v49, %v602_v20  ;;  %v306_v56 = vrot.slane %v292_v50, %v602_v20  ;;  %v307_v57 = vcombine.high %v299_v51, %v299_v51 }
  0x99   : > { %v320_v62 = vsel %vm318_vm9, %v299_v51, 0 }
  0x9a   : > { %v290_v58 = vcombine.high %v267_v52, %v281_v54  ;;  %v291_v59 = vcombine.low %v274_v53, %v288_v55  ;;  %v289_v60 = vcombine.low %v267_v52, %v281_v54  ;;  %v326_v61 = vsel %vm318_vm9, %v306_v56, 0 }
  0x9c   : > { %330 = vmatprep.subr.bf16.mxu0 %v290_v58  ;;  %512 = vmatpush3.bf16.msra.mxu1 %v291_v59 }
  0x9d   : > { %331 = vmatpush1.bf16.msra.mxu0 %v289_v60  ;;  %513 = vmatprep.subr.bf16.mxu1 %v550_v3 }
  0x9e   : > { %499 = vmatprep.subr.msk.bf16.mxu0 %vm318_vm9, %v307_v57 }
  0xa0   : > { %514 = vmatpush3.bf16.msra.mxu1 %v326_v61 }
  0xa1   : > { %333 = vmatpush1.bf16.msra.mxu0 %v320_v62 }
  0xa3   : > { %516 = vmatmul.mubr.msk.bf16.vlgmr.msra.gmra.mrb[0].mxu1 %vm314_vm10, %v215_v63  ;;  %v220_v0 = vpop.permute.xlu0 %219 }
  0xa4   : > { %500 = vmatmul.mubr.msk.bf16.vlgmr.msra.gmra.mrb[0].mxu0 %vm314_vm10, %v215_v63 }
 0x176   : > { %v403_v1 = vpop.f32.mrb[0].mxu1 }
 0x177   : > { %v362_v2 = vpop.f32.mrb[0].mxu0  ;;  %v517_v4 = vpop.f32.mrb[1].mxu1  ;;  %v404_v3 = vadd.f32 %v403_v1, %v220_v0 }
 0x178   : > { %v363_v5 = vadd.f32 %v362_v2, %v220_v0  ;;  %v364_v6 = vpop.f32.mrb[1].mxu0  ;;  %v406_v7 = vpop.f32.mrb[2].mxu1 }
 0x179   : > { %v411_v8 = vpack.c.bf16 %v404_v3, %v404_v3  ;;  %v365_v9 = vadd.f32 %v364_v6, %v220_v0  ;;  %v366_v10 = vpop.f32.mrb[2].mxu0  ;;  %v518_v11 = vpop.f32.mrb[3].mxu1 }
 0x17a   : > { %v367_v12 = vpop.f32.mrb[3].mxu0 }
 0x17b   : > { %v429_v13 = vrot.slane %v411_v8, %v602_v20  ;;  %v502_v14 = vpack.c.bf16 %v365_v9, %v363_v5 }
 0x17d   : > { %v422_v15 = vrot.slane %v502_v14, %v602_v20 }
 0x17f   : > { %v430_v16 = vcombine.low %v422_v15, %v429_v13 }
 0x181   : > { %436 = vst.msk [vmem:[%s170_s5] sm:$0x3f] %vm435_vm14, %v430_v16 }
 0x182 PF: > { %s13_s12 = sadd.s32 1, %s547_s12  }
 0x183   : > { %p10_p4 = scmp.ge.s32.totalorder %s13_s12, 4  }
 0x185   :  { %12 = sbr.rel (!%p10_p4) target bundleno = 1 (0x1), region = 62 }

// kernel: _lambda_.29
= control target key start
LH: loop header
LB: loop body
LE: loop exit
PB: predicated region body
PF: predicated region fallthrough
CT: control target
= control target key end

     0   :  { %s588_s12 = smov 0   ;;  %s635_s0 = inlined_call_operand.vmem [shape: bf16[2,1,8,326], index: 0, kind: input, shape index: {}]   ;;  %s636_s1 = inlined_call_operand.vmem [shape: bf16[3,72], index: 1, kind: input, shape index: {}]   ;;  %s637_s2 = inlined_call_operand.vmem [shape: f32[3,1], index: 2, kind: input, shape index: {}]   ;;  %s638_s3 = inlined_call_operand.vmem [shape: f32[2,3,288], index: 3, kind: output, shape index: {}]  }
   0x1 LB: > { %s475_s13 = sadd.s32 4294967295, %s555_s12   ;;  %p479_p0 = scmp.ge.s32.totalorder %s555_s12, 1  ;;  %s555_s12 = sphi %s588_s12, %s13_s12  }
   0x2   : > { %p137_p1 = scmp.lt.s32.totalorder %s555_s12, 3 }
   0x4   : > { %p138_p2 = pnand %p479_p0, %p137_p1 }
   0x5   : > { %p161_p3 = scmp.lt.s32.totalorder (!%p138_p2), %s475_s13, 1  ;;  %v557_v0 = vmov (!%p138_p2), 0   ;;  %v558_v1 = vmov (!%p138_p2), 0.0   ;;  %s559_s18 = smov (!%p138_p2), 126   ;;  %vm566_vm0 = vmmov (!%p138_p2), 0   ;;  %vm184_vm1 = vcmask (!%p138_p2), 1043456  }
   0x6   : > { %141 = sbr.rel (%p138_p2) target bundleno = 405 (0x195), region = 32  ;;  %358 = vmatprep.mubr.bf16.mxu0 (!%p138_p2), %v557_v0  ;;  %542 = vset.pattern.permute.xlu0 (!%p138_p2), %v557_v0  ;;  %s560_s19 = smov (!%p138_p2), 127   ;;  %v252_v6 = vld [vmem:[%s637_s2] sm:$0x7] (!%p138_p2)  ;;  %vm186_vm2 = vcmask (!%p138_p2), 1039360   ;;  %vm195_vm3 = vcmask (!%p138_p2), 1031168  }
   0x7   : > { %508 = vmatprep.subr.bf16.mxu1 (!%p138_p2), %v558_v1  ;;  %s561_s20 = smov (!%p138_p2), 110   ;;  %s562_s21 = smov (!%p138_p2), 109   ;;  %518 = vmatprep.mubr.msk.bf16.mxu1 (!%p138_p2), %vm566_vm0, %v558_v1  ;;  %vm204_vm4 = vcmask (!%p138_p2), 900096   ;;  %vm213_vm5 = vcmask (!%p138_p2), 891904   ;;  %vm222_vm6 = vcmask (!%p138_p2), 883712   ;;  %vm231_vm7 = vcmask (!%p138_p2), 752640  }
   0x8   : > { %s563_s22 = smov (!%p138_p2), 108   ;;  %s564_s23 = smov (!%p138_p2), 92   ;;  %vm240_vm8 = vcmask (!%p138_p2), 744448   ;;  %vm249_vm9 = vcmask (!%p138_p2), 736256   ;;  %vm312_vm10 = vcmask (!%p138_p2), 588800   ;;  %vm418_vm11 = vcmask (!%p138_p2), 256000  }
   0x9   : > { %s565_s24 = smov (!%p138_p2), 91   ;;  %s567_s25 = smov (!%p138_p2), 90  }
   0xd   : > { %s640_s13 = smov (!%p161_p3, %s475_s13), 1 }
   0xe   : > { %s522_s14 = smul.u32 12, %s640_s13 }
  0x10   : > { %s165_s17 = scalar_lea.vmem %s635_s0, %s522_s14  ;;  %s170_s5 = scalar_lea.vmem %s638_s3, %s522_s14 }
  0x11   : > { %v172_v2 = vld [vmem:[%s165_s17] sm:$0xff]  ;;  %v173_v3 = vld [vmem:[%s165_s17 + $0x8] sm:$0xf] }
  0x12   : > { %v174_v4 = vmax.bf16 %v557_v0, %v172_v2  ;;  %v175_v5 = vmax.bf16 %v557_v0, %v173_v3 }
  0x14   : > { %188 = vrot.lane.b32.xlu1 %v174_v4, %s559_s18  ;;  %178 = vrot.lane.b32.xlu0 %v174_v4, %s560_s19 }
  0x18   : > { %190 = vrot.lane.b32.xlu1 %v175_v5, %s559_s18  ;;  %180 = vrot.lane.b32.xlu0 %v175_v5, %s560_s19 }
  0x1c   : > { %199 = vrot.lane.b32.xlu1 %v175_v5, %s561_s20  ;;  %197 = vrot.lane.b32.xlu0 %v174_v4, %s561_s20 }
  0x20   : > { %208 = vrot.lane.b32.xlu1 %v175_v5, %s562_s21  ;;  %206 = vrot.lane.b32.xlu0 %v174_v4, %s562_s21 }
  0x24   : > { %217 = vrot.lane.b32.xlu1 %v175_v5, %s563_s22  ;;  %215 = vrot.lane.b32.xlu0 %v174_v4, %s563_s22 }
  0x28   : > { %226 = vrot.lane.b32.xlu1 %v175_v5, %s564_s23  ;;  %224 = vrot.lane.b32.xlu0 %v174_v4, %s564_s23 }
  0x2c   : > { %235 = vrot.lane.b32.xlu1 %v175_v5, %s565_s24  ;;  %233 = vrot.lane.b32.xlu0 %v174_v4, %s565_s24 }
  0x30   : > { %244 = vrot.lane.b32.xlu1 %v175_v5, %s567_s25  ;;  %242 = vrot.lane.b32.xlu0 %v174_v4, %s567_s25 }
  0x34   : > { %255 = vperm.xlu0 %542, %v252_v6  }
  0x86   : > { %v189_v7 = vpop.permute.xlu1 %188  ;;  %v179_v8 = vpop.permute.xlu0 %178 }
  0x87   : > { %v182_v11 = vrot.slane %v179_v8, 4  ;;  %v192_v15 = vrot.slane %v189_v7, 4 }
  0x8a   : > { %v191_v9 = vpop.permute.xlu1 %190  ;;  %v181_v10 = vpop.permute.xlu0 %180 }
  0x8b   : > { %v193_v12 = vrot.slane %v191_v9, 4  ;;  %v183_v13 = vrot.slane %v181_v10, 4  ;;  %v484_v14 = vcombine.low %v175_v5, %v181_v10  ;;  %v251_v5 = vld [vmem:[%s636_s1] sm:$0x3] }
  0x8d   : > { %509 = vmatpush3.bf16.msra.mxu1 %v484_v14  ;;  %v185_v16 = vsel %vm184_vm1, %v182_v11, %v183_v13  ;;  %v194_v18 = vsel %vm184_vm1, %v192_v15, %v193_v12 }
  0x8e   : > { %v200_v17 = vpop.permute.xlu1 %199  ;;  %v198_v19 = vpop.permute.xlu0 %197  ;;  %510 = vmatprep.subr.bf16.mxu1 %v558_v1  ;;  %v187_v20 = vsel %vm186_vm2, %v179_v8, %v185_v16  ;;  %v196_v27 = vsel %vm195_vm3, %v189_v7, %v194_v18 }
  0x8f   : > { %v202_v21 = vrot.slane %v200_v17, 4  ;;  %v487_v22 = vcombine.low %v191_v9, %v200_v17  ;;  %v201_v23 = vrot.slane %v198_v19, 4  ;;  %v483_v24 = vcombine.high %v174_v4, %v187_v20 }
  0x90   : > { %v482_v25 = vcombine.low %v174_v4, %v187_v20 }
  0x91   : > { %v203_v26 = vsel %vm184_vm1, %v201_v23, %v202_v21  ;;  %326 = vmatprep.subr.bf16.mxu0 %v483_v24  ;;  %511 = vmatpush3.bf16.msra.mxu1 %v487_v22 }
  0x92   : > { %v205_v28 = vsel %vm204_vm4, %v198_v19, %v203_v26  ;;  %v209_v29 = vpop.permute.xlu1 %208  ;;  %327 = vmatpush1.bf16.msra.mxu0 %v482_v25  ;;  %v207_v30 = vpop.permute.xlu0 %206  ;;  %512 = vmatprep.subr.bf16.mxu1 %v558_v1 }
  0x93   : > { %v485_v31 = vcombine.low %v196_v27, %v205_v28  ;;  %v486_v32 = vcombine.high %v196_v27, %v205_v28  ;;  %v211_v33 = vrot.slane %v209_v29, 4  ;;  %v210_v34 = vrot.slane %v207_v30, 4 }
  0x95   : > { %328 = vmatprep.subr.bf16.mxu0 %v486_v32  ;;  %v212_v37 = vsel %vm184_vm1, %v210_v34, %v211_v33 }
  0x96   : > { %v218_v35 = vpop.permute.xlu1 %217  ;;  %329 = vmatpush1.bf16.msra.mxu0 %v485_v31  ;;  %v216_v36 = vpop.permute.xlu0 %215  ;;  %v214_v42 = vsel %vm213_vm5, %v207_v30, %v212_v37 }
  0x97   : > { %v220_v38 = vrot.slane %v218_v35, 4  ;;  %v490_v39 = vcombine.low %v209_v29, %v218_v35  ;;  %v219_v40 = vrot.slane %v216_v36, 4 }
  0x99   : > { %v221_v41 = vsel %vm184_vm1, %v219_v40, %v220_v38  ;;  %513 = vmatpush3.bf16.msra.mxu1 %v490_v39 }
  0x9a   : > { %v223_v43 = vsel %vm222_vm6, %v216_v36, %v221_v41  ;;  %v227_v44 = vpop.permute.xlu1 %226  ;;  %v225_v45 = vpop.permute.xlu0 %224  ;;  %514 = vmatprep.subr.bf16.mxu1 %v558_v1 }
  0x9b   : > { %v488_v46 = vcombine.low %v214_v42, %v223_v43  ;;  %v489_v47 = vcombine.high %v214_v42, %v223_v43  ;;  %v229_v48 = vrot.slane %v227_v44, 4  ;;  %v228_v49 = vrot.slane %v225_v45, 4 }
  0x9d   : > { %330 = vmatprep.subr.bf16.mxu0 %v489_v47  ;;  %v230_v52 = vsel %vm184_vm1, %v228_v49, %v229_v48 }
  0x9e   : > { %v236_v50 = vpop.permute.xlu1 %235  ;;  %331 = vmatpush1.bf16.msra.mxu0 %v488_v46  ;;  %v234_v51 = vpop.permute.xlu0 %233  ;;  %v232_v57 = vsel %vm231_vm7, %v225_v45, %v230_v52 }
  0x9f   : > { %v238_v53 = vrot.slane %v236_v50, 4  ;;  %v493_v54 = vcombine.low %v227_v44, %v236_v50  ;;  %v237_v55 = vrot.slane %v234_v51, 4 }
  0xa1   : > { %v239_v56 = vsel %vm184_vm1, %v237_v55, %v238_v53  ;;  %515 = vmatpush3.bf16.msra.mxu1 %v493_v54 }
  0xa2   : > { %v241_v58 = vsel %vm240_vm8, %v234_v51, %v239_v56  ;;  %v245_v59 = vpop.permute.xlu1 %244  ;;  %v243_v60 = vpop.permute.xlu0 %242  ;;  %516 = vmatprep.subr.bf16.mxu1 %v558_v1 }
  0xa3   : > { %v491_v61 = vcombine.low %v232_v57, %v241_v58  ;;  %v492_v62 = vcombine.high %v232_v57, %v241_v58  ;;  %v247_v63 = vrot.slane %v245_v59, 4  ;;  %v496_v0 = vcombine.low %v245_v59, %v245_v59 }
  0xa4   : > { %v246_v2 = vrot.slane %v243_v60, 4 }
  0xa5   : > { %332 = vmatprep.subr.bf16.mxu0 %v492_v62  ;;  %v324_v3 = vsel %vm184_vm1, %v496_v0, 0 }
  0xa6   : > { %v248_v4 = vsel %vm184_vm1, %v246_v2, %v247_v63  ;;  %333 = vmatpush1.bf16.msra.mxu0 %v491_v61  ;;  %517 = vmatpush3.bf16.msra.mxu1 %v324_v3 }
  0xa7   : > { %v250_v6 = vsel %vm249_vm9, %v243_v60, %v248_v4 }
  0xa8   : > { %v494_v1 = vcombine.low %v250_v6, %v250_v6  ;;  %v495_v7 = vcombine.high %v250_v6, %v250_v6 }
  0xa9   : > { %519 = vmatmul.mubr.msk.bf16.vlgmr.msra.gmra.mrb[0].mxu1 %vm312_vm10, %v251_v5 }
  0xaa   : > { %497 = vmatprep.subr.msk.bf16.mxu0 %vm184_vm1, %v495_v7  ;;  %v318_v8 = vsel %vm184_vm1, %v494_v1, 0 }
  0xab   : > { %335 = vmatpush1.bf16.msra.mxu0 %v318_v8 }
  0xae   : > { %498 = vmatmul.mubr.msk.bf16.vlgmr.msra.gmra.mrb[0].mxu0 %vm312_vm10, %v251_v5 }
  0xb3   : > { %v256_v9 = vpop.permute.xlu0 %255 }
 0x17c   : > { %v401_v10 = vpop.f32.mrb[0].mxu1 }
 0x17d   : > { %v402_v11 = vadd.f32 %v401_v10, %v256_v9  ;;  %v520_v12 = vpop.f32.mrb[1].mxu1 }
 0x17e   : > { %v404_v13 = vpop.f32.mrb[2].mxu1 }
 0x17f   : > { %543 = vtanh.f32 %v402_v11  ;;  %v521_v14 = vpop.f32.mrb[3].mxu1 }
 0x181   : > { %v360_v15 = vpop.f32.mrb[0].mxu0 }
 0x182   : > { %v361_v16 = vadd.f32 %v360_v15, %v256_v9  ;;  %v362_v17 = vpop.f32.mrb[1].mxu0 }
 0x183   : > { %v363_v18 = vadd.f32 %v362_v17, %v256_v9  ;;  %v364_v19 = vpop.f32.mrb[2].mxu0 }
 0x184   : > { %545 = vtanh.f32 %v361_v16  ;;  %v365_v20 = vpop.f32.mrb[3].mxu0 }
 0x185   : > { %547 = vtanh.f32 %v363_v18 }
 0x189   : > { %v544_v21 = vpop.eup %543 }
 0x18a   : > { %v412_v22 = vmul.f32 0.039215688, %v544_v21 }
 0x18c   : > { %419 = vst.msk [vmem:[%s170_s5 + $0x8] sm:$0x7] %vm418_vm11, %v412_v22 }
 0x18e   : > { %v546_v23 = vpop.eup %545 }
 0x18f   : > { %v548_v24 = vpop.eup %547  ;;  %v410_v25 = vmul.f32 0.039215688, %v546_v23 }
 0x190   : > { %v411_v26 = vmul.f32 0.039215688, %v548_v24 }
 0x192   : > { %v415_v27 = vcombine.low %v410_v25, %v411_v26 }
 0x194   : > { %417 = vst [vmem:[%s170_s5] sm:$0x77] %v415_v27 }
 0x195 PF: > { %s13_s12 = sadd.s32 1, %s555_s12  }
 0x196   : > { %p10_p4 = scmp.ge.s32.totalorder %s13_s12, 4  }
 0x198   :  { %12 = sbr.rel (!%p10_p4) target bundleno = 1 (0x1), region = 62 }

</bundles_post_ra>
